<compile_context>
chip_gen: v6e
topology: v6e:2x2x1
jax: 0.10.0
libtpu: 0.0.40
codegen_flags: <defaults>
</compile_context>

<pallas_src>
import math

import jax
import jax.numpy as jnp
from jax import lax
from jax.experimental import pallas as pl
from jax.experimental.pallas import tpu as pltpu

INV_SQRT2 = 0.7071067811865475


# ---------------------------------------------------------------------------
# Single-qubit gate helpers on an (alpha, beta) complex pair stored as 4 real
# arrays.  `c`, `s` are cos(theta/2), sin(theta/2) (broadcastable).
# ---------------------------------------------------------------------------
def _rx(ar, ai, br, bi, c, s):
    return c * ar + s * bi, c * ai - s * br, s * ai + c * br, c * bi - s * ar


def _ry(ar, ai, br, bi, c, s):
    return c * ar - s * br, c * ai - s * bi, s * ar + c * br, s * ai + c * bi


def _rz(ar, ai, br, bi, c, s):
    return c * ar + s * ai, c * ai - s * ar, c * br - s * bi, c * bi + s * br


def _hadamard(ar, ai, br, bi):
    return ((ar + br) * INV_SQRT2, (ai + bi) * INV_SQRT2,
            (ar - br) * INV_SQRT2, (ai - bi) * INV_SQRT2)


# ---------------------------------------------------------------------------
# Host-side parameter slab packing (one DMA for all weights / constants).
# ---------------------------------------------------------------------------
def _pad_block(a, lanes):
    a = jnp.asarray(a, jnp.float32)
    r, c = a.shape
    rp = -(-r // 8) * 8                      # round rows up to a sublane tile
    return jnp.pad(a, ((0, rp - r), (0, lanes - c)))


def _build_slab(blocks, lanes):
    offs, padded, row = {}, [], 0
    for name, a in blocks:
        p = _pad_block(a, lanes)
        offs[name] = row
        padded.append(p)
        row += p.shape[0]
    return jnp.concatenate(padded, axis=0), offs


# ---------------------------------------------------------------------------
# Pallas kernel: entire sequence in one invocation; recurrence via fori_loop.
# ---------------------------------------------------------------------------
def _make_kernel(S, B, Q, H, offs):
    G4 = 4 * B  # four gates stacked along sublanes

    def kernel(xproj_ref, slab_ref, out_ref):
        # ---- hoisted constant loads from the packed slab (done once) -------
        def blk(name, rows, cols):
            r = offs[name]
            rp = -(-rows // 8) * 8           # blocks are 8-row padded in slab
            return slab_ref[r:r + rp, :][:rows, :cols]

        wc0 = blk("wc0", G4, Q)
        wc1 = blk("wc1", G4, Q)
        wc2 = blk("wc2", G4, Q)
        ws0 = blk("ws0", G4, Q)
        ws1 = blk("ws1", G4, Q)
        ws2 = blk("ws2", G4, Q)
        ge = blk("ge", G4, Q)                # e prescale (0.5 sigmoid / 1 tanh)
        w_in_h = blk("w_in_h", H, Q)         # (H, Q)
        w_out = blk("w_out", Q, H)           # (Q, H)
        b_out_s = blk("b_out_s", G4, H)      # per-gate prescaled bias
        ga = blk("ga", G4, H)                # gate affine: scale
        gb = blk("gb", G4, H)                # gate affine: offset
        fcb = blk("fc", 2, H)
        w_fc = fcb[0:1, :]                   # (1, H)
        b_fc = fcb[1:2, 0:1]                 # (1, 1)

        def step(t, carry):
            h, c = carry
            # clayer_in: x-part precomputed in the wrapper (xproj).
            y = (jnp.dot(h, w_in_h, preferred_element_type=jnp.float32)
                 + xproj_ref[t])                                  # (B, Q)

            # ---- exact classical sim of the entanglement-free VQC ----------
            # Rotation angle a = arctan(y[0]) from the FIRST batch row (shared
            # by all gates); RZ reuses ry_params (source-module quirks).
            z = y[0:1, :]
            cos_a = lax.rsqrt(1.0 + z * z)       # cos(arctan z)  (1 EUP)
            thalf = 0.5 * (1.0 + cos_a)
            inv = lax.rsqrt(thalf)               # single rsqrt replaces sqrt+div
            ch = thalf * inv                     # cos(a/2)
            sh = (0.5 * z) * cos_a * inv         # sin(a/2) = sin(a)/(2 cos(a/2))

            ys = jnp.concatenate([y, y, y, y], axis=0)            # (4B, Q)
            cc = jnp.cos(0.5 * ys)
            ss = jnp.sin(0.5 * ys)
            # AngleEmbedding (rotation='X') applied to |0>.
            ar, ai = cc, jnp.zeros_like(cc)
            br, bi = jnp.zeros_like(cc), -ss
            ar, ai, br, bi = _hadamard(ar, ai, br, bi)
            ar, ai, br, bi = _ry(ar, ai, br, bi, ch, sh)   # implicit (1,Q) bcast
            ar, ai, br, bi = _rz(ar, ai, br, bi, ch, sh)
            # ansatz (n_qlayers=1): RX/RY/RZ applied TWICE; CNOTs are dead code.
            for _ in range(2):
                ar, ai, br, bi = _rx(ar, ai, br, bi, wc0, ws0)
                ar, ai, br, bi = _ry(ar, ai, br, bi, wc1, ws1)
                ar, ai, br, bi = _rz(ar, ai, br, bi, wc2, ws2)
            e = ar * ar + ai * ai - (br * br + bi * bi)           # <PauliZ>

            # ---- fused clayer_out + single-tanh gate activations ------------
            # sigmoid(x) = 0.5*tanh(x/2)+0.5: the 0.5 prescale is folded into
            # ge / b_out_s host-side, so one tanh covers all four gates.
            pre = (jnp.dot(e * ge, w_out, preferred_element_type=jnp.float32)
                   + b_out_s)                                     # (4B, H)
            tt = jnp.tanh(pre)                                    # one EUP pass
            gates = tt * ga + gb                                  # one VPU fma
            f_t = gates[0 * B:1 * B]
            i_t = gates[1 * B:2 * B]
            g_t = gates[2 * B:3 * B]
            o_t = gates[3 * B:4 * B]
            c_new = f_t * c + i_t * g_t
            h_new = o_t * jnp.tanh(c_new)
            return h_new, c_new

        h0 = jnp.zeros((B, H), jnp.float32)
        c0 = jnp.zeros((B, H), jnp.float32)
        # Fully unrolled recurrence (serial dependence on h/c; 8 steps).
        h_fin, _ = lax.fori_loop(0, S, step, (h0, c0), unroll=True)

        # Final regression head: sigmoid(Linear(hn)).flatten()
        logits = jnp.sum(h_fin * w_fc, axis=-1, keepdims=True) + b_fc
        out_ref[...] = jax.nn.sigmoid(logits)

    return kernel


def qshallow_regression_lstm(x, params):
    """x: (batch, seq, num_sensors) float32 -> (batch,) float32."""
    B, S, F = x.shape
    Q = params["w_in"].shape[0]
    H = params["w_out"].shape[0]
    G4 = 4 * B
    L = max(H, Q)                                       # slab lane width

    x = x.astype(jnp.float32)
    # torch Linear stores weight as (out, in); split concat(h, x) projection.
    w_in = jnp.asarray(params["w_in"], jnp.float32)     # (Q, H+F)
    w_in_h = w_in[:, :H].T                              # (H, Q)
    w_in_x = w_in[:, H:]                                # (Q, F)
    b_in = jnp.asarray(params["b_in"], jnp.float32)     # (Q,)

    # Hoisted input projection for ALL timesteps: xproj[t] = x_t @ W_in_x^T + b
    xproj = (jnp.einsum("bsf,qf->sbq", x, w_in_x,
                        precision=lax.Precision.HIGHEST)
             + b_in.reshape(1, 1, Q))                   # (S, B, Q)

    # VQC ansatz: cos/sin of half-angles, stacked (gate, batch) along sublanes
    # so a single (4B, Q) elementwise pass covers all four gates.
    vqc = jnp.asarray(params["vqc"], jnp.float32)       # (4, 3, Q)
    half = 0.5 * jnp.transpose(vqc, (1, 0, 2))          # (3, 4, Q)
    wc = jnp.repeat(jnp.cos(half), B, axis=1)           # (3, 4B, Q)
    ws = jnp.repeat(jnp.sin(half), B, axis=1)

    # Gate activation constants: sigmoid gates (f,i,o) get the 0.5 prescale so
    # one tanh serves all four gates; tanh gate (g) passes through.
    gate_scale = jnp.array([0.5, 0.5, 1.0, 0.5], jnp.float32)  # f, i, g, o
    gate_off = jnp.array([0.5, 0.5, 0.0, 0.5], jnp.float32)
    col = jnp.repeat(gate_scale, B)[:, None]                    # (4B, 1)
    ge = jnp.broadcast_to(col, (G4, Q))
    ga = jnp.broadcast_to(col, (G4, H))
    gb = jnp.broadcast_to(jnp.repeat(gate_off, B)[:, None], (G4, H))

    w_out = jnp.asarray(params["w_out"], jnp.float32).T         # (Q, H)
    b_out = jnp.asarray(params["b_out"], jnp.float32).reshape(1, H)
    b_out_s = col * b_out                                       # (4B, H)
    w_fc = jnp.asarray(params["w_fc"], jnp.float32).reshape(1, H)
    b_fc = jnp.asarray(params["b_fc"], jnp.float32).reshape(1, 1)
    fc_block = jnp.concatenate(
        [w_fc, jnp.pad(b_fc, ((0, 0), (0, H - 1)))], axis=0)    # (2, H)

    # One packed, lane-padded parameter slab -> one DMA for all constants.
    blocks = [("wc0", wc[0]), ("wc1", wc[1]), ("wc2", wc[2]),
              ("ws0", ws[0]), ("ws1", ws[1]), ("ws2", ws[2]),
              ("ge", ge), ("w_in_h", w_in_h), ("w_out", w_out),
              ("b_out_s", b_out_s), ("ga", ga), ("gb", gb),
              ("fc", fc_block)]
    slab, offs = _build_slab(blocks, L)
    R = slab.shape[0]

    kernel = _make_kernel(S, B, Q, H, offs)

    out = pl.pallas_call(
        kernel,
        out_shape=jax.ShapeDtypeStruct((B, 1), jnp.float32),
        grid_spec=pltpu.PrefetchScalarGridSpec(
            num_scalar_prefetch=0,
            grid=(1,),                                          # single step
            in_specs=[
                pl.BlockSpec((S, B, Q), lambda i: (0, 0, 0)),   # xproj (whole)
                pl.BlockSpec((R, L), lambda i: (0, 0)),         # packed slab
            ],
            out_specs=pl.BlockSpec((B, 1), lambda i: (0, 0)),
        ),
        compiler_params=pltpu.CompilerParams(
            dimension_semantics=("arbitrary",)),
    )(xproj, slab)
    return out.reshape(B)


# ---------------------------------------------------------------------------
# Pure-JAX reference (mirrors the torch forward, uses arctan directly).
# ---------------------------------------------------------------------------
def _apply_vqc_ref(y, w):
    c = jnp.cos(0.5 * y)
    s = jnp.sin(0.5 * y)
    ar, ai, br, bi = c, jnp.zeros_like(c), jnp.zeros_like(c), -s
    ar, ai, br, bi = _hadamard(ar, ai, br, bi)
    a = jnp.arctan(y[0:1, :])
    ch, sh = jnp.cos(0.5 * a), jnp.sin(0.5 * a)
    ar, ai, br, bi = _ry(ar, ai, br, bi, ch, sh)
    ar, ai, br, bi = _rz(ar, ai, br, bi, ch, sh)
    for _ in range(2):
        for rot, k in ((_rx, 0), (_ry, 1), (_rz, 2)):
            th = w[k:k + 1, :]
            ar, ai, br, bi = rot(ar, ai, br, bi,
                                 jnp.cos(0.5 * th), jnp.sin(0.5 * th))
    return ar * ar + ai * ai - (br * br + bi * bi)


def reference_forward(x, params):
    B, S, F = x.shape
    H = params["w_out"].shape[0]
    h = jnp.zeros((B, H), jnp.float32)
    c = jnp.zeros((B, H), jnp.float32)
    for t in range(S):
        x_t = x[:, t, :]
        v = jnp.concatenate([h, x_t], axis=1)
        y = v @ params["w_in"].T + params["b_in"]

        def clayer_out(g):
            e = _apply_vqc_ref(y, params["vqc"][g])
            return e @ params["w_out"].T + params["b_out"]

        f = jax.nn.sigmoid(clayer_out(0))
        i = jax.nn.sigmoid(clayer_out(1))
        g_ = jnp.tanh(clayer_out(2))
        o = jax.nn.sigmoid(clayer_out(3))
        c = f * c + i * g_
        h = o * jnp.tanh(c)
    out = (h @ params["w_fc"].T + params["b_fc"]).reshape(-1)
    return jax.nn.sigmoid(out)


# ---------------------------------------------------------------------------
# Deterministic parameter init (shapes from the module __init__).
# ---------------------------------------------------------------------------
def init_params(key, num_sensors, hidden_units, n_qubits):
    concat = num_sensors + hidden_units
    ks = jax.random.split(key, 8)

    def lin_w(k, out_f, in_f):
        bound = 1.0 / math.sqrt(in_f)
        return jax.random.uniform(k, (out_f, in_f), jnp.float32, -bound, bound)

    def lin_b(k, out_f, in_f):
        bound = 1.0 / math.sqrt(in_f)
        return jax.random.uniform(k, (out_f,), jnp.float32, -bound, bound)

    return {
        "w_in": lin_w(ks[0], n_qubits, concat),           # clayer_in
        "b_in": lin_b(ks[1], n_qubits, concat),
        # VQC weights for forget/input/update/output, (n_qlayers=1, 3, Q) each
        # -> packed as (4, 3, Q); TorchLayer default init is U[0, 2*pi).
        "vqc": jax.random.uniform(ks[2], (4, 3, n_qubits), jnp.float32,
                                  0.0, 2.0 * math.pi),
        "w_out": lin_w(ks[3], hidden_units, n_qubits),    # clayer_out
        "b_out": lin_b(ks[4], hidden_units, n_qubits),
        "w_fc": lin_w(ks[5], 1, hidden_units),            # final Linear
        "b_fc": lin_b(ks[6], 1, hidden_units),
    }


if __name__ == "__main__":
    BATCH, SEQ, NUM_SENSORS = 2, 8, 4
    HIDDEN_UNITS, N_QUBITS = 32, 4

    key = jax.random.PRNGKey(0)
    k_x, k_p = jax.random.split(key)
    x = jax.random.normal(k_x, (BATCH, SEQ, NUM_SENSORS), jnp.float32)
    params = init_params(k_p, NUM_SENSORS, HIDDEN_UNITS, N_QUBITS)

    out = qshallow_regression_lstm(x, params)
    out = jax.block_until_ready(out)

    ref = jax.block_until_ready(reference_forward(x, params))
    assert out.shape == (BATCH,)
    assert jnp.allclose(out, ref, atol=2e-3, rtol=1e-3), (out, ref)
    print("KERNEL_OK")
</pallas_src>

<mosaic_0001>
module attributes {stable_mosaic.version = 11 : i64} {
  func.func @kernel(%arg0: i32, %arg1: memref<8x2x4xf32, #tpu.memory_space<vmem>>, %arg2: memref<128x32xf32, #tpu.memory_space<vmem>>, %arg3: memref<2x1xf32, #tpu.memory_space<vmem>>) attributes {dimension_semantics = [#tpu.dimension_semantics<arbitrary>], iteration_bounds = array<i64: 1>, scalar_prefetch = 0 : i64, scratch_operands = 0 : i64, tpu.core_type = #tpu.core_type<tc>, window_params = [{pipeline_mode = #tpu.pipeline_mode<synchronous>, transform_indices = @transform_0, window_bounds = array<i64: 8, 2, 4>}, {pipeline_mode = #tpu.pipeline_mode<synchronous>, transform_indices = @transform_1, window_bounds = array<i64: 128, 32>}, {pipeline_mode = #tpu.pipeline_mode<synchronous>, transform_indices = @transform_2, window_bounds = array<i64: 2, 1>}]} {
    %c0 = arith.constant 0 : index
    %c0_0 = arith.constant 0 : index
    %0 = vector.load %arg2[%c0, %c0_0] : memref<128x32xf32, #tpu.memory_space<vmem>>, vector<8x32xf32>
    %1 = vector.extract_strided_slice %0 {offsets = [0, 0], sizes = [8, 4], strides = [1, 1]} : vector<8x32xf32> to vector<8x4xf32>
    %c8 = arith.constant 8 : index
    %c0_1 = arith.constant 0 : index
    %2 = vector.load %arg2[%c8, %c0_1] : memref<128x32xf32, #tpu.memory_space<vmem>>, vector<8x32xf32>
    %3 = vector.extract_strided_slice %2 {offsets = [0, 0], sizes = [8, 4], strides = [1, 1]} : vector<8x32xf32> to vector<8x4xf32>
    %c16 = arith.constant 16 : index
    %c0_2 = arith.constant 0 : index
    %4 = vector.load %arg2[%c16, %c0_2] : memref<128x32xf32, #tpu.memory_space<vmem>>, vector<8x32xf32>
    %5 = vector.extract_strided_slice %4 {offsets = [0, 0], sizes = [8, 4], strides = [1, 1]} : vector<8x32xf32> to vector<8x4xf32>
    %c24 = arith.constant 24 : index
    %c0_3 = arith.constant 0 : index
    %6 = vector.load %arg2[%c24, %c0_3] : memref<128x32xf32, #tpu.memory_space<vmem>>, vector<8x32xf32>
    %7 = vector.extract_strided_slice %6 {offsets = [0, 0], sizes = [8, 4], strides = [1, 1]} : vector<8x32xf32> to vector<8x4xf32>
    %c32 = arith.constant 32 : index
    %c0_4 = arith.constant 0 : index
    %8 = vector.load %arg2[%c32, %c0_4] : memref<128x32xf32, #tpu.memory_space<vmem>>, vector<8x32xf32>
    %9 = vector.extract_strided_slice %8 {offsets = [0, 0], sizes = [8, 4], strides = [1, 1]} : vector<8x32xf32> to vector<8x4xf32>
    %c40 = arith.constant 40 : index
    %c0_5 = arith.constant 0 : index
    %10 = vector.load %arg2[%c40, %c0_5] : memref<128x32xf32, #tpu.memory_space<vmem>>, vector<8x32xf32>
    %11 = vector.extract_strided_slice %10 {offsets = [0, 0], sizes = [8, 4], strides = [1, 1]} : vector<8x32xf32> to vector<8x4xf32>
    %c48 = arith.constant 48 : index
    %c0_6 = arith.constant 0 : index
    %12 = vector.load %arg2[%c48, %c0_6] : memref<128x32xf32, #tpu.memory_space<vmem>>, vector<8x32xf32>
    %13 = vector.extract_strided_slice %12 {offsets = [0, 0], sizes = [8, 4], strides = [1, 1]} : vector<8x32xf32> to vector<8x4xf32>
    %c56 = arith.constant 56 : index
    %c0_7 = arith.constant 0 : index
    %14 = vector.load %arg2[%c56, %c0_7] : memref<128x32xf32, #tpu.memory_space<vmem>>, vector<32x32xf32>
    %15 = vector.extract_strided_slice %14 {offsets = [0, 0], sizes = [32, 4], strides = [1, 1]} : vector<32x32xf32> to vector<32x4xf32>
    %c88 = arith.constant 88 : index
    %c0_8 = arith.constant 0 : index
    %16 = vector.load %arg2[%c88, %c0_8] : memref<128x32xf32, #tpu.memory_space<vmem>>, vector<8x32xf32>
    %17 = vector.extract_strided_slice %16 {offsets = [0, 0], sizes = [4, 32], strides = [1, 1]} : vector<8x32xf32> to vector<4x32xf32>
    %c96 = arith.constant 96 : index
    %c0_9 = arith.constant 0 : index
    %18 = vector.load %arg2[%c96, %c0_9] : memref<128x32xf32, #tpu.memory_space<vmem>>, vector<8x32xf32>
    %c104 = arith.constant 104 : index
    %c0_10 = arith.constant 0 : index
    %19 = vector.load %arg2[%c104, %c0_10] : memref<128x32xf32, #tpu.memory_space<vmem>>, vector<8x32xf32>
    %c112 = arith.constant 112 : index
    %c0_11 = arith.constant 0 : index
    %20 = vector.load %arg2[%c112, %c0_11] : memref<128x32xf32, #tpu.memory_space<vmem>>, vector<8x32xf32>
    %c120 = arith.constant 120 : index
    %c0_12 = arith.constant 0 : index
    %21 = vector.load %arg2[%c120, %c0_12] : memref<128x32xf32, #tpu.memory_space<vmem>>, vector<8x32xf32>
    %22 = vector.extract_strided_slice %21 {offsets = [0, 0], sizes = [2, 32], strides = [1, 1]} : vector<8x32xf32> to vector<2x32xf32>
    %23 = vector.extract_strided_slice %22 {offsets = [0, 0], sizes = [1, 32], strides = [1, 1]} : vector<2x32xf32> to vector<1x32xf32>
    %24 = vector.extract_strided_slice %22 {offsets = [1, 0], sizes = [1, 1], strides = [1, 1]} : vector<2x32xf32> to vector<1x1xf32>
    %cst = arith.constant 0.000000e+00 : f32
    %25 = vector.broadcast %cst : f32 to vector<2x32xf32>
    %cst_13 = arith.constant 0.000000e+00 : f32
    %26 = vector.broadcast %cst_13 : f32 to vector<2x32xf32>
    %c0_i32 = arith.constant 0 : i32
    %cst_14 = arith.constant dense<0.000000e+00> : vector<2x4xf32>
    %27 = tpu.matmul %25, %15, %cst_14 {dimension_numbers = #tpu.dot_dimension_numbers<[1], [0], [0], [1], [0, 0, 1, 1], [], []>} : vector<2x32xf32>, vector<32x4xf32>, vector<2x4xf32> -> vector<2x4xf32>
    %28 = arith.index_cast %c0_i32 : i32 to index
    %c0_15 = arith.constant 0 : index
    %c0_16 = arith.constant 0 : index
    %29 = vector.load %arg1[%28, %c0_15, %c0_16] : memref<8x2x4xf32, #tpu.memory_space<vmem>>, vector<1x2x4xf32>
    %30 = vector.shape_cast %29 : vector<1x2x4xf32> to vector<2x4xf32>
    %31 = arith.addf %27, %30 : vector<2x4xf32>
    %32 = vector.extract_strided_slice %31 {offsets = [0, 0], sizes = [1, 4], strides = [1, 1]} : vector<2x4xf32> to vector<1x4xf32>
    %33 = arith.mulf %32, %32 : vector<1x4xf32>
    %cst_17 = arith.constant 1.000000e+00 : f32
    %34 = vector.broadcast %cst_17 : f32 to vector<1x4xf32>
    %35 = arith.addf %34, %33 : vector<1x4xf32>
    %36 = math.rsqrt %35 : vector<1x4xf32>
    %cst_18 = arith.constant 1.000000e+00 : f32
    %37 = vector.broadcast %cst_18 : f32 to vector<1x4xf32>
    %38 = arith.addf %37, %36 : vector<1x4xf32>
    %cst_19 = arith.constant 5.000000e-01 : f32
    %39 = vector.broadcast %cst_19 : f32 to vector<1x4xf32>
    %40 = arith.mulf %39, %38 : vector<1x4xf32>
    %41 = math.rsqrt %40 : vector<1x4xf32>
    %42 = arith.mulf %40, %41 : vector<1x4xf32>
    %cst_20 = arith.constant 5.000000e-01 : f32
    %43 = vector.broadcast %cst_20 : f32 to vector<1x4xf32>
    %44 = arith.mulf %43, %32 : vector<1x4xf32>
    %45 = arith.mulf %44, %36 : vector<1x4xf32>
    %46 = arith.mulf %45, %41 : vector<1x4xf32>
    %47 = tpu.concatenate %31, %31, %31, %31 in 0 : vector<2x4xf32>, vector<2x4xf32>, vector<2x4xf32>, vector<2x4xf32> -> vector<8x4xf32>
    %cst_21 = arith.constant 5.000000e-01 : f32
    %48 = vector.broadcast %cst_21 : f32 to vector<8x4xf32>
    %49 = arith.mulf %48, %47 : vector<8x4xf32>
    %50 = math.cos %49 : vector<8x4xf32>
    %cst_22 = arith.constant 5.000000e-01 : f32
    %51 = vector.broadcast %cst_22 : f32 to vector<8x4xf32>
    %52 = arith.mulf %51, %47 : vector<8x4xf32>
    %53 = math.sin %52 : vector<8x4xf32>
    %cst_23 = arith.constant 0.000000e+00 : f32
    %54 = vector.broadcast %cst_23 : f32 to vector<8x4xf32>
    %cst_24 = arith.constant 0.000000e+00 : f32
    %55 = vector.broadcast %cst_24 : f32 to vector<8x4xf32>
    %cst_25 = arith.constant 0.000000e+00 : f32
    %56 = vector.broadcast %cst_25 : f32 to vector<8x4xf32>
    %57 = arith.subf %56, %53 : vector<8x4xf32>
    %58 = arith.addf %50, %55 : vector<8x4xf32>
    %cst_26 = arith.constant 0.707106769 : f32
    %59 = vector.broadcast %cst_26 : f32 to vector<8x4xf32>
    %60 = arith.mulf %58, %59 : vector<8x4xf32>
    %61 = arith.addf %54, %57 : vector<8x4xf32>
    %cst_27 = arith.constant 0.707106769 : f32
    %62 = vector.broadcast %cst_27 : f32 to vector<8x4xf32>
    %63 = arith.mulf %61, %62 : vector<8x4xf32>
    %64 = arith.subf %50, %55 : vector<8x4xf32>
    %cst_28 = arith.constant 0.707106769 : f32
    %65 = vector.broadcast %cst_28 : f32 to vector<8x4xf32>
    %66 = arith.mulf %64, %65 : vector<8x4xf32>
    %67 = arith.subf %54, %57 : vector<8x4xf32>
    %cst_29 = arith.constant 0.707106769 : f32
    %68 = vector.broadcast %cst_29 : f32 to vector<8x4xf32>
    %69 = arith.mulf %67, %68 : vector<8x4xf32>
    %70 = vector.broadcast %42 : vector<1x4xf32> to vector<8x4xf32>
    %71 = arith.mulf %70, %60 : vector<8x4xf32>
    %72 = vector.broadcast %46 : vector<1x4xf32> to vector<8x4xf32>
    %73 = arith.mulf %72, %66 : vector<8x4xf32>
    %74 = arith.subf %71, %73 : vector<8x4xf32>
    %75 = vector.broadcast %42 : vector<1x4xf32> to vector<8x4xf32>
    %76 = arith.mulf %75, %63 : vector<8x4xf32>
    %77 = vector.broadcast %46 : vector<1x4xf32> to vector<8x4xf32>
    %78 = arith.mulf %77, %69 : vector<8x4xf32>
    %79 = arith.subf %76, %78 : vector<8x4xf32>
    %80 = vector.broadcast %46 : vector<1x4xf32> to vector<8x4xf32>
    %81 = arith.mulf %80, %60 : vector<8x4xf32>
    %82 = vector.broadcast %42 : vector<1x4xf32> to vector<8x4xf32>
    %83 = arith.mulf %82, %66 : vector<8x4xf32>
    %84 = arith.addf %81, %83 : vector<8x4xf32>
    %85 = vector.broadcast %46 : vector<1x4xf32> to vector<8x4xf32>
    %86 = arith.mulf %85, %63 : vector<8x4xf32>
    %87 = vector.broadcast %42 : vector<1x4xf32> to vector<8x4xf32>
    %88 = arith.mulf %87, %69 : vector<8x4xf32>
    %89 = arith.addf %86, %88 : vector<8x4xf32>
    %90 = vector.broadcast %42 : vector<1x4xf32> to vector<8x4xf32>
    %91 = arith.mulf %90, %74 : vector<8x4xf32>
    %92 = vector.broadcast %46 : vector<1x4xf32> to vector<8x4xf32>
    %93 = arith.mulf %92, %79 : vector<8x4xf32>
    %94 = arith.addf %91, %93 : vector<8x4xf32>
    %95 = vector.broadcast %42 : vector<1x4xf32> to vector<8x4xf32>
    %96 = arith.mulf %95, %79 : vector<8x4xf32>
    %97 = vector.broadcast %46 : vector<1x4xf32> to vector<8x4xf32>
    %98 = arith.mulf %97, %74 : vector<8x4xf32>
    %99 = arith.subf %96, %98 : vector<8x4xf32>
    %100 = vector.broadcast %42 : vector<1x4xf32> to vector<8x4xf32>
    %101 = arith.mulf %100, %84 : vector<8x4xf32>
    %102 = vector.broadcast %46 : vector<1x4xf32> to vector<8x4xf32>
    %103 = arith.mulf %102, %89 : vector<8x4xf32>
    %104 = arith.subf %101, %103 : vector<8x4xf32>
    %105 = vector.broadcast %42 : vector<1x4xf32> to vector<8x4xf32>
    %106 = arith.mulf %105, %89 : vector<8x4xf32>
    %107 = vector.broadcast %46 : vector<1x4xf32> to vector<8x4xf32>
    %108 = arith.mulf %107, %84 : vector<8x4xf32>
    %109 = arith.addf %106, %108 : vector<8x4xf32>
    %110 = arith.mulf %1, %94 : vector<8x4xf32>
    %111 = arith.mulf %7, %109 : vector<8x4xf32>
    %112 = arith.addf %110, %111 : vector<8x4xf32>
    %113 = arith.mulf %1, %99 : vector<8x4xf32>
    %114 = arith.mulf %7, %104 : vector<8x4xf32>
    %115 = arith.subf %113, %114 : vector<8x4xf32>
    %116 = arith.mulf %7, %99 : vector<8x4xf32>
    %117 = arith.mulf %1, %104 : vector<8x4xf32>
    %118 = arith.addf %116, %117 : vector<8x4xf32>
    %119 = arith.mulf %1, %109 : vector<8x4xf32>
    %120 = arith.mulf %7, %94 : vector<8x4xf32>
    %121 = arith.subf %119, %120 : vector<8x4xf32>
    %122 = arith.mulf %3, %112 : vector<8x4xf32>
    %123 = arith.mulf %9, %118 : vector<8x4xf32>
    %124 = arith.subf %122, %123 : vector<8x4xf32>
    %125 = arith.mulf %3, %115 : vector<8x4xf32>
    %126 = arith.mulf %9, %121 : vector<8x4xf32>
    %127 = arith.subf %125, %126 : vector<8x4xf32>
    %128 = arith.mulf %9, %112 : vector<8x4xf32>
    %129 = arith.mulf %3, %118 : vector<8x4xf32>
    %130 = arith.addf %128, %129 : vector<8x4xf32>
    %131 = arith.mulf %9, %115 : vector<8x4xf32>
    %132 = arith.mulf %3, %121 : vector<8x4xf32>
    %133 = arith.addf %131, %132 : vector<8x4xf32>
    %134 = arith.mulf %5, %124 : vector<8x4xf32>
    %135 = arith.mulf %11, %127 : vector<8x4xf32>
    %136 = arith.addf %134, %135 : vector<8x4xf32>
    %137 = arith.mulf %5, %127 : vector<8x4xf32>
    %138 = arith.mulf %11, %124 : vector<8x4xf32>
    %139 = arith.subf %137, %138 : vector<8x4xf32>
    %140 = arith.mulf %5, %130 : vector<8x4xf32>
    %141 = arith.mulf %11, %133 : vector<8x4xf32>
    %142 = arith.subf %140, %141 : vector<8x4xf32>
    %143 = arith.mulf %5, %133 : vector<8x4xf32>
    %144 = arith.mulf %11, %130 : vector<8x4xf32>
    %145 = arith.addf %143, %144 : vector<8x4xf32>
    %146 = arith.mulf %1, %136 : vector<8x4xf32>
    %147 = arith.mulf %7, %145 : vector<8x4xf32>
    %148 = arith.addf %146, %147 : vector<8x4xf32>
    %149 = arith.mulf %1, %139 : vector<8x4xf32>
    %150 = arith.mulf %7, %142 : vector<8x4xf32>
    %151 = arith.subf %149, %150 : vector<8x4xf32>
    %152 = arith.mulf %7, %139 : vector<8x4xf32>
    %153 = arith.mulf %1, %142 : vector<8x4xf32>
    %154 = arith.addf %152, %153 : vector<8x4xf32>
    %155 = arith.mulf %1, %145 : vector<8x4xf32>
    %156 = arith.mulf %7, %136 : vector<8x4xf32>
    %157 = arith.subf %155, %156 : vector<8x4xf32>
    %158 = arith.mulf %3, %148 : vector<8x4xf32>
    %159 = arith.mulf %9, %154 : vector<8x4xf32>
    %160 = arith.subf %158, %159 : vector<8x4xf32>
    %161 = arith.mulf %3, %151 : vector<8x4xf32>
    %162 = arith.mulf %9, %157 : vector<8x4xf32>
    %163 = arith.subf %161, %162 : vector<8x4xf32>
    %164 = arith.mulf %9, %148 : vector<8x4xf32>
    %165 = arith.mulf %3, %154 : vector<8x4xf32>
    %166 = arith.addf %164, %165 : vector<8x4xf32>
    %167 = arith.mulf %9, %151 : vector<8x4xf32>
    %168 = arith.mulf %3, %157 : vector<8x4xf32>
    %169 = arith.addf %167, %168 : vector<8x4xf32>
    %170 = arith.mulf %5, %160 : vector<8x4xf32>
    %171 = arith.mulf %11, %163 : vector<8x4xf32>
    %172 = arith.addf %170, %171 : vector<8x4xf32>
    %173 = arith.mulf %5, %163 : vector<8x4xf32>
    %174 = arith.mulf %11, %160 : vector<8x4xf32>
    %175 = arith.subf %173, %174 : vector<8x4xf32>
    %176 = arith.mulf %5, %166 : vector<8x4xf32>
    %177 = arith.mulf %11, %169 : vector<8x4xf32>
    %178 = arith.subf %176, %177 : vector<8x4xf32>
    %179 = arith.mulf %5, %169 : vector<8x4xf32>
    %180 = arith.mulf %11, %166 : vector<8x4xf32>
    %181 = arith.addf %179, %180 : vector<8x4xf32>
    %182 = arith.mulf %172, %172 : vector<8x4xf32>
    %183 = arith.mulf %175, %175 : vector<8x4xf32>
    %184 = arith.addf %182, %183 : vector<8x4xf32>
    %185 = arith.mulf %178, %178 : vector<8x4xf32>
    %186 = arith.mulf %181, %181 : vector<8x4xf32>
    %187 = arith.addf %185, %186 : vector<8x4xf32>
    %188 = arith.subf %184, %187 : vector<8x4xf32>
    %189 = arith.mulf %188, %13 : vector<8x4xf32>
    %cst_30 = arith.constant dense<0.000000e+00> : vector<8x32xf32>
    %190 = tpu.matmul %189, %17, %cst_30 {dimension_numbers = #tpu.dot_dimension_numbers<[1], [0], [0], [1], [0, 0, 1, 1], [], []>} : vector<8x4xf32>, vector<4x32xf32>, vector<8x32xf32> -> vector<8x32xf32>
    %191 = arith.addf %190, %18 : vector<8x32xf32>
    %192 = math.tanh %191 : vector<8x32xf32>
    %193 = arith.mulf %192, %19 : vector<8x32xf32>
    %194 = arith.addf %193, %20 : vector<8x32xf32>
    %195 = vector.extract_strided_slice %194 {offsets = [0, 0], sizes = [2, 32], strides = [1, 1]} : vector<8x32xf32> to vector<2x32xf32>
    %196 = vector.extract_strided_slice %194 {offsets = [2, 0], sizes = [2, 32], strides = [1, 1]} : vector<8x32xf32> to vector<2x32xf32>
    %197 = vector.extract_strided_slice %194 {offsets = [4, 0], sizes = [2, 32], strides = [1, 1]} : vector<8x32xf32> to vector<2x32xf32>
    %198 = vector.extract_strided_slice %194 {offsets = [6, 0], sizes = [2, 32], strides = [1, 1]} : vector<8x32xf32> to vector<2x32xf32>
    %199 = arith.mulf %195, %26 : vector<2x32xf32>
    %200 = arith.mulf %196, %197 : vector<2x32xf32>
    %201 = arith.addf %199, %200 : vector<2x32xf32>
    %202 = math.tanh %201 : vector<2x32xf32>
    %203 = arith.mulf %198, %202 : vector<2x32xf32>
    %c1_i32 = arith.constant 1 : i32
    %cst_31 = arith.constant dense<0.000000e+00> : vector<2x4xf32>
    %204 = tpu.matmul %203, %15, %cst_31 {dimension_numbers = #tpu.dot_dimension_numbers<[1], [0], [0], [1], [0, 0, 1, 1], [], []>} : vector<2x32xf32>, vector<32x4xf32>, vector<2x4xf32> -> vector<2x4xf32>
    %205 = arith.index_cast %c1_i32 : i32 to index
    %c0_32 = arith.constant 0 : index
    %c0_33 = arith.constant 0 : index
    %206 = vector.load %arg1[%205, %c0_32, %c0_33] : memref<8x2x4xf32, #tpu.memory_space<vmem>>, vector<1x2x4xf32>
    %207 = vector.shape_cast %206 : vector<1x2x4xf32> to vector<2x4xf32>
    %208 = arith.addf %204, %207 : vector<2x4xf32>
    %209 = vector.extract_strided_slice %208 {offsets = [0, 0], sizes = [1, 4], strides = [1, 1]} : vector<2x4xf32> to vector<1x4xf32>
    %210 = arith.mulf %209, %209 : vector<1x4xf32>
    %cst_34 = arith.constant 1.000000e+00 : f32
    %211 = vector.broadcast %cst_34 : f32 to vector<1x4xf32>
    %212 = arith.addf %211, %210 : vector<1x4xf32>
    %213 = math.rsqrt %212 : vector<1x4xf32>
    %cst_35 = arith.constant 1.000000e+00 : f32
    %214 = vector.broadcast %cst_35 : f32 to vector<1x4xf32>
    %215 = arith.addf %214, %213 : vector<1x4xf32>
    %cst_36 = arith.constant 5.000000e-01 : f32
    %216 = vector.broadcast %cst_36 : f32 to vector<1x4xf32>
    %217 = arith.mulf %216, %215 : vector<1x4xf32>
    %218 = math.rsqrt %217 : vector<1x4xf32>
    %219 = arith.mulf %217, %218 : vector<1x4xf32>
    %cst_37 = arith.constant 5.000000e-01 : f32
    %220 = vector.broadcast %cst_37 : f32 to vector<1x4xf32>
    %221 = arith.mulf %220, %209 : vector<1x4xf32>
    %222 = arith.mulf %221, %213 : vector<1x4xf32>
    %223 = arith.mulf %222, %218 : vector<1x4xf32>
    %224 = tpu.concatenate %208, %208, %208, %208 in 0 : vector<2x4xf32>, vector<2x4xf32>, vector<2x4xf32>, vector<2x4xf32> -> vector<8x4xf32>
    %cst_38 = arith.constant 5.000000e-01 : f32
    %225 = vector.broadcast %cst_38 : f32 to vector<8x4xf32>
    %226 = arith.mulf %225, %224 : vector<8x4xf32>
    %227 = math.cos %226 : vector<8x4xf32>
    %cst_39 = arith.constant 5.000000e-01 : f32
    %228 = vector.broadcast %cst_39 : f32 to vector<8x4xf32>
    %229 = arith.mulf %228, %224 : vector<8x4xf32>
    %230 = math.sin %229 : vector<8x4xf32>
    %cst_40 = arith.constant 0.000000e+00 : f32
    %231 = vector.broadcast %cst_40 : f32 to vector<8x4xf32>
    %cst_41 = arith.constant 0.000000e+00 : f32
    %232 = vector.broadcast %cst_41 : f32 to vector<8x4xf32>
    %cst_42 = arith.constant 0.000000e+00 : f32
    %233 = vector.broadcast %cst_42 : f32 to vector<8x4xf32>
    %234 = arith.subf %233, %230 : vector<8x4xf32>
    %235 = arith.addf %227, %232 : vector<8x4xf32>
    %cst_43 = arith.constant 0.707106769 : f32
    %236 = vector.broadcast %cst_43 : f32 to vector<8x4xf32>
    %237 = arith.mulf %235, %236 : vector<8x4xf32>
    %238 = arith.addf %231, %234 : vector<8x4xf32>
    %cst_44 = arith.constant 0.707106769 : f32
    %239 = vector.broadcast %cst_44 : f32 to vector<8x4xf32>
    %240 = arith.mulf %238, %239 : vector<8x4xf32>
    %241 = arith.subf %227, %232 : vector<8x4xf32>
    %cst_45 = arith.constant 0.707106769 : f32
    %242 = vector.broadcast %cst_45 : f32 to vector<8x4xf32>
    %243 = arith.mulf %241, %242 : vector<8x4xf32>
    %244 = arith.subf %231, %234 : vector<8x4xf32>
    %cst_46 = arith.constant 0.707106769 : f32
    %245 = vector.broadcast %cst_46 : f32 to vector<8x4xf32>
    %246 = arith.mulf %244, %245 : vector<8x4xf32>
    %247 = vector.broadcast %219 : vector<1x4xf32> to vector<8x4xf32>
    %248 = arith.mulf %247, %237 : vector<8x4xf32>
    %249 = vector.broadcast %223 : vector<1x4xf32> to vector<8x4xf32>
    %250 = arith.mulf %249, %243 : vector<8x4xf32>
    %251 = arith.subf %248, %250 : vector<8x4xf32>
    %252 = vector.broadcast %219 : vector<1x4xf32> to vector<8x4xf32>
    %253 = arith.mulf %252, %240 : vector<8x4xf32>
    %254 = vector.broadcast %223 : vector<1x4xf32> to vector<8x4xf32>
    %255 = arith.mulf %254, %246 : vector<8x4xf32>
    %256 = arith.subf %253, %255 : vector<8x4xf32>
    %257 = vector.broadcast %223 : vector<1x4xf32> to vector<8x4xf32>
    %258 = arith.mulf %257, %237 : vector<8x4xf32>
    %259 = vector.broadcast %219 : vector<1x4xf32> to vector<8x4xf32>
    %260 = arith.mulf %259, %243 : vector<8x4xf32>
    %261 = arith.addf %258, %260 : vector<8x4xf32>
    %262 = vector.broadcast %223 : vector<1x4xf32> to vector<8x4xf32>
    %263 = arith.mulf %262, %240 : vector<8x4xf32>
    %264 = vector.broadcast %219 : vector<1x4xf32> to vector<8x4xf32>
    %265 = arith.mulf %264, %246 : vector<8x4xf32>
    %266 = arith.addf %263, %265 : vector<8x4xf32>
    %267 = vector.broadcast %219 : vector<1x4xf32> to vector<8x4xf32>
    %268 = arith.mulf %267, %251 : vector<8x4xf32>
    %269 = vector.broadcast %223 : vector<1x4xf32> to vector<8x4xf32>
    %270 = arith.mulf %269, %256 : vector<8x4xf32>
    %271 = arith.addf %268, %270 : vector<8x4xf32>
    %272 = vector.broadcast %219 : vector<1x4xf32> to vector<8x4xf32>
    %273 = arith.mulf %272, %256 : vector<8x4xf32>
    %274 = vector.broadcast %223 : vector<1x4xf32> to vector<8x4xf32>
    %275 = arith.mulf %274, %251 : vector<8x4xf32>
    %276 = arith.subf %273, %275 : vector<8x4xf32>
    %277 = vector.broadcast %219 : vector<1x4xf32> to vector<8x4xf32>
    %278 = arith.mulf %277, %261 : vector<8x4xf32>
    %279 = vector.broadcast %223 : vector<1x4xf32> to vector<8x4xf32>
    %280 = arith.mulf %279, %266 : vector<8x4xf32>
    %281 = arith.subf %278, %280 : vector<8x4xf32>
    %282 = vector.broadcast %219 : vector<1x4xf32> to vector<8x4xf32>
    %283 = arith.mulf %282, %266 : vector<8x4xf32>
    %284 = vector.broadcast %223 : vector<1x4xf32> to vector<8x4xf32>
    %285 = arith.mulf %284, %261 : vector<8x4xf32>
    %286 = arith.addf %283, %285 : vector<8x4xf32>
    %287 = arith.mulf %1, %271 : vector<8x4xf32>
    %288 = arith.mulf %7, %286 : vector<8x4xf32>
    %289 = arith.addf %287, %288 : vector<8x4xf32>
    %290 = arith.mulf %1, %276 : vector<8x4xf32>
    %291 = arith.mulf %7, %281 : vector<8x4xf32>
    %292 = arith.subf %290, %291 : vector<8x4xf32>
    %293 = arith.mulf %7, %276 : vector<8x4xf32>
    %294 = arith.mulf %1, %281 : vector<8x4xf32>
    %295 = arith.addf %293, %294 : vector<8x4xf32>
    %296 = arith.mulf %1, %286 : vector<8x4xf32>
    %297 = arith.mulf %7, %271 : vector<8x4xf32>
    %298 = arith.subf %296, %297 : vector<8x4xf32>
    %299 = arith.mulf %3, %289 : vector<8x4xf32>
    %300 = arith.mulf %9, %295 : vector<8x4xf32>
    %301 = arith.subf %299, %300 : vector<8x4xf32>
    %302 = arith.mulf %3, %292 : vector<8x4xf32>
    %303 = arith.mulf %9, %298 : vector<8x4xf32>
    %304 = arith.subf %302, %303 : vector<8x4xf32>
    %305 = arith.mulf %9, %289 : vector<8x4xf32>
    %306 = arith.mulf %3, %295 : vector<8x4xf32>
    %307 = arith.addf %305, %306 : vector<8x4xf32>
    %308 = arith.mulf %9, %292 : vector<8x4xf32>
    %309 = arith.mulf %3, %298 : vector<8x4xf32>
    %310 = arith.addf %308, %309 : vector<8x4xf32>
    %311 = arith.mulf %5, %301 : vector<8x4xf32>
    %312 = arith.mulf %11, %304 : vector<8x4xf32>
    %313 = arith.addf %311, %312 : vector<8x4xf32>
    %314 = arith.mulf %5, %304 : vector<8x4xf32>
    %315 = arith.mulf %11, %301 : vector<8x4xf32>
    %316 = arith.subf %314, %315 : vector<8x4xf32>
    %317 = arith.mulf %5, %307 : vector<8x4xf32>
    %318 = arith.mulf %11, %310 : vector<8x4xf32>
    %319 = arith.subf %317, %318 : vector<8x4xf32>
    %320 = arith.mulf %5, %310 : vector<8x4xf32>
    %321 = arith.mulf %11, %307 : vector<8x4xf32>
    %322 = arith.addf %320, %321 : vector<8x4xf32>
    %323 = arith.mulf %1, %313 : vector<8x4xf32>
    %324 = arith.mulf %7, %322 : vector<8x4xf32>
    %325 = arith.addf %323, %324 : vector<8x4xf32>
    %326 = arith.mulf %1, %316 : vector<8x4xf32>
    %327 = arith.mulf %7, %319 : vector<8x4xf32>
    %328 = arith.subf %326, %327 : vector<8x4xf32>
    %329 = arith.mulf %7, %316 : vector<8x4xf32>
    %330 = arith.mulf %1, %319 : vector<8x4xf32>
    %331 = arith.addf %329, %330 : vector<8x4xf32>
    %332 = arith.mulf %1, %322 : vector<8x4xf32>
    %333 = arith.mulf %7, %313 : vector<8x4xf32>
    %334 = arith.subf %332, %333 : vector<8x4xf32>
    %335 = arith.mulf %3, %325 : vector<8x4xf32>
    %336 = arith.mulf %9, %331 : vector<8x4xf32>
    %337 = arith.subf %335, %336 : vector<8x4xf32>
    %338 = arith.mulf %3, %328 : vector<8x4xf32>
    %339 = arith.mulf %9, %334 : vector<8x4xf32>
    %340 = arith.subf %338, %339 : vector<8x4xf32>
    %341 = arith.mulf %9, %325 : vector<8x4xf32>
    %342 = arith.mulf %3, %331 : vector<8x4xf32>
    %343 = arith.addf %341, %342 : vector<8x4xf32>
    %344 = arith.mulf %9, %328 : vector<8x4xf32>
    %345 = arith.mulf %3, %334 : vector<8x4xf32>
    %346 = arith.addf %344, %345 : vector<8x4xf32>
    %347 = arith.mulf %5, %337 : vector<8x4xf32>
    %348 = arith.mulf %11, %340 : vector<8x4xf32>
    %349 = arith.addf %347, %348 : vector<8x4xf32>
    %350 = arith.mulf %5, %340 : vector<8x4xf32>
    %351 = arith.mulf %11, %337 : vector<8x4xf32>
    %352 = arith.subf %350, %351 : vector<8x4xf32>
    %353 = arith.mulf %5, %343 : vector<8x4xf32>
    %354 = arith.mulf %11, %346 : vector<8x4xf32>
    %355 = arith.subf %353, %354 : vector<8x4xf32>
    %356 = arith.mulf %5, %346 : vector<8x4xf32>
    %357 = arith.mulf %11, %343 : vector<8x4xf32>
    %358 = arith.addf %356, %357 : vector<8x4xf32>
    %359 = arith.mulf %349, %349 : vector<8x4xf32>
    %360 = arith.mulf %352, %352 : vector<8x4xf32>
    %361 = arith.addf %359, %360 : vector<8x4xf32>
    %362 = arith.mulf %355, %355 : vector<8x4xf32>
    %363 = arith.mulf %358, %358 : vector<8x4xf32>
    %364 = arith.addf %362, %363 : vector<8x4xf32>
    %365 = arith.subf %361, %364 : vector<8x4xf32>
    %366 = arith.mulf %365, %13 : vector<8x4xf32>
    %cst_47 = arith.constant dense<0.000000e+00> : vector<8x32xf32>
    %367 = tpu.matmul %366, %17, %cst_47 {dimension_numbers = #tpu.dot_dimension_numbers<[1], [0], [0], [1], [0, 0, 1, 1], [], []>} : vector<8x4xf32>, vector<4x32xf32>, vector<8x32xf32> -> vector<8x32xf32>
    %368 = arith.addf %367, %18 : vector<8x32xf32>
    %369 = math.tanh %368 : vector<8x32xf32>
    %370 = arith.mulf %369, %19 : vector<8x32xf32>
    %371 = arith.addf %370, %20 : vector<8x32xf32>
    %372 = vector.extract_strided_slice %371 {offsets = [0, 0], sizes = [2, 32], strides = [1, 1]} : vector<8x32xf32> to vector<2x32xf32>
    %373 = vector.extract_strided_slice %371 {offsets = [2, 0], sizes = [2, 32], strides = [1, 1]} : vector<8x32xf32> to vector<2x32xf32>
    %374 = vector.extract_strided_slice %371 {offsets = [4, 0], sizes = [2, 32], strides = [1, 1]} : vector<8x32xf32> to vector<2x32xf32>
    %375 = vector.extract_strided_slice %371 {offsets = [6, 0], sizes = [2, 32], strides = [1, 1]} : vector<8x32xf32> to vector<2x32xf32>
    %376 = arith.mulf %372, %201 : vector<2x32xf32>
    %377 = arith.mulf %373, %374 : vector<2x32xf32>
    %378 = arith.addf %376, %377 : vector<2x32xf32>
    %379 = math.tanh %378 : vector<2x32xf32>
    %380 = arith.mulf %375, %379 : vector<2x32xf32>
    %c2_i32 = arith.constant 2 : i32
    %cst_48 = arith.constant dense<0.000000e+00> : vector<2x4xf32>
    %381 = tpu.matmul %380, %15, %cst_48 {dimension_numbers = #tpu.dot_dimension_numbers<[1], [0], [0], [1], [0, 0, 1, 1], [], []>} : vector<2x32xf32>, vector<32x4xf32>, vector<2x4xf32> -> vector<2x4xf32>
    %382 = arith.index_cast %c2_i32 : i32 to index
    %c0_49 = arith.constant 0 : index
    %c0_50 = arith.constant 0 : index
    %383 = vector.load %arg1[%382, %c0_49, %c0_50] : memref<8x2x4xf32, #tpu.memory_space<vmem>>, vector<1x2x4xf32>
    %384 = vector.shape_cast %383 : vector<1x2x4xf32> to vector<2x4xf32>
    %385 = arith.addf %381, %384 : vector<2x4xf32>
    %386 = vector.extract_strided_slice %385 {offsets = [0, 0], sizes = [1, 4], strides = [1, 1]} : vector<2x4xf32> to vector<1x4xf32>
    %387 = arith.mulf %386, %386 : vector<1x4xf32>
    %cst_51 = arith.constant 1.000000e+00 : f32
    %388 = vector.broadcast %cst_51 : f32 to vector<1x4xf32>
    %389 = arith.addf %388, %387 : vector<1x4xf32>
    %390 = math.rsqrt %389 : vector<1x4xf32>
    %cst_52 = arith.constant 1.000000e+00 : f32
    %391 = vector.broadcast %cst_52 : f32 to vector<1x4xf32>
    %392 = arith.addf %391, %390 : vector<1x4xf32>
    %cst_53 = arith.constant 5.000000e-01 : f32
    %393 = vector.broadcast %cst_53 : f32 to vector<1x4xf32>
    %394 = arith.mulf %393, %392 : vector<1x4xf32>
    %395 = math.rsqrt %394 : vector<1x4xf32>
    %396 = arith.mulf %394, %395 : vector<1x4xf32>
    %cst_54 = arith.constant 5.000000e-01 : f32
    %397 = vector.broadcast %cst_54 : f32 to vector<1x4xf32>
    %398 = arith.mulf %397, %386 : vector<1x4xf32>
    %399 = arith.mulf %398, %390 : vector<1x4xf32>
    %400 = arith.mulf %399, %395 : vector<1x4xf32>
    %401 = tpu.concatenate %385, %385, %385, %385 in 0 : vector<2x4xf32>, vector<2x4xf32>, vector<2x4xf32>, vector<2x4xf32> -> vector<8x4xf32>
    %cst_55 = arith.constant 5.000000e-01 : f32
    %402 = vector.broadcast %cst_55 : f32 to vector<8x4xf32>
    %403 = arith.mulf %402, %401 : vector<8x4xf32>
    %404 = math.cos %403 : vector<8x4xf32>
    %cst_56 = arith.constant 5.000000e-01 : f32
    %405 = vector.broadcast %cst_56 : f32 to vector<8x4xf32>
    %406 = arith.mulf %405, %401 : vector<8x4xf32>
    %407 = math.sin %406 : vector<8x4xf32>
    %cst_57 = arith.constant 0.000000e+00 : f32
    %408 = vector.broadcast %cst_57 : f32 to vector<8x4xf32>
    %cst_58 = arith.constant 0.000000e+00 : f32
    %409 = vector.broadcast %cst_58 : f32 to vector<8x4xf32>
    %cst_59 = arith.constant 0.000000e+00 : f32
    %410 = vector.broadcast %cst_59 : f32 to vector<8x4xf32>
    %411 = arith.subf %410, %407 : vector<8x4xf32>
    %412 = arith.addf %404, %409 : vector<8x4xf32>
    %cst_60 = arith.constant 0.707106769 : f32
    %413 = vector.broadcast %cst_60 : f32 to vector<8x4xf32>
    %414 = arith.mulf %412, %413 : vector<8x4xf32>
    %415 = arith.addf %408, %411 : vector<8x4xf32>
    %cst_61 = arith.constant 0.707106769 : f32
    %416 = vector.broadcast %cst_61 : f32 to vector<8x4xf32>
    %417 = arith.mulf %415, %416 : vector<8x4xf32>
    %418 = arith.subf %404, %409 : vector<8x4xf32>
    %cst_62 = arith.constant 0.707106769 : f32
    %419 = vector.broadcast %cst_62 : f32 to vector<8x4xf32>
    %420 = arith.mulf %418, %419 : vector<8x4xf32>
    %421 = arith.subf %408, %411 : vector<8x4xf32>
    %cst_63 = arith.constant 0.707106769 : f32
    %422 = vector.broadcast %cst_63 : f32 to vector<8x4xf32>
    %423 = arith.mulf %421, %422 : vector<8x4xf32>
    %424 = vector.broadcast %396 : vector<1x4xf32> to vector<8x4xf32>
    %425 = arith.mulf %424, %414 : vector<8x4xf32>
    %426 = vector.broadcast %400 : vector<1x4xf32> to vector<8x4xf32>
    %427 = arith.mulf %426, %420 : vector<8x4xf32>
    %428 = arith.subf %425, %427 : vector<8x4xf32>
    %429 = vector.broadcast %396 : vector<1x4xf32> to vector<8x4xf32>
    %430 = arith.mulf %429, %417 : vector<8x4xf32>
    %431 = vector.broadcast %400 : vector<1x4xf32> to vector<8x4xf32>
    %432 = arith.mulf %431, %423 : vector<8x4xf32>
    %433 = arith.subf %430, %432 : vector<8x4xf32>
    %434 = vector.broadcast %400 : vector<1x4xf32> to vector<8x4xf32>
    %435 = arith.mulf %434, %414 : vector<8x4xf32>
    %436 = vector.broadcast %396 : vector<1x4xf32> to vector<8x4xf32>
    %437 = arith.mulf %436, %420 : vector<8x4xf32>
    %438 = arith.addf %435, %437 : vector<8x4xf32>
    %439 = vector.broadcast %400 : vector<1x4xf32> to vector<8x4xf32>
    %440 = arith.mulf %439, %417 : vector<8x4xf32>
    %441 = vector.broadcast %396 : vector<1x4xf32> to vector<8x4xf32>
    %442 = arith.mulf %441, %423 : vector<8x4xf32>
    %443 = arith.addf %440, %442 : vector<8x4xf32>
    %444 = vector.broadcast %396 : vector<1x4xf32> to vector<8x4xf32>
    %445 = arith.mulf %444, %428 : vector<8x4xf32>
    %446 = vector.broadcast %400 : vector<1x4xf32> to vector<8x4xf32>
    %447 = arith.mulf %446, %433 : vector<8x4xf32>
    %448 = arith.addf %445, %447 : vector<8x4xf32>
    %449 = vector.broadcast %396 : vector<1x4xf32> to vector<8x4xf32>
    %450 = arith.mulf %449, %433 : vector<8x4xf32>
    %451 = vector.broadcast %400 : vector<1x4xf32> to vector<8x4xf32>
    %452 = arith.mulf %451, %428 : vector<8x4xf32>
    %453 = arith.subf %450, %452 : vector<8x4xf32>
    %454 = vector.broadcast %396 : vector<1x4xf32> to vector<8x4xf32>
    %455 = arith.mulf %454, %438 : vector<8x4xf32>
    %456 = vector.broadcast %400 : vector<1x4xf32> to vector<8x4xf32>
    %457 = arith.mulf %456, %443 : vector<8x4xf32>
    %458 = arith.subf %455, %457 : vector<8x4xf32>
    %459 = vector.broadcast %396 : vector<1x4xf32> to vector<8x4xf32>
    %460 = arith.mulf %459, %443 : vector<8x4xf32>
    %461 = vector.broadcast %400 : vector<1x4xf32> to vector<8x4xf32>
    %462 = arith.mulf %461, %438 : vector<8x4xf32>
    %463 = arith.addf %460, %462 : vector<8x4xf32>
    %464 = arith.mulf %1, %448 : vector<8x4xf32>
    %465 = arith.mulf %7, %463 : vector<8x4xf32>
    %466 = arith.addf %464, %465 : vector<8x4xf32>
    %467 = arith.mulf %1, %453 : vector<8x4xf32>
    %468 = arith.mulf %7, %458 : vector<8x4xf32>
    %469 = arith.subf %467, %468 : vector<8x4xf32>
    %470 = arith.mulf %7, %453 : vector<8x4xf32>
    %471 = arith.mulf %1, %458 : vector<8x4xf32>
    %472 = arith.addf %470, %471 : vector<8x4xf32>
    %473 = arith.mulf %1, %463 : vector<8x4xf32>
    %474 = arith.mulf %7, %448 : vector<8x4xf32>
    %475 = arith.subf %473, %474 : vector<8x4xf32>
    %476 = arith.mulf %3, %466 : vector<8x4xf32>
    %477 = arith.mulf %9, %472 : vector<8x4xf32>
    %478 = arith.subf %476, %477 : vector<8x4xf32>
    %479 = arith.mulf %3, %469 : vector<8x4xf32>
    %480 = arith.mulf %9, %475 : vector<8x4xf32>
    %481 = arith.subf %479, %480 : vector<8x4xf32>
    %482 = arith.mulf %9, %466 : vector<8x4xf32>
    %483 = arith.mulf %3, %472 : vector<8x4xf32>
    %484 = arith.addf %482, %483 : vector<8x4xf32>
    %485 = arith.mulf %9, %469 : vector<8x4xf32>
    %486 = arith.mulf %3, %475 : vector<8x4xf32>
    %487 = arith.addf %485, %486 : vector<8x4xf32>
    %488 = arith.mulf %5, %478 : vector<8x4xf32>
    %489 = arith.mulf %11, %481 : vector<8x4xf32>
    %490 = arith.addf %488, %489 : vector<8x4xf32>
    %491 = arith.mulf %5, %481 : vector<8x4xf32>
    %492 = arith.mulf %11, %478 : vector<8x4xf32>
    %493 = arith.subf %491, %492 : vector<8x4xf32>
    %494 = arith.mulf %5, %484 : vector<8x4xf32>
    %495 = arith.mulf %11, %487 : vector<8x4xf32>
    %496 = arith.subf %494, %495 : vector<8x4xf32>
    %497 = arith.mulf %5, %487 : vector<8x4xf32>
    %498 = arith.mulf %11, %484 : vector<8x4xf32>
    %499 = arith.addf %497, %498 : vector<8x4xf32>
    %500 = arith.mulf %1, %490 : vector<8x4xf32>
    %501 = arith.mulf %7, %499 : vector<8x4xf32>
    %502 = arith.addf %500, %501 : vector<8x4xf32>
    %503 = arith.mulf %1, %493 : vector<8x4xf32>
    %504 = arith.mulf %7, %496 : vector<8x4xf32>
    %505 = arith.subf %503, %504 : vector<8x4xf32>
    %506 = arith.mulf %7, %493 : vector<8x4xf32>
    %507 = arith.mulf %1, %496 : vector<8x4xf32>
    %508 = arith.addf %506, %507 : vector<8x4xf32>
    %509 = arith.mulf %1, %499 : vector<8x4xf32>
    %510 = arith.mulf %7, %490 : vector<8x4xf32>
    %511 = arith.subf %509, %510 : vector<8x4xf32>
    %512 = arith.mulf %3, %502 : vector<8x4xf32>
    %513 = arith.mulf %9, %508 : vector<8x4xf32>
    %514 = arith.subf %512, %513 : vector<8x4xf32>
    %515 = arith.mulf %3, %505 : vector<8x4xf32>
    %516 = arith.mulf %9, %511 : vector<8x4xf32>
    %517 = arith.subf %515, %516 : vector<8x4xf32>
    %518 = arith.mulf %9, %502 : vector<8x4xf32>
    %519 = arith.mulf %3, %508 : vector<8x4xf32>
    %520 = arith.addf %518, %519 : vector<8x4xf32>
    %521 = arith.mulf %9, %505 : vector<8x4xf32>
    %522 = arith.mulf %3, %511 : vector<8x4xf32>
    %523 = arith.addf %521, %522 : vector<8x4xf32>
    %524 = arith.mulf %5, %514 : vector<8x4xf32>
    %525 = arith.mulf %11, %517 : vector<8x4xf32>
    %526 = arith.addf %524, %525 : vector<8x4xf32>
    %527 = arith.mulf %5, %517 : vector<8x4xf32>
    %528 = arith.mulf %11, %514 : vector<8x4xf32>
    %529 = arith.subf %527, %528 : vector<8x4xf32>
    %530 = arith.mulf %5, %520 : vector<8x4xf32>
    %531 = arith.mulf %11, %523 : vector<8x4xf32>
    %532 = arith.subf %530, %531 : vector<8x4xf32>
    %533 = arith.mulf %5, %523 : vector<8x4xf32>
    %534 = arith.mulf %11, %520 : vector<8x4xf32>
    %535 = arith.addf %533, %534 : vector<8x4xf32>
    %536 = arith.mulf %526, %526 : vector<8x4xf32>
    %537 = arith.mulf %529, %529 : vector<8x4xf32>
    %538 = arith.addf %536, %537 : vector<8x4xf32>
    %539 = arith.mulf %532, %532 : vector<8x4xf32>
    %540 = arith.mulf %535, %535 : vector<8x4xf32>
    %541 = arith.addf %539, %540 : vector<8x4xf32>
    %542 = arith.subf %538, %541 : vector<8x4xf32>
    %543 = arith.mulf %542, %13 : vector<8x4xf32>
    %cst_64 = arith.constant dense<0.000000e+00> : vector<8x32xf32>
    %544 = tpu.matmul %543, %17, %cst_64 {dimension_numbers = #tpu.dot_dimension_numbers<[1], [0], [0], [1], [0, 0, 1, 1], [], []>} : vector<8x4xf32>, vector<4x32xf32>, vector<8x32xf32> -> vector<8x32xf32>
    %545 = arith.addf %544, %18 : vector<8x32xf32>
    %546 = math.tanh %545 : vector<8x32xf32>
    %547 = arith.mulf %546, %19 : vector<8x32xf32>
    %548 = arith.addf %547, %20 : vector<8x32xf32>
    %549 = vector.extract_strided_slice %548 {offsets = [0, 0], sizes = [2, 32], strides = [1, 1]} : vector<8x32xf32> to vector<2x32xf32>
    %550 = vector.extract_strided_slice %548 {offsets = [2, 0], sizes = [2, 32], strides = [1, 1]} : vector<8x32xf32> to vector<2x32xf32>
    %551 = vector.extract_strided_slice %548 {offsets = [4, 0], sizes = [2, 32], strides = [1, 1]} : vector<8x32xf32> to vector<2x32xf32>
    %552 = vector.extract_strided_slice %548 {offsets = [6, 0], sizes = [2, 32], strides = [1, 1]} : vector<8x32xf32> to vector<2x32xf32>
    %553 = arith.mulf %549, %378 : vector<2x32xf32>
    %554 = arith.mulf %550, %551 : vector<2x32xf32>
    %555 = arith.addf %553, %554 : vector<2x32xf32>
    %556 = math.tanh %555 : vector<2x32xf32>
    %557 = arith.mulf %552, %556 : vector<2x32xf32>
    %c3_i32 = arith.constant 3 : i32
    %cst_65 = arith.constant dense<0.000000e+00> : vector<2x4xf32>
    %558 = tpu.matmul %557, %15, %cst_65 {dimension_numbers = #tpu.dot_dimension_numbers<[1], [0], [0], [1], [0, 0, 1, 1], [], []>} : vector<2x32xf32>, vector<32x4xf32>, vector<2x4xf32> -> vector<2x4xf32>
    %559 = arith.index_cast %c3_i32 : i32 to index
    %c0_66 = arith.constant 0 : index
    %c0_67 = arith.constant 0 : index
    %560 = vector.load %arg1[%559, %c0_66, %c0_67] : memref<8x2x4xf32, #tpu.memory_space<vmem>>, vector<1x2x4xf32>
    %561 = vector.shape_cast %560 : vector<1x2x4xf32> to vector<2x4xf32>
    %562 = arith.addf %558, %561 : vector<2x4xf32>
    %563 = vector.extract_strided_slice %562 {offsets = [0, 0], sizes = [1, 4], strides = [1, 1]} : vector<2x4xf32> to vector<1x4xf32>
    %564 = arith.mulf %563, %563 : vector<1x4xf32>
    %cst_68 = arith.constant 1.000000e+00 : f32
    %565 = vector.broadcast %cst_68 : f32 to vector<1x4xf32>
    %566 = arith.addf %565, %564 : vector<1x4xf32>
    %567 = math.rsqrt %566 : vector<1x4xf32>
    %cst_69 = arith.constant 1.000000e+00 : f32
    %568 = vector.broadcast %cst_69 : f32 to vector<1x4xf32>
    %569 = arith.addf %568, %567 : vector<1x4xf32>
    %cst_70 = arith.constant 5.000000e-01 : f32
    %570 = vector.broadcast %cst_70 : f32 to vector<1x4xf32>
    %571 = arith.mulf %570, %569 : vector<1x4xf32>
    %572 = math.rsqrt %571 : vector<1x4xf32>
    %573 = arith.mulf %571, %572 : vector<1x4xf32>
    %cst_71 = arith.constant 5.000000e-01 : f32
    %574 = vector.broadcast %cst_71 : f32 to vector<1x4xf32>
    %575 = arith.mulf %574, %563 : vector<1x4xf32>
    %576 = arith.mulf %575, %567 : vector<1x4xf32>
    %577 = arith.mulf %576, %572 : vector<1x4xf32>
    %578 = tpu.concatenate %562, %562, %562, %562 in 0 : vector<2x4xf32>, vector<2x4xf32>, vector<2x4xf32>, vector<2x4xf32> -> vector<8x4xf32>
    %cst_72 = arith.constant 5.000000e-01 : f32
    %579 = vector.broadcast %cst_72 : f32 to vector<8x4xf32>
    %580 = arith.mulf %579, %578 : vector<8x4xf32>
    %581 = math.cos %580 : vector<8x4xf32>
    %cst_73 = arith.constant 5.000000e-01 : f32
    %582 = vector.broadcast %cst_73 : f32 to vector<8x4xf32>
    %583 = arith.mulf %582, %578 : vector<8x4xf32>
    %584 = math.sin %583 : vector<8x4xf32>
    %cst_74 = arith.constant 0.000000e+00 : f32
    %585 = vector.broadcast %cst_74 : f32 to vector<8x4xf32>
    %cst_75 = arith.constant 0.000000e+00 : f32
    %586 = vector.broadcast %cst_75 : f32 to vector<8x4xf32>
    %cst_76 = arith.constant 0.000000e+00 : f32
    %587 = vector.broadcast %cst_76 : f32 to vector<8x4xf32>
    %588 = arith.subf %587, %584 : vector<8x4xf32>
    %589 = arith.addf %581, %586 : vector<8x4xf32>
    %cst_77 = arith.constant 0.707106769 : f32
    %590 = vector.broadcast %cst_77 : f32 to vector<8x4xf32>
    %591 = arith.mulf %589, %590 : vector<8x4xf32>
    %592 = arith.addf %585, %588 : vector<8x4xf32>
    %cst_78 = arith.constant 0.707106769 : f32
    %593 = vector.broadcast %cst_78 : f32 to vector<8x4xf32>
    %594 = arith.mulf %592, %593 : vector<8x4xf32>
    %595 = arith.subf %581, %586 : vector<8x4xf32>
    %cst_79 = arith.constant 0.707106769 : f32
    %596 = vector.broadcast %cst_79 : f32 to vector<8x4xf32>
    %597 = arith.mulf %595, %596 : vector<8x4xf32>
    %598 = arith.subf %585, %588 : vector<8x4xf32>
    %cst_80 = arith.constant 0.707106769 : f32
    %599 = vector.broadcast %cst_80 : f32 to vector<8x4xf32>
    %600 = arith.mulf %598, %599 : vector<8x4xf32>
    %601 = vector.broadcast %573 : vector<1x4xf32> to vector<8x4xf32>
    %602 = arith.mulf %601, %591 : vector<8x4xf32>
    %603 = vector.broadcast %577 : vector<1x4xf32> to vector<8x4xf32>
    %604 = arith.mulf %603, %597 : vector<8x4xf32>
    %605 = arith.subf %602, %604 : vector<8x4xf32>
    %606 = vector.broadcast %573 : vector<1x4xf32> to vector<8x4xf32>
    %607 = arith.mulf %606, %594 : vector<8x4xf32>
    %608 = vector.broadcast %577 : vector<1x4xf32> to vector<8x4xf32>
    %609 = arith.mulf %608, %600 : vector<8x4xf32>
    %610 = arith.subf %607, %609 : vector<8x4xf32>
    %611 = vector.broadcast %577 : vector<1x4xf32> to vector<8x4xf32>
    %612 = arith.mulf %611, %591 : vector<8x4xf32>
    %613 = vector.broadcast %573 : vector<1x4xf32> to vector<8x4xf32>
    %614 = arith.mulf %613, %597 : vector<8x4xf32>
    %615 = arith.addf %612, %614 : vector<8x4xf32>
    %616 = vector.broadcast %577 : vector<1x4xf32> to vector<8x4xf32>
    %617 = arith.mulf %616, %594 : vector<8x4xf32>
    %618 = vector.broadcast %573 : vector<1x4xf32> to vector<8x4xf32>
    %619 = arith.mulf %618, %600 : vector<8x4xf32>
    %620 = arith.addf %617, %619 : vector<8x4xf32>
    %621 = vector.broadcast %573 : vector<1x4xf32> to vector<8x4xf32>
    %622 = arith.mulf %621, %605 : vector<8x4xf32>
    %623 = vector.broadcast %577 : vector<1x4xf32> to vector<8x4xf32>
    %624 = arith.mulf %623, %610 : vector<8x4xf32>
    %625 = arith.addf %622, %624 : vector<8x4xf32>
    %626 = vector.broadcast %573 : vector<1x4xf32> to vector<8x4xf32>
    %627 = arith.mulf %626, %610 : vector<8x4xf32>
    %628 = vector.broadcast %577 : vector<1x4xf32> to vector<8x4xf32>
    %629 = arith.mulf %628, %605 : vector<8x4xf32>
    %630 = arith.subf %627, %629 : vector<8x4xf32>
    %631 = vector.broadcast %573 : vector<1x4xf32> to vector<8x4xf32>
    %632 = arith.mulf %631, %615 : vector<8x4xf32>
    %633 = vector.broadcast %577 : vector<1x4xf32> to vector<8x4xf32>
    %634 = arith.mulf %633, %620 : vector<8x4xf32>
    %635 = arith.subf %632, %634 : vector<8x4xf32>
    %636 = vector.broadcast %573 : vector<1x4xf32> to vector<8x4xf32>
    %637 = arith.mulf %636, %620 : vector<8x4xf32>
    %638 = vector.broadcast %577 : vector<1x4xf32> to vector<8x4xf32>
    %639 = arith.mulf %638, %615 : vector<8x4xf32>
    %640 = arith.addf %637, %639 : vector<8x4xf32>
    %641 = arith.mulf %1, %625 : vector<8x4xf32>
    %642 = arith.mulf %7, %640 : vector<8x4xf32>
    %643 = arith.addf %641, %642 : vector<8x4xf32>
    %644 = arith.mulf %1, %630 : vector<8x4xf32>
    %645 = arith.mulf %7, %635 : vector<8x4xf32>
    %646 = arith.subf %644, %645 : vector<8x4xf32>
    %647 = arith.mulf %7, %630 : vector<8x4xf32>
    %648 = arith.mulf %1, %635 : vector<8x4xf32>
    %649 = arith.addf %647, %648 : vector<8x4xf32>
    %650 = arith.mulf %1, %640 : vector<8x4xf32>
    %651 = arith.mulf %7, %625 : vector<8x4xf32>
    %652 = arith.subf %650, %651 : vector<8x4xf32>
    %653 = arith.mulf %3, %643 : vector<8x4xf32>
    %654 = arith.mulf %9, %649 : vector<8x4xf32>
    %655 = arith.subf %653, %654 : vector<8x4xf32>
    %656 = arith.mulf %3, %646 : vector<8x4xf32>
    %657 = arith.mulf %9, %652 : vector<8x4xf32>
    %658 = arith.subf %656, %657 : vector<8x4xf32>
    %659 = arith.mulf %9, %643 : vector<8x4xf32>
    %660 = arith.mulf %3, %649 : vector<8x4xf32>
    %661 = arith.addf %659, %660 : vector<8x4xf32>
    %662 = arith.mulf %9, %646 : vector<8x4xf32>
    %663 = arith.mulf %3, %652 : vector<8x4xf32>
    %664 = arith.addf %662, %663 : vector<8x4xf32>
    %665 = arith.mulf %5, %655 : vector<8x4xf32>
    %666 = arith.mulf %11, %658 : vector<8x4xf32>
    %667 = arith.addf %665, %666 : vector<8x4xf32>
    %668 = arith.mulf %5, %658 : vector<8x4xf32>
    %669 = arith.mulf %11, %655 : vector<8x4xf32>
    %670 = arith.subf %668, %669 : vector<8x4xf32>
    %671 = arith.mulf %5, %661 : vector<8x4xf32>
    %672 = arith.mulf %11, %664 : vector<8x4xf32>
    %673 = arith.subf %671, %672 : vector<8x4xf32>
    %674 = arith.mulf %5, %664 : vector<8x4xf32>
    %675 = arith.mulf %11, %661 : vector<8x4xf32>
    %676 = arith.addf %674, %675 : vector<8x4xf32>
    %677 = arith.mulf %1, %667 : vector<8x4xf32>
    %678 = arith.mulf %7, %676 : vector<8x4xf32>
    %679 = arith.addf %677, %678 : vector<8x4xf32>
    %680 = arith.mulf %1, %670 : vector<8x4xf32>
    %681 = arith.mulf %7, %673 : vector<8x4xf32>
    %682 = arith.subf %680, %681 : vector<8x4xf32>
    %683 = arith.mulf %7, %670 : vector<8x4xf32>
    %684 = arith.mulf %1, %673 : vector<8x4xf32>
    %685 = arith.addf %683, %684 : vector<8x4xf32>
    %686 = arith.mulf %1, %676 : vector<8x4xf32>
    %687 = arith.mulf %7, %667 : vector<8x4xf32>
    %688 = arith.subf %686, %687 : vector<8x4xf32>
    %689 = arith.mulf %3, %679 : vector<8x4xf32>
    %690 = arith.mulf %9, %685 : vector<8x4xf32>
    %691 = arith.subf %689, %690 : vector<8x4xf32>
    %692 = arith.mulf %3, %682 : vector<8x4xf32>
    %693 = arith.mulf %9, %688 : vector<8x4xf32>
    %694 = arith.subf %692, %693 : vector<8x4xf32>
    %695 = arith.mulf %9, %679 : vector<8x4xf32>
    %696 = arith.mulf %3, %685 : vector<8x4xf32>
    %697 = arith.addf %695, %696 : vector<8x4xf32>
    %698 = arith.mulf %9, %682 : vector<8x4xf32>
    %699 = arith.mulf %3, %688 : vector<8x4xf32>
    %700 = arith.addf %698, %699 : vector<8x4xf32>
    %701 = arith.mulf %5, %691 : vector<8x4xf32>
    %702 = arith.mulf %11, %694 : vector<8x4xf32>
    %703 = arith.addf %701, %702 : vector<8x4xf32>
    %704 = arith.mulf %5, %694 : vector<8x4xf32>
    %705 = arith.mulf %11, %691 : vector<8x4xf32>
    %706 = arith.subf %704, %705 : vector<8x4xf32>
    %707 = arith.mulf %5, %697 : vector<8x4xf32>
    %708 = arith.mulf %11, %700 : vector<8x4xf32>
    %709 = arith.subf %707, %708 : vector<8x4xf32>
    %710 = arith.mulf %5, %700 : vector<8x4xf32>
    %711 = arith.mulf %11, %697 : vector<8x4xf32>
    %712 = arith.addf %710, %711 : vector<8x4xf32>
    %713 = arith.mulf %703, %703 : vector<8x4xf32>
    %714 = arith.mulf %706, %706 : vector<8x4xf32>
    %715 = arith.addf %713, %714 : vector<8x4xf32>
    %716 = arith.mulf %709, %709 : vector<8x4xf32>
    %717 = arith.mulf %712, %712 : vector<8x4xf32>
    %718 = arith.addf %716, %717 : vector<8x4xf32>
    %719 = arith.subf %715, %718 : vector<8x4xf32>
    %720 = arith.mulf %719, %13 : vector<8x4xf32>
    %cst_81 = arith.constant dense<0.000000e+00> : vector<8x32xf32>
    %721 = tpu.matmul %720, %17, %cst_81 {dimension_numbers = #tpu.dot_dimension_numbers<[1], [0], [0], [1], [0, 0, 1, 1], [], []>} : vector<8x4xf32>, vector<4x32xf32>, vector<8x32xf32> -> vector<8x32xf32>
    %722 = arith.addf %721, %18 : vector<8x32xf32>
    %723 = math.tanh %722 : vector<8x32xf32>
    %724 = arith.mulf %723, %19 : vector<8x32xf32>
    %725 = arith.addf %724, %20 : vector<8x32xf32>
    %726 = vector.extract_strided_slice %725 {offsets = [0, 0], sizes = [2, 32], strides = [1, 1]} : vector<8x32xf32> to vector<2x32xf32>
    %727 = vector.extract_strided_slice %725 {offsets = [2, 0], sizes = [2, 32], strides = [1, 1]} : vector<8x32xf32> to vector<2x32xf32>
    %728 = vector.extract_strided_slice %725 {offsets = [4, 0], sizes = [2, 32], strides = [1, 1]} : vector<8x32xf32> to vector<2x32xf32>
    %729 = vector.extract_strided_slice %725 {offsets = [6, 0], sizes = [2, 32], strides = [1, 1]} : vector<8x32xf32> to vector<2x32xf32>
    %730 = arith.mulf %726, %555 : vector<2x32xf32>
    %731 = arith.mulf %727, %728 : vector<2x32xf32>
    %732 = arith.addf %730, %731 : vector<2x32xf32>
    %733 = math.tanh %732 : vector<2x32xf32>
    %734 = arith.mulf %729, %733 : vector<2x32xf32>
    %c4_i32 = arith.constant 4 : i32
    %cst_82 = arith.constant dense<0.000000e+00> : vector<2x4xf32>
    %735 = tpu.matmul %734, %15, %cst_82 {dimension_numbers = #tpu.dot_dimension_numbers<[1], [0], [0], [1], [0, 0, 1, 1], [], []>} : vector<2x32xf32>, vector<32x4xf32>, vector<2x4xf32> -> vector<2x4xf32>
    %736 = arith.index_cast %c4_i32 : i32 to index
    %c0_83 = arith.constant 0 : index
    %c0_84 = arith.constant 0 : index
    %737 = vector.load %arg1[%736, %c0_83, %c0_84] : memref<8x2x4xf32, #tpu.memory_space<vmem>>, vector<1x2x4xf32>
    %738 = vector.shape_cast %737 : vector<1x2x4xf32> to vector<2x4xf32>
    %739 = arith.addf %735, %738 : vector<2x4xf32>
    %740 = vector.extract_strided_slice %739 {offsets = [0, 0], sizes = [1, 4], strides = [1, 1]} : vector<2x4xf32> to vector<1x4xf32>
    %741 = arith.mulf %740, %740 : vector<1x4xf32>
    %cst_85 = arith.constant 1.000000e+00 : f32
    %742 = vector.broadcast %cst_85 : f32 to vector<1x4xf32>
    %743 = arith.addf %742, %741 : vector<1x4xf32>
    %744 = math.rsqrt %743 : vector<1x4xf32>
    %cst_86 = arith.constant 1.000000e+00 : f32
    %745 = vector.broadcast %cst_86 : f32 to vector<1x4xf32>
    %746 = arith.addf %745, %744 : vector<1x4xf32>
    %cst_87 = arith.constant 5.000000e-01 : f32
    %747 = vector.broadcast %cst_87 : f32 to vector<1x4xf32>
    %748 = arith.mulf %747, %746 : vector<1x4xf32>
    %749 = math.rsqrt %748 : vector<1x4xf32>
    %750 = arith.mulf %748, %749 : vector<1x4xf32>
    %cst_88 = arith.constant 5.000000e-01 : f32
    %751 = vector.broadcast %cst_88 : f32 to vector<1x4xf32>
    %752 = arith.mulf %751, %740 : vector<1x4xf32>
    %753 = arith.mulf %752, %744 : vector<1x4xf32>
    %754 = arith.mulf %753, %749 : vector<1x4xf32>
    %755 = tpu.concatenate %739, %739, %739, %739 in 0 : vector<2x4xf32>, vector<2x4xf32>, vector<2x4xf32>, vector<2x4xf32> -> vector<8x4xf32>
    %cst_89 = arith.constant 5.000000e-01 : f32
    %756 = vector.broadcast %cst_89 : f32 to vector<8x4xf32>
    %757 = arith.mulf %756, %755 : vector<8x4xf32>
    %758 = math.cos %757 : vector<8x4xf32>
    %cst_90 = arith.constant 5.000000e-01 : f32
    %759 = vector.broadcast %cst_90 : f32 to vector<8x4xf32>
    %760 = arith.mulf %759, %755 : vector<8x4xf32>
    %761 = math.sin %760 : vector<8x4xf32>
    %cst_91 = arith.constant 0.000000e+00 : f32
    %762 = vector.broadcast %cst_91 : f32 to vector<8x4xf32>
    %cst_92 = arith.constant 0.000000e+00 : f32
    %763 = vector.broadcast %cst_92 : f32 to vector<8x4xf32>
    %cst_93 = arith.constant 0.000000e+00 : f32
    %764 = vector.broadcast %cst_93 : f32 to vector<8x4xf32>
    %765 = arith.subf %764, %761 : vector<8x4xf32>
    %766 = arith.addf %758, %763 : vector<8x4xf32>
    %cst_94 = arith.constant 0.707106769 : f32
    %767 = vector.broadcast %cst_94 : f32 to vector<8x4xf32>
    %768 = arith.mulf %766, %767 : vector<8x4xf32>
    %769 = arith.addf %762, %765 : vector<8x4xf32>
    %cst_95 = arith.constant 0.707106769 : f32
    %770 = vector.broadcast %cst_95 : f32 to vector<8x4xf32>
    %771 = arith.mulf %769, %770 : vector<8x4xf32>
    %772 = arith.subf %758, %763 : vector<8x4xf32>
    %cst_96 = arith.constant 0.707106769 : f32
    %773 = vector.broadcast %cst_96 : f32 to vector<8x4xf32>
    %774 = arith.mulf %772, %773 : vector<8x4xf32>
    %775 = arith.subf %762, %765 : vector<8x4xf32>
    %cst_97 = arith.constant 0.707106769 : f32
    %776 = vector.broadcast %cst_97 : f32 to vector<8x4xf32>
    %777 = arith.mulf %775, %776 : vector<8x4xf32>
    %778 = vector.broadcast %750 : vector<1x4xf32> to vector<8x4xf32>
    %779 = arith.mulf %778, %768 : vector<8x4xf32>
    %780 = vector.broadcast %754 : vector<1x4xf32> to vector<8x4xf32>
    %781 = arith.mulf %780, %774 : vector<8x4xf32>
    %782 = arith.subf %779, %781 : vector<8x4xf32>
    %783 = vector.broadcast %750 : vector<1x4xf32> to vector<8x4xf32>
    %784 = arith.mulf %783, %771 : vector<8x4xf32>
    %785 = vector.broadcast %754 : vector<1x4xf32> to vector<8x4xf32>
    %786 = arith.mulf %785, %777 : vector<8x4xf32>
    %787 = arith.subf %784, %786 : vector<8x4xf32>
    %788 = vector.broadcast %754 : vector<1x4xf32> to vector<8x4xf32>
    %789 = arith.mulf %788, %768 : vector<8x4xf32>
    %790 = vector.broadcast %750 : vector<1x4xf32> to vector<8x4xf32>
    %791 = arith.mulf %790, %774 : vector<8x4xf32>
    %792 = arith.addf %789, %791 : vector<8x4xf32>
    %793 = vector.broadcast %754 : vector<1x4xf32> to vector<8x4xf32>
    %794 = arith.mulf %793, %771 : vector<8x4xf32>
    %795 = vector.broadcast %750 : vector<1x4xf32> to vector<8x4xf32>
    %796 = arith.mulf %795, %777 : vector<8x4xf32>
    %797 = arith.addf %794, %796 : vector<8x4xf32>
    %798 = vector.broadcast %750 : vector<1x4xf32> to vector<8x4xf32>
    %799 = arith.mulf %798, %782 : vector<8x4xf32>
    %800 = vector.broadcast %754 : vector<1x4xf32> to vector<8x4xf32>
    %801 = arith.mulf %800, %787 : vector<8x4xf32>
    %802 = arith.addf %799, %801 : vector<8x4xf32>
    %803 = vector.broadcast %750 : vector<1x4xf32> to vector<8x4xf32>
    %804 = arith.mulf %803, %787 : vector<8x4xf32>
    %805 = vector.broadcast %754 : vector<1x4xf32> to vector<8x4xf32>
    %806 = arith.mulf %805, %782 : vector<8x4xf32>
    %807 = arith.subf %804, %806 : vector<8x4xf32>
    %808 = vector.broadcast %750 : vector<1x4xf32> to vector<8x4xf32>
    %809 = arith.mulf %808, %792 : vector<8x4xf32>
    %810 = vector.broadcast %754 : vector<1x4xf32> to vector<8x4xf32>
    %811 = arith.mulf %810, %797 : vector<8x4xf32>
    %812 = arith.subf %809, %811 : vector<8x4xf32>
    %813 = vector.broadcast %750 : vector<1x4xf32> to vector<8x4xf32>
    %814 = arith.mulf %813, %797 : vector<8x4xf32>
    %815 = vector.broadcast %754 : vector<1x4xf32> to vector<8x4xf32>
    %816 = arith.mulf %815, %792 : vector<8x4xf32>
    %817 = arith.addf %814, %816 : vector<8x4xf32>
    %818 = arith.mulf %1, %802 : vector<8x4xf32>
    %819 = arith.mulf %7, %817 : vector<8x4xf32>
    %820 = arith.addf %818, %819 : vector<8x4xf32>
    %821 = arith.mulf %1, %807 : vector<8x4xf32>
    %822 = arith.mulf %7, %812 : vector<8x4xf32>
    %823 = arith.subf %821, %822 : vector<8x4xf32>
    %824 = arith.mulf %7, %807 : vector<8x4xf32>
    %825 = arith.mulf %1, %812 : vector<8x4xf32>
    %826 = arith.addf %824, %825 : vector<8x4xf32>
    %827 = arith.mulf %1, %817 : vector<8x4xf32>
    %828 = arith.mulf %7, %802 : vector<8x4xf32>
    %829 = arith.subf %827, %828 : vector<8x4xf32>
    %830 = arith.mulf %3, %820 : vector<8x4xf32>
    %831 = arith.mulf %9, %826 : vector<8x4xf32>
    %832 = arith.subf %830, %831 : vector<8x4xf32>
    %833 = arith.mulf %3, %823 : vector<8x4xf32>
    %834 = arith.mulf %9, %829 : vector<8x4xf32>
    %835 = arith.subf %833, %834 : vector<8x4xf32>
    %836 = arith.mulf %9, %820 : vector<8x4xf32>
    %837 = arith.mulf %3, %826 : vector<8x4xf32>
    %838 = arith.addf %836, %837 : vector<8x4xf32>
    %839 = arith.mulf %9, %823 : vector<8x4xf32>
    %840 = arith.mulf %3, %829 : vector<8x4xf32>
    %841 = arith.addf %839, %840 : vector<8x4xf32>
    %842 = arith.mulf %5, %832 : vector<8x4xf32>
    %843 = arith.mulf %11, %835 : vector<8x4xf32>
    %844 = arith.addf %842, %843 : vector<8x4xf32>
    %845 = arith.mulf %5, %835 : vector<8x4xf32>
    %846 = arith.mulf %11, %832 : vector<8x4xf32>
    %847 = arith.subf %845, %846 : vector<8x4xf32>
    %848 = arith.mulf %5, %838 : vector<8x4xf32>
    %849 = arith.mulf %11, %841 : vector<8x4xf32>
    %850 = arith.subf %848, %849 : vector<8x4xf32>
    %851 = arith.mulf %5, %841 : vector<8x4xf32>
    %852 = arith.mulf %11, %838 : vector<8x4xf32>
    %853 = arith.addf %851, %852 : vector<8x4xf32>
    %854 = arith.mulf %1, %844 : vector<8x4xf32>
    %855 = arith.mulf %7, %853 : vector<8x4xf32>
    %856 = arith.addf %854, %855 : vector<8x4xf32>
    %857 = arith.mulf %1, %847 : vector<8x4xf32>
    %858 = arith.mulf %7, %850 : vector<8x4xf32>
    %859 = arith.subf %857, %858 : vector<8x4xf32>
    %860 = arith.mulf %7, %847 : vector<8x4xf32>
    %861 = arith.mulf %1, %850 : vector<8x4xf32>
    %862 = arith.addf %860, %861 : vector<8x4xf32>
    %863 = arith.mulf %1, %853 : vector<8x4xf32>
    %864 = arith.mulf %7, %844 : vector<8x4xf32>
    %865 = arith.subf %863, %864 : vector<8x4xf32>
    %866 = arith.mulf %3, %856 : vector<8x4xf32>
    %867 = arith.mulf %9, %862 : vector<8x4xf32>
    %868 = arith.subf %866, %867 : vector<8x4xf32>
    %869 = arith.mulf %3, %859 : vector<8x4xf32>
    %870 = arith.mulf %9, %865 : vector<8x4xf32>
    %871 = arith.subf %869, %870 : vector<8x4xf32>
    %872 = arith.mulf %9, %856 : vector<8x4xf32>
    %873 = arith.mulf %3, %862 : vector<8x4xf32>
    %874 = arith.addf %872, %873 : vector<8x4xf32>
    %875 = arith.mulf %9, %859 : vector<8x4xf32>
    %876 = arith.mulf %3, %865 : vector<8x4xf32>
    %877 = arith.addf %875, %876 : vector<8x4xf32>
    %878 = arith.mulf %5, %868 : vector<8x4xf32>
    %879 = arith.mulf %11, %871 : vector<8x4xf32>
    %880 = arith.addf %878, %879 : vector<8x4xf32>
    %881 = arith.mulf %5, %871 : vector<8x4xf32>
    %882 = arith.mulf %11, %868 : vector<8x4xf32>
    %883 = arith.subf %881, %882 : vector<8x4xf32>
    %884 = arith.mulf %5, %874 : vector<8x4xf32>
    %885 = arith.mulf %11, %877 : vector<8x4xf32>
    %886 = arith.subf %884, %885 : vector<8x4xf32>
    %887 = arith.mulf %5, %877 : vector<8x4xf32>
    %888 = arith.mulf %11, %874 : vector<8x4xf32>
    %889 = arith.addf %887, %888 : vector<8x4xf32>
    %890 = arith.mulf %880, %880 : vector<8x4xf32>
    %891 = arith.mulf %883, %883 : vector<8x4xf32>
    %892 = arith.addf %890, %891 : vector<8x4xf32>
    %893 = arith.mulf %886, %886 : vector<8x4xf32>
    %894 = arith.mulf %889, %889 : vector<8x4xf32>
    %895 = arith.addf %893, %894 : vector<8x4xf32>
    %896 = arith.subf %892, %895 : vector<8x4xf32>
    %897 = arith.mulf %896, %13 : vector<8x4xf32>
    %cst_98 = arith.constant dense<0.000000e+00> : vector<8x32xf32>
    %898 = tpu.matmul %897, %17, %cst_98 {dimension_numbers = #tpu.dot_dimension_numbers<[1], [0], [0], [1], [0, 0, 1, 1], [], []>} : vector<8x4xf32>, vector<4x32xf32>, vector<8x32xf32> -> vector<8x32xf32>
    %899 = arith.addf %898, %18 : vector<8x32xf32>
    %900 = math.tanh %899 : vector<8x32xf32>
    %901 = arith.mulf %900, %19 : vector<8x32xf32>
    %902 = arith.addf %901, %20 : vector<8x32xf32>
    %903 = vector.extract_strided_slice %902 {offsets = [0, 0], sizes = [2, 32], strides = [1, 1]} : vector<8x32xf32> to vector<2x32xf32>
    %904 = vector.extract_strided_slice %902 {offsets = [2, 0], sizes = [2, 32], strides = [1, 1]} : vector<8x32xf32> to vector<2x32xf32>
    %905 = vector.extract_strided_slice %902 {offsets = [4, 0], sizes = [2, 32], strides = [1, 1]} : vector<8x32xf32> to vector<2x32xf32>
    %906 = vector.extract_strided_slice %902 {offsets = [6, 0], sizes = [2, 32], strides = [1, 1]} : vector<8x32xf32> to vector<2x32xf32>
    %907 = arith.mulf %903, %732 : vector<2x32xf32>
    %908 = arith.mulf %904, %905 : vector<2x32xf32>
    %909 = arith.addf %907, %908 : vector<2x32xf32>
    %910 = math.tanh %909 : vector<2x32xf32>
    %911 = arith.mulf %906, %910 : vector<2x32xf32>
    %c5_i32 = arith.constant 5 : i32
    %cst_99 = arith.constant dense<0.000000e+00> : vector<2x4xf32>
    %912 = tpu.matmul %911, %15, %cst_99 {dimension_numbers = #tpu.dot_dimension_numbers<[1], [0], [0], [1], [0, 0, 1, 1], [], []>} : vector<2x32xf32>, vector<32x4xf32>, vector<2x4xf32> -> vector<2x4xf32>
    %913 = arith.index_cast %c5_i32 : i32 to index
    %c0_100 = arith.constant 0 : index
    %c0_101 = arith.constant 0 : index
    %914 = vector.load %arg1[%913, %c0_100, %c0_101] : memref<8x2x4xf32, #tpu.memory_space<vmem>>, vector<1x2x4xf32>
    %915 = vector.shape_cast %914 : vector<1x2x4xf32> to vector<2x4xf32>
    %916 = arith.addf %912, %915 : vector<2x4xf32>
    %917 = vector.extract_strided_slice %916 {offsets = [0, 0], sizes = [1, 4], strides = [1, 1]} : vector<2x4xf32> to vector<1x4xf32>
    %918 = arith.mulf %917, %917 : vector<1x4xf32>
    %cst_102 = arith.constant 1.000000e+00 : f32
    %919 = vector.broadcast %cst_102 : f32 to vector<1x4xf32>
    %920 = arith.addf %919, %918 : vector<1x4xf32>
    %921 = math.rsqrt %920 : vector<1x4xf32>
    %cst_103 = arith.constant 1.000000e+00 : f32
    %922 = vector.broadcast %cst_103 : f32 to vector<1x4xf32>
    %923 = arith.addf %922, %921 : vector<1x4xf32>
    %cst_104 = arith.constant 5.000000e-01 : f32
    %924 = vector.broadcast %cst_104 : f32 to vector<1x4xf32>
    %925 = arith.mulf %924, %923 : vector<1x4xf32>
    %926 = math.rsqrt %925 : vector<1x4xf32>
    %927 = arith.mulf %925, %926 : vector<1x4xf32>
    %cst_105 = arith.constant 5.000000e-01 : f32
    %928 = vector.broadcast %cst_105 : f32 to vector<1x4xf32>
    %929 = arith.mulf %928, %917 : vector<1x4xf32>
    %930 = arith.mulf %929, %921 : vector<1x4xf32>
    %931 = arith.mulf %930, %926 : vector<1x4xf32>
    %932 = tpu.concatenate %916, %916, %916, %916 in 0 : vector<2x4xf32>, vector<2x4xf32>, vector<2x4xf32>, vector<2x4xf32> -> vector<8x4xf32>
    %cst_106 = arith.constant 5.000000e-01 : f32
    %933 = vector.broadcast %cst_106 : f32 to vector<8x4xf32>
    %934 = arith.mulf %933, %932 : vector<8x4xf32>
    %935 = math.cos %934 : vector<8x4xf32>
    %cst_107 = arith.constant 5.000000e-01 : f32
    %936 = vector.broadcast %cst_107 : f32 to vector<8x4xf32>
    %937 = arith.mulf %936, %932 : vector<8x4xf32>
    %938 = math.sin %937 : vector<8x4xf32>
    %cst_108 = arith.constant 0.000000e+00 : f32
    %939 = vector.broadcast %cst_108 : f32 to vector<8x4xf32>
    %cst_109 = arith.constant 0.000000e+00 : f32
    %940 = vector.broadcast %cst_109 : f32 to vector<8x4xf32>
    %cst_110 = arith.constant 0.000000e+00 : f32
    %941 = vector.broadcast %cst_110 : f32 to vector<8x4xf32>
    %942 = arith.subf %941, %938 : vector<8x4xf32>
    %943 = arith.addf %935, %940 : vector<8x4xf32>
    %cst_111 = arith.constant 0.707106769 : f32
    %944 = vector.broadcast %cst_111 : f32 to vector<8x4xf32>
    %945 = arith.mulf %943, %944 : vector<8x4xf32>
    %946 = arith.addf %939, %942 : vector<8x4xf32>
    %cst_112 = arith.constant 0.707106769 : f32
    %947 = vector.broadcast %cst_112 : f32 to vector<8x4xf32>
    %948 = arith.mulf %946, %947 : vector<8x4xf32>
    %949 = arith.subf %935, %940 : vector<8x4xf32>
    %cst_113 = arith.constant 0.707106769 : f32
    %950 = vector.broadcast %cst_113 : f32 to vector<8x4xf32>
    %951 = arith.mulf %949, %950 : vector<8x4xf32>
    %952 = arith.subf %939, %942 : vector<8x4xf32>
    %cst_114 = arith.constant 0.707106769 : f32
    %953 = vector.broadcast %cst_114 : f32 to vector<8x4xf32>
    %954 = arith.mulf %952, %953 : vector<8x4xf32>
    %955 = vector.broadcast %927 : vector<1x4xf32> to vector<8x4xf32>
    %956 = arith.mulf %955, %945 : vector<8x4xf32>
    %957 = vector.broadcast %931 : vector<1x4xf32> to vector<8x4xf32>
    %958 = arith.mulf %957, %951 : vector<8x4xf32>
    %959 = arith.subf %956, %958 : vector<8x4xf32>
    %960 = vector.broadcast %927 : vector<1x4xf32> to vector<8x4xf32>
    %961 = arith.mulf %960, %948 : vector<8x4xf32>
    %962 = vector.broadcast %931 : vector<1x4xf32> to vector<8x4xf32>
    %963 = arith.mulf %962, %954 : vector<8x4xf32>
    %964 = arith.subf %961, %963 : vector<8x4xf32>
    %965 = vector.broadcast %931 : vector<1x4xf32> to vector<8x4xf32>
    %966 = arith.mulf %965, %945 : vector<8x4xf32>
    %967 = vector.broadcast %927 : vector<1x4xf32> to vector<8x4xf32>
    %968 = arith.mulf %967, %951 : vector<8x4xf32>
    %969 = arith.addf %966, %968 : vector<8x4xf32>
    %970 = vector.broadcast %931 : vector<1x4xf32> to vector<8x4xf32>
    %971 = arith.mulf %970, %948 : vector<8x4xf32>
    %972 = vector.broadcast %927 : vector<1x4xf32> to vector<8x4xf32>
    %973 = arith.mulf %972, %954 : vector<8x4xf32>
    %974 = arith.addf %971, %973 : vector<8x4xf32>
    %975 = vector.broadcast %927 : vector<1x4xf32> to vector<8x4xf32>
    %976 = arith.mulf %975, %959 : vector<8x4xf32>
    %977 = vector.broadcast %931 : vector<1x4xf32> to vector<8x4xf32>
    %978 = arith.mulf %977, %964 : vector<8x4xf32>
    %979 = arith.addf %976, %978 : vector<8x4xf32>
    %980 = vector.broadcast %927 : vector<1x4xf32> to vector<8x4xf32>
    %981 = arith.mulf %980, %964 : vector<8x4xf32>
    %982 = vector.broadcast %931 : vector<1x4xf32> to vector<8x4xf32>
    %983 = arith.mulf %982, %959 : vector<8x4xf32>
    %984 = arith.subf %981, %983 : vector<8x4xf32>
    %985 = vector.broadcast %927 : vector<1x4xf32> to vector<8x4xf32>
    %986 = arith.mulf %985, %969 : vector<8x4xf32>
    %987 = vector.broadcast %931 : vector<1x4xf32> to vector<8x4xf32>
    %988 = arith.mulf %987, %974 : vector<8x4xf32>
    %989 = arith.subf %986, %988 : vector<8x4xf32>
    %990 = vector.broadcast %927 : vector<1x4xf32> to vector<8x4xf32>
    %991 = arith.mulf %990, %974 : vector<8x4xf32>
    %992 = vector.broadcast %931 : vector<1x4xf32> to vector<8x4xf32>
    %993 = arith.mulf %992, %969 : vector<8x4xf32>
    %994 = arith.addf %991, %993 : vector<8x4xf32>
    %995 = arith.mulf %1, %979 : vector<8x4xf32>
    %996 = arith.mulf %7, %994 : vector<8x4xf32>
    %997 = arith.addf %995, %996 : vector<8x4xf32>
    %998 = arith.mulf %1, %984 : vector<8x4xf32>
    %999 = arith.mulf %7, %989 : vector<8x4xf32>
    %1000 = arith.subf %998, %999 : vector<8x4xf32>
    %1001 = arith.mulf %7, %984 : vector<8x4xf32>
    %1002 = arith.mulf %1, %989 : vector<8x4xf32>
    %1003 = arith.addf %1001, %1002 : vector<8x4xf32>
    %1004 = arith.mulf %1, %994 : vector<8x4xf32>
    %1005 = arith.mulf %7, %979 : vector<8x4xf32>
    %1006 = arith.subf %1004, %1005 : vector<8x4xf32>
    %1007 = arith.mulf %3, %997 : vector<8x4xf32>
    %1008 = arith.mulf %9, %1003 : vector<8x4xf32>
    %1009 = arith.subf %1007, %1008 : vector<8x4xf32>
    %1010 = arith.mulf %3, %1000 : vector<8x4xf32>
    %1011 = arith.mulf %9, %1006 : vector<8x4xf32>
    %1012 = arith.subf %1010, %1011 : vector<8x4xf32>
    %1013 = arith.mulf %9, %997 : vector<8x4xf32>
    %1014 = arith.mulf %3, %1003 : vector<8x4xf32>
    %1015 = arith.addf %1013, %1014 : vector<8x4xf32>
    %1016 = arith.mulf %9, %1000 : vector<8x4xf32>
    %1017 = arith.mulf %3, %1006 : vector<8x4xf32>
    %1018 = arith.addf %1016, %1017 : vector<8x4xf32>
    %1019 = arith.mulf %5, %1009 : vector<8x4xf32>
    %1020 = arith.mulf %11, %1012 : vector<8x4xf32>
    %1021 = arith.addf %1019, %1020 : vector<8x4xf32>
    %1022 = arith.mulf %5, %1012 : vector<8x4xf32>
    %1023 = arith.mulf %11, %1009 : vector<8x4xf32>
    %1024 = arith.subf %1022, %1023 : vector<8x4xf32>
    %1025 = arith.mulf %5, %1015 : vector<8x4xf32>
    %1026 = arith.mulf %11, %1018 : vector<8x4xf32>
    %1027 = arith.subf %1025, %1026 : vector<8x4xf32>
    %1028 = arith.mulf %5, %1018 : vector<8x4xf32>
    %1029 = arith.mulf %11, %1015 : vector<8x4xf32>
    %1030 = arith.addf %1028, %1029 : vector<8x4xf32>
    %1031 = arith.mulf %1, %1021 : vector<8x4xf32>
    %1032 = arith.mulf %7, %1030 : vector<8x4xf32>
    %1033 = arith.addf %1031, %1032 : vector<8x4xf32>
    %1034 = arith.mulf %1, %1024 : vector<8x4xf32>
    %1035 = arith.mulf %7, %1027 : vector<8x4xf32>
    %1036 = arith.subf %1034, %1035 : vector<8x4xf32>
    %1037 = arith.mulf %7, %1024 : vector<8x4xf32>
    %1038 = arith.mulf %1, %1027 : vector<8x4xf32>
    %1039 = arith.addf %1037, %1038 : vector<8x4xf32>
    %1040 = arith.mulf %1, %1030 : vector<8x4xf32>
    %1041 = arith.mulf %7, %1021 : vector<8x4xf32>
    %1042 = arith.subf %1040, %1041 : vector<8x4xf32>
    %1043 = arith.mulf %3, %1033 : vector<8x4xf32>
    %1044 = arith.mulf %9, %1039 : vector<8x4xf32>
    %1045 = arith.subf %1043, %1044 : vector<8x4xf32>
    %1046 = arith.mulf %3, %1036 : vector<8x4xf32>
    %1047 = arith.mulf %9, %1042 : vector<8x4xf32>
    %1048 = arith.subf %1046, %1047 : vector<8x4xf32>
    %1049 = arith.mulf %9, %1033 : vector<8x4xf32>
    %1050 = arith.mulf %3, %1039 : vector<8x4xf32>
    %1051 = arith.addf %1049, %1050 : vector<8x4xf32>
    %1052 = arith.mulf %9, %1036 : vector<8x4xf32>
    %1053 = arith.mulf %3, %1042 : vector<8x4xf32>
    %1054 = arith.addf %1052, %1053 : vector<8x4xf32>
    %1055 = arith.mulf %5, %1045 : vector<8x4xf32>
    %1056 = arith.mulf %11, %1048 : vector<8x4xf32>
    %1057 = arith.addf %1055, %1056 : vector<8x4xf32>
    %1058 = arith.mulf %5, %1048 : vector<8x4xf32>
    %1059 = arith.mulf %11, %1045 : vector<8x4xf32>
    %1060 = arith.subf %1058, %1059 : vector<8x4xf32>
    %1061 = arith.mulf %5, %1051 : vector<8x4xf32>
    %1062 = arith.mulf %11, %1054 : vector<8x4xf32>
    %1063 = arith.subf %1061, %1062 : vector<8x4xf32>
    %1064 = arith.mulf %5, %1054 : vector<8x4xf32>
    %1065 = arith.mulf %11, %1051 : vector<8x4xf32>
    %1066 = arith.addf %1064, %1065 : vector<8x4xf32>
    %1067 = arith.mulf %1057, %1057 : vector<8x4xf32>
    %1068 = arith.mulf %1060, %1060 : vector<8x4xf32>
    %1069 = arith.addf %1067, %1068 : vector<8x4xf32>
    %1070 = arith.mulf %1063, %1063 : vector<8x4xf32>
    %1071 = arith.mulf %1066, %1066 : vector<8x4xf32>
    %1072 = arith.addf %1070, %1071 : vector<8x4xf32>
    %1073 = arith.subf %1069, %1072 : vector<8x4xf32>
    %1074 = arith.mulf %1073, %13 : vector<8x4xf32>
    %cst_115 = arith.constant dense<0.000000e+00> : vector<8x32xf32>
    %1075 = tpu.matmul %1074, %17, %cst_115 {dimension_numbers = #tpu.dot_dimension_numbers<[1], [0], [0], [1], [0, 0, 1, 1], [], []>} : vector<8x4xf32>, vector<4x32xf32>, vector<8x32xf32> -> vector<8x32xf32>
    %1076 = arith.addf %1075, %18 : vector<8x32xf32>
    %1077 = math.tanh %1076 : vector<8x32xf32>
    %1078 = arith.mulf %1077, %19 : vector<8x32xf32>
    %1079 = arith.addf %1078, %20 : vector<8x32xf32>
    %1080 = vector.extract_strided_slice %1079 {offsets = [0, 0], sizes = [2, 32], strides = [1, 1]} : vector<8x32xf32> to vector<2x32xf32>
    %1081 = vector.extract_strided_slice %1079 {offsets = [2, 0], sizes = [2, 32], strides = [1, 1]} : vector<8x32xf32> to vector<2x32xf32>
    %1082 = vector.extract_strided_slice %1079 {offsets = [4, 0], sizes = [2, 32], strides = [1, 1]} : vector<8x32xf32> to vector<2x32xf32>
    %1083 = vector.extract_strided_slice %1079 {offsets = [6, 0], sizes = [2, 32], strides = [1, 1]} : vector<8x32xf32> to vector<2x32xf32>
    %1084 = arith.mulf %1080, %909 : vector<2x32xf32>
    %1085 = arith.mulf %1081, %1082 : vector<2x32xf32>
    %1086 = arith.addf %1084, %1085 : vector<2x32xf32>
    %1087 = math.tanh %1086 : vector<2x32xf32>
    %1088 = arith.mulf %1083, %1087 : vector<2x32xf32>
    %c6_i32 = arith.constant 6 : i32
    %cst_116 = arith.constant dense<0.000000e+00> : vector<2x4xf32>
    %1089 = tpu.matmul %1088, %15, %cst_116 {dimension_numbers = #tpu.dot_dimension_numbers<[1], [0], [0], [1], [0, 0, 1, 1], [], []>} : vector<2x32xf32>, vector<32x4xf32>, vector<2x4xf32> -> vector<2x4xf32>
    %1090 = arith.index_cast %c6_i32 : i32 to index
    %c0_117 = arith.constant 0 : index
    %c0_118 = arith.constant 0 : index
    %1091 = vector.load %arg1[%1090, %c0_117, %c0_118] : memref<8x2x4xf32, #tpu.memory_space<vmem>>, vector<1x2x4xf32>
    %1092 = vector.shape_cast %1091 : vector<1x2x4xf32> to vector<2x4xf32>
    %1093 = arith.addf %1089, %1092 : vector<2x4xf32>
    %1094 = vector.extract_strided_slice %1093 {offsets = [0, 0], sizes = [1, 4], strides = [1, 1]} : vector<2x4xf32> to vector<1x4xf32>
    %1095 = arith.mulf %1094, %1094 : vector<1x4xf32>
    %cst_119 = arith.constant 1.000000e+00 : f32
    %1096 = vector.broadcast %cst_119 : f32 to vector<1x4xf32>
    %1097 = arith.addf %1096, %1095 : vector<1x4xf32>
    %1098 = math.rsqrt %1097 : vector<1x4xf32>
    %cst_120 = arith.constant 1.000000e+00 : f32
    %1099 = vector.broadcast %cst_120 : f32 to vector<1x4xf32>
    %1100 = arith.addf %1099, %1098 : vector<1x4xf32>
    %cst_121 = arith.constant 5.000000e-01 : f32
    %1101 = vector.broadcast %cst_121 : f32 to vector<1x4xf32>
    %1102 = arith.mulf %1101, %1100 : vector<1x4xf32>
    %1103 = math.rsqrt %1102 : vector<1x4xf32>
    %1104 = arith.mulf %1102, %1103 : vector<1x4xf32>
    %cst_122 = arith.constant 5.000000e-01 : f32
    %1105 = vector.broadcast %cst_122 : f32 to vector<1x4xf32>
    %1106 = arith.mulf %1105, %1094 : vector<1x4xf32>
    %1107 = arith.mulf %1106, %1098 : vector<1x4xf32>
    %1108 = arith.mulf %1107, %1103 : vector<1x4xf32>
    %1109 = tpu.concatenate %1093, %1093, %1093, %1093 in 0 : vector<2x4xf32>, vector<2x4xf32>, vector<2x4xf32>, vector<2x4xf32> -> vector<8x4xf32>
    %cst_123 = arith.constant 5.000000e-01 : f32
    %1110 = vector.broadcast %cst_123 : f32 to vector<8x4xf32>
    %1111 = arith.mulf %1110, %1109 : vector<8x4xf32>
    %1112 = math.cos %1111 : vector<8x4xf32>
    %cst_124 = arith.constant 5.000000e-01 : f32
    %1113 = vector.broadcast %cst_124 : f32 to vector<8x4xf32>
    %1114 = arith.mulf %1113, %1109 : vector<8x4xf32>
    %1115 = math.sin %1114 : vector<8x4xf32>
    %cst_125 = arith.constant 0.000000e+00 : f32
    %1116 = vector.broadcast %cst_125 : f32 to vector<8x4xf32>
    %cst_126 = arith.constant 0.000000e+00 : f32
    %1117 = vector.broadcast %cst_126 : f32 to vector<8x4xf32>
    %cst_127 = arith.constant 0.000000e+00 : f32
    %1118 = vector.broadcast %cst_127 : f32 to vector<8x4xf32>
    %1119 = arith.subf %1118, %1115 : vector<8x4xf32>
    %1120 = arith.addf %1112, %1117 : vector<8x4xf32>
    %cst_128 = arith.constant 0.707106769 : f32
    %1121 = vector.broadcast %cst_128 : f32 to vector<8x4xf32>
    %1122 = arith.mulf %1120, %1121 : vector<8x4xf32>
    %1123 = arith.addf %1116, %1119 : vector<8x4xf32>
    %cst_129 = arith.constant 0.707106769 : f32
    %1124 = vector.broadcast %cst_129 : f32 to vector<8x4xf32>
    %1125 = arith.mulf %1123, %1124 : vector<8x4xf32>
    %1126 = arith.subf %1112, %1117 : vector<8x4xf32>
    %cst_130 = arith.constant 0.707106769 : f32
    %1127 = vector.broadcast %cst_130 : f32 to vector<8x4xf32>
    %1128 = arith.mulf %1126, %1127 : vector<8x4xf32>
    %1129 = arith.subf %1116, %1119 : vector<8x4xf32>
    %cst_131 = arith.constant 0.707106769 : f32
    %1130 = vector.broadcast %cst_131 : f32 to vector<8x4xf32>
    %1131 = arith.mulf %1129, %1130 : vector<8x4xf32>
    %1132 = vector.broadcast %1104 : vector<1x4xf32> to vector<8x4xf32>
    %1133 = arith.mulf %1132, %1122 : vector<8x4xf32>
    %1134 = vector.broadcast %1108 : vector<1x4xf32> to vector<8x4xf32>
    %1135 = arith.mulf %1134, %1128 : vector<8x4xf32>
    %1136 = arith.subf %1133, %1135 : vector<8x4xf32>
    %1137 = vector.broadcast %1104 : vector<1x4xf32> to vector<8x4xf32>
    %1138 = arith.mulf %1137, %1125 : vector<8x4xf32>
    %1139 = vector.broadcast %1108 : vector<1x4xf32> to vector<8x4xf32>
    %1140 = arith.mulf %1139, %1131 : vector<8x4xf32>
    %1141 = arith.subf %1138, %1140 : vector<8x4xf32>
    %1142 = vector.broadcast %1108 : vector<1x4xf32> to vector<8x4xf32>
    %1143 = arith.mulf %1142, %1122 : vector<8x4xf32>
    %1144 = vector.broadcast %1104 : vector<1x4xf32> to vector<8x4xf32>
    %1145 = arith.mulf %1144, %1128 : vector<8x4xf32>
    %1146 = arith.addf %1143, %1145 : vector<8x4xf32>
    %1147 = vector.broadcast %1108 : vector<1x4xf32> to vector<8x4xf32>
    %1148 = arith.mulf %1147, %1125 : vector<8x4xf32>
    %1149 = vector.broadcast %1104 : vector<1x4xf32> to vector<8x4xf32>
    %1150 = arith.mulf %1149, %1131 : vector<8x4xf32>
    %1151 = arith.addf %1148, %1150 : vector<8x4xf32>
    %1152 = vector.broadcast %1104 : vector<1x4xf32> to vector<8x4xf32>
    %1153 = arith.mulf %1152, %1136 : vector<8x4xf32>
    %1154 = vector.broadcast %1108 : vector<1x4xf32> to vector<8x4xf32>
    %1155 = arith.mulf %1154, %1141 : vector<8x4xf32>
    %1156 = arith.addf %1153, %1155 : vector<8x4xf32>
    %1157 = vector.broadcast %1104 : vector<1x4xf32> to vector<8x4xf32>
    %1158 = arith.mulf %1157, %1141 : vector<8x4xf32>
    %1159 = vector.broadcast %1108 : vector<1x4xf32> to vector<8x4xf32>
    %1160 = arith.mulf %1159, %1136 : vector<8x4xf32>
    %1161 = arith.subf %1158, %1160 : vector<8x4xf32>
    %1162 = vector.broadcast %1104 : vector<1x4xf32> to vector<8x4xf32>
    %1163 = arith.mulf %1162, %1146 : vector<8x4xf32>
    %1164 = vector.broadcast %1108 : vector<1x4xf32> to vector<8x4xf32>
    %1165 = arith.mulf %1164, %1151 : vector<8x4xf32>
    %1166 = arith.subf %1163, %1165 : vector<8x4xf32>
    %1167 = vector.broadcast %1104 : vector<1x4xf32> to vector<8x4xf32>
    %1168 = arith.mulf %1167, %1151 : vector<8x4xf32>
    %1169 = vector.broadcast %1108 : vector<1x4xf32> to vector<8x4xf32>
    %1170 = arith.mulf %1169, %1146 : vector<8x4xf32>
    %1171 = arith.addf %1168, %1170 : vector<8x4xf32>
    %1172 = arith.mulf %1, %1156 : vector<8x4xf32>
    %1173 = arith.mulf %7, %1171 : vector<8x4xf32>
    %1174 = arith.addf %1172, %1173 : vector<8x4xf32>
    %1175 = arith.mulf %1, %1161 : vector<8x4xf32>
    %1176 = arith.mulf %7, %1166 : vector<8x4xf32>
    %1177 = arith.subf %1175, %1176 : vector<8x4xf32>
    %1178 = arith.mulf %7, %1161 : vector<8x4xf32>
    %1179 = arith.mulf %1, %1166 : vector<8x4xf32>
    %1180 = arith.addf %1178, %1179 : vector<8x4xf32>
    %1181 = arith.mulf %1, %1171 : vector<8x4xf32>
    %1182 = arith.mulf %7, %1156 : vector<8x4xf32>
    %1183 = arith.subf %1181, %1182 : vector<8x4xf32>
    %1184 = arith.mulf %3, %1174 : vector<8x4xf32>
    %1185 = arith.mulf %9, %1180 : vector<8x4xf32>
    %1186 = arith.subf %1184, %1185 : vector<8x4xf32>
    %1187 = arith.mulf %3, %1177 : vector<8x4xf32>
    %1188 = arith.mulf %9, %1183 : vector<8x4xf32>
    %1189 = arith.subf %1187, %1188 : vector<8x4xf32>
    %1190 = arith.mulf %9, %1174 : vector<8x4xf32>
    %1191 = arith.mulf %3, %1180 : vector<8x4xf32>
    %1192 = arith.addf %1190, %1191 : vector<8x4xf32>
    %1193 = arith.mulf %9, %1177 : vector<8x4xf32>
    %1194 = arith.mulf %3, %1183 : vector<8x4xf32>
    %1195 = arith.addf %1193, %1194 : vector<8x4xf32>
    %1196 = arith.mulf %5, %1186 : vector<8x4xf32>
    %1197 = arith.mulf %11, %1189 : vector<8x4xf32>
    %1198 = arith.addf %1196, %1197 : vector<8x4xf32>
    %1199 = arith.mulf %5, %1189 : vector<8x4xf32>
    %1200 = arith.mulf %11, %1186 : vector<8x4xf32>
    %1201 = arith.subf %1199, %1200 : vector<8x4xf32>
    %1202 = arith.mulf %5, %1192 : vector<8x4xf32>
    %1203 = arith.mulf %11, %1195 : vector<8x4xf32>
    %1204 = arith.subf %1202, %1203 : vector<8x4xf32>
    %1205 = arith.mulf %5, %1195 : vector<8x4xf32>
    %1206 = arith.mulf %11, %1192 : vector<8x4xf32>
    %1207 = arith.addf %1205, %1206 : vector<8x4xf32>
    %1208 = arith.mulf %1, %1198 : vector<8x4xf32>
    %1209 = arith.mulf %7, %1207 : vector<8x4xf32>
    %1210 = arith.addf %1208, %1209 : vector<8x4xf32>
    %1211 = arith.mulf %1, %1201 : vector<8x4xf32>
    %1212 = arith.mulf %7, %1204 : vector<8x4xf32>
    %1213 = arith.subf %1211, %1212 : vector<8x4xf32>
    %1214 = arith.mulf %7, %1201 : vector<8x4xf32>
    %1215 = arith.mulf %1, %1204 : vector<8x4xf32>
    %1216 = arith.addf %1214, %1215 : vector<8x4xf32>
    %1217 = arith.mulf %1, %1207 : vector<8x4xf32>
    %1218 = arith.mulf %7, %1198 : vector<8x4xf32>
    %1219 = arith.subf %1217, %1218 : vector<8x4xf32>
    %1220 = arith.mulf %3, %1210 : vector<8x4xf32>
    %1221 = arith.mulf %9, %1216 : vector<8x4xf32>
    %1222 = arith.subf %1220, %1221 : vector<8x4xf32>
    %1223 = arith.mulf %3, %1213 : vector<8x4xf32>
    %1224 = arith.mulf %9, %1219 : vector<8x4xf32>
    %1225 = arith.subf %1223, %1224 : vector<8x4xf32>
    %1226 = arith.mulf %9, %1210 : vector<8x4xf32>
    %1227 = arith.mulf %3, %1216 : vector<8x4xf32>
    %1228 = arith.addf %1226, %1227 : vector<8x4xf32>
    %1229 = arith.mulf %9, %1213 : vector<8x4xf32>
    %1230 = arith.mulf %3, %1219 : vector<8x4xf32>
    %1231 = arith.addf %1229, %1230 : vector<8x4xf32>
    %1232 = arith.mulf %5, %1222 : vector<8x4xf32>
    %1233 = arith.mulf %11, %1225 : vector<8x4xf32>
    %1234 = arith.addf %1232, %1233 : vector<8x4xf32>
    %1235 = arith.mulf %5, %1225 : vector<8x4xf32>
    %1236 = arith.mulf %11, %1222 : vector<8x4xf32>
    %1237 = arith.subf %1235, %1236 : vector<8x4xf32>
    %1238 = arith.mulf %5, %1228 : vector<8x4xf32>
    %1239 = arith.mulf %11, %1231 : vector<8x4xf32>
    %1240 = arith.subf %1238, %1239 : vector<8x4xf32>
    %1241 = arith.mulf %5, %1231 : vector<8x4xf32>
    %1242 = arith.mulf %11, %1228 : vector<8x4xf32>
    %1243 = arith.addf %1241, %1242 : vector<8x4xf32>
    %1244 = arith.mulf %1234, %1234 : vector<8x4xf32>
    %1245 = arith.mulf %1237, %1237 : vector<8x4xf32>
    %1246 = arith.addf %1244, %1245 : vector<8x4xf32>
    %1247 = arith.mulf %1240, %1240 : vector<8x4xf32>
    %1248 = arith.mulf %1243, %1243 : vector<8x4xf32>
    %1249 = arith.addf %1247, %1248 : vector<8x4xf32>
    %1250 = arith.subf %1246, %1249 : vector<8x4xf32>
    %1251 = arith.mulf %1250, %13 : vector<8x4xf32>
    %cst_132 = arith.constant dense<0.000000e+00> : vector<8x32xf32>
    %1252 = tpu.matmul %1251, %17, %cst_132 {dimension_numbers = #tpu.dot_dimension_numbers<[1], [0], [0], [1], [0, 0, 1, 1], [], []>} : vector<8x4xf32>, vector<4x32xf32>, vector<8x32xf32> -> vector<8x32xf32>
    %1253 = arith.addf %1252, %18 : vector<8x32xf32>
    %1254 = math.tanh %1253 : vector<8x32xf32>
    %1255 = arith.mulf %1254, %19 : vector<8x32xf32>
    %1256 = arith.addf %1255, %20 : vector<8x32xf32>
    %1257 = vector.extract_strided_slice %1256 {offsets = [0, 0], sizes = [2, 32], strides = [1, 1]} : vector<8x32xf32> to vector<2x32xf32>
    %1258 = vector.extract_strided_slice %1256 {offsets = [2, 0], sizes = [2, 32], strides = [1, 1]} : vector<8x32xf32> to vector<2x32xf32>
    %1259 = vector.extract_strided_slice %1256 {offsets = [4, 0], sizes = [2, 32], strides = [1, 1]} : vector<8x32xf32> to vector<2x32xf32>
    %1260 = vector.extract_strided_slice %1256 {offsets = [6, 0], sizes = [2, 32], strides = [1, 1]} : vector<8x32xf32> to vector<2x32xf32>
    %1261 = arith.mulf %1257, %1086 : vector<2x32xf32>
    %1262 = arith.mulf %1258, %1259 : vector<2x32xf32>
    %1263 = arith.addf %1261, %1262 : vector<2x32xf32>
    %1264 = math.tanh %1263 : vector<2x32xf32>
    %1265 = arith.mulf %1260, %1264 : vector<2x32xf32>
    %c7_i32 = arith.constant 7 : i32
    %cst_133 = arith.constant dense<0.000000e+00> : vector<2x4xf32>
    %1266 = tpu.matmul %1265, %15, %cst_133 {dimension_numbers = #tpu.dot_dimension_numbers<[1], [0], [0], [1], [0, 0, 1, 1], [], []>} : vector<2x32xf32>, vector<32x4xf32>, vector<2x4xf32> -> vector<2x4xf32>
    %1267 = arith.index_cast %c7_i32 : i32 to index
    %c0_134 = arith.constant 0 : index
    %c0_135 = arith.constant 0 : index
    %1268 = vector.load %arg1[%1267, %c0_134, %c0_135] : memref<8x2x4xf32, #tpu.memory_space<vmem>>, vector<1x2x4xf32>
    %1269 = vector.shape_cast %1268 : vector<1x2x4xf32> to vector<2x4xf32>
    %1270 = arith.addf %1266, %1269 : vector<2x4xf32>
    %1271 = vector.extract_strided_slice %1270 {offsets = [0, 0], sizes = [1, 4], strides = [1, 1]} : vector<2x4xf32> to vector<1x4xf32>
    %1272 = arith.mulf %1271, %1271 : vector<1x4xf32>
    %cst_136 = arith.constant 1.000000e+00 : f32
    %1273 = vector.broadcast %cst_136 : f32 to vector<1x4xf32>
    %1274 = arith.addf %1273, %1272 : vector<1x4xf32>
    %1275 = math.rsqrt %1274 : vector<1x4xf32>
    %cst_137 = arith.constant 1.000000e+00 : f32
    %1276 = vector.broadcast %cst_137 : f32 to vector<1x4xf32>
    %1277 = arith.addf %1276, %1275 : vector<1x4xf32>
    %cst_138 = arith.constant 5.000000e-01 : f32
    %1278 = vector.broadcast %cst_138 : f32 to vector<1x4xf32>
    %1279 = arith.mulf %1278, %1277 : vector<1x4xf32>
    %1280 = math.rsqrt %1279 : vector<1x4xf32>
    %1281 = arith.mulf %1279, %1280 : vector<1x4xf32>
    %cst_139 = arith.constant 5.000000e-01 : f32
    %1282 = vector.broadcast %cst_139 : f32 to vector<1x4xf32>
    %1283 = arith.mulf %1282, %1271 : vector<1x4xf32>
    %1284 = arith.mulf %1283, %1275 : vector<1x4xf32>
    %1285 = arith.mulf %1284, %1280 : vector<1x4xf32>
    %1286 = tpu.concatenate %1270, %1270, %1270, %1270 in 0 : vector<2x4xf32>, vector<2x4xf32>, vector<2x4xf32>, vector<2x4xf32> -> vector<8x4xf32>
    %cst_140 = arith.constant 5.000000e-01 : f32
    %1287 = vector.broadcast %cst_140 : f32 to vector<8x4xf32>
    %1288 = arith.mulf %1287, %1286 : vector<8x4xf32>
    %1289 = math.cos %1288 : vector<8x4xf32>
    %cst_141 = arith.constant 5.000000e-01 : f32
    %1290 = vector.broadcast %cst_141 : f32 to vector<8x4xf32>
    %1291 = arith.mulf %1290, %1286 : vector<8x4xf32>
    %1292 = math.sin %1291 : vector<8x4xf32>
    %cst_142 = arith.constant 0.000000e+00 : f32
    %1293 = vector.broadcast %cst_142 : f32 to vector<8x4xf32>
    %cst_143 = arith.constant 0.000000e+00 : f32
    %1294 = vector.broadcast %cst_143 : f32 to vector<8x4xf32>
    %cst_144 = arith.constant 0.000000e+00 : f32
    %1295 = vector.broadcast %cst_144 : f32 to vector<8x4xf32>
    %1296 = arith.subf %1295, %1292 : vector<8x4xf32>
    %1297 = arith.addf %1289, %1294 : vector<8x4xf32>
    %cst_145 = arith.constant 0.707106769 : f32
    %1298 = vector.broadcast %cst_145 : f32 to vector<8x4xf32>
    %1299 = arith.mulf %1297, %1298 : vector<8x4xf32>
    %1300 = arith.addf %1293, %1296 : vector<8x4xf32>
    %cst_146 = arith.constant 0.707106769 : f32
    %1301 = vector.broadcast %cst_146 : f32 to vector<8x4xf32>
    %1302 = arith.mulf %1300, %1301 : vector<8x4xf32>
    %1303 = arith.subf %1289, %1294 : vector<8x4xf32>
    %cst_147 = arith.constant 0.707106769 : f32
    %1304 = vector.broadcast %cst_147 : f32 to vector<8x4xf32>
    %1305 = arith.mulf %1303, %1304 : vector<8x4xf32>
    %1306 = arith.subf %1293, %1296 : vector<8x4xf32>
    %cst_148 = arith.constant 0.707106769 : f32
    %1307 = vector.broadcast %cst_148 : f32 to vector<8x4xf32>
    %1308 = arith.mulf %1306, %1307 : vector<8x4xf32>
    %1309 = vector.broadcast %1281 : vector<1x4xf32> to vector<8x4xf32>
    %1310 = arith.mulf %1309, %1299 : vector<8x4xf32>
    %1311 = vector.broadcast %1285 : vector<1x4xf32> to vector<8x4xf32>
    %1312 = arith.mulf %1311, %1305 : vector<8x4xf32>
    %1313 = arith.subf %1310, %1312 : vector<8x4xf32>
    %1314 = vector.broadcast %1281 : vector<1x4xf32> to vector<8x4xf32>
    %1315 = arith.mulf %1314, %1302 : vector<8x4xf32>
    %1316 = vector.broadcast %1285 : vector<1x4xf32> to vector<8x4xf32>
    %1317 = arith.mulf %1316, %1308 : vector<8x4xf32>
    %1318 = arith.subf %1315, %1317 : vector<8x4xf32>
    %1319 = vector.broadcast %1285 : vector<1x4xf32> to vector<8x4xf32>
    %1320 = arith.mulf %1319, %1299 : vector<8x4xf32>
    %1321 = vector.broadcast %1281 : vector<1x4xf32> to vector<8x4xf32>
    %1322 = arith.mulf %1321, %1305 : vector<8x4xf32>
    %1323 = arith.addf %1320, %1322 : vector<8x4xf32>
    %1324 = vector.broadcast %1285 : vector<1x4xf32> to vector<8x4xf32>
    %1325 = arith.mulf %1324, %1302 : vector<8x4xf32>
    %1326 = vector.broadcast %1281 : vector<1x4xf32> to vector<8x4xf32>
    %1327 = arith.mulf %1326, %1308 : vector<8x4xf32>
    %1328 = arith.addf %1325, %1327 : vector<8x4xf32>
    %1329 = vector.broadcast %1281 : vector<1x4xf32> to vector<8x4xf32>
    %1330 = arith.mulf %1329, %1313 : vector<8x4xf32>
    %1331 = vector.broadcast %1285 : vector<1x4xf32> to vector<8x4xf32>
    %1332 = arith.mulf %1331, %1318 : vector<8x4xf32>
    %1333 = arith.addf %1330, %1332 : vector<8x4xf32>
    %1334 = vector.broadcast %1281 : vector<1x4xf32> to vector<8x4xf32>
    %1335 = arith.mulf %1334, %1318 : vector<8x4xf32>
    %1336 = vector.broadcast %1285 : vector<1x4xf32> to vector<8x4xf32>
    %1337 = arith.mulf %1336, %1313 : vector<8x4xf32>
    %1338 = arith.subf %1335, %1337 : vector<8x4xf32>
    %1339 = vector.broadcast %1281 : vector<1x4xf32> to vector<8x4xf32>
    %1340 = arith.mulf %1339, %1323 : vector<8x4xf32>
    %1341 = vector.broadcast %1285 : vector<1x4xf32> to vector<8x4xf32>
    %1342 = arith.mulf %1341, %1328 : vector<8x4xf32>
    %1343 = arith.subf %1340, %1342 : vector<8x4xf32>
    %1344 = vector.broadcast %1281 : vector<1x4xf32> to vector<8x4xf32>
    %1345 = arith.mulf %1344, %1328 : vector<8x4xf32>
    %1346 = vector.broadcast %1285 : vector<1x4xf32> to vector<8x4xf32>
    %1347 = arith.mulf %1346, %1323 : vector<8x4xf32>
    %1348 = arith.addf %1345, %1347 : vector<8x4xf32>
    %1349 = arith.mulf %1, %1333 : vector<8x4xf32>
    %1350 = arith.mulf %7, %1348 : vector<8x4xf32>
    %1351 = arith.addf %1349, %1350 : vector<8x4xf32>
    %1352 = arith.mulf %1, %1338 : vector<8x4xf32>
    %1353 = arith.mulf %7, %1343 : vector<8x4xf32>
    %1354 = arith.subf %1352, %1353 : vector<8x4xf32>
    %1355 = arith.mulf %7, %1338 : vector<8x4xf32>
    %1356 = arith.mulf %1, %1343 : vector<8x4xf32>
    %1357 = arith.addf %1355, %1356 : vector<8x4xf32>
    %1358 = arith.mulf %1, %1348 : vector<8x4xf32>
    %1359 = arith.mulf %7, %1333 : vector<8x4xf32>
    %1360 = arith.subf %1358, %1359 : vector<8x4xf32>
    %1361 = arith.mulf %3, %1351 : vector<8x4xf32>
    %1362 = arith.mulf %9, %1357 : vector<8x4xf32>
    %1363 = arith.subf %1361, %1362 : vector<8x4xf32>
    %1364 = arith.mulf %3, %1354 : vector<8x4xf32>
    %1365 = arith.mulf %9, %1360 : vector<8x4xf32>
    %1366 = arith.subf %1364, %1365 : vector<8x4xf32>
    %1367 = arith.mulf %9, %1351 : vector<8x4xf32>
    %1368 = arith.mulf %3, %1357 : vector<8x4xf32>
    %1369 = arith.addf %1367, %1368 : vector<8x4xf32>
    %1370 = arith.mulf %9, %1354 : vector<8x4xf32>
    %1371 = arith.mulf %3, %1360 : vector<8x4xf32>
    %1372 = arith.addf %1370, %1371 : vector<8x4xf32>
    %1373 = arith.mulf %5, %1363 : vector<8x4xf32>
    %1374 = arith.mulf %11, %1366 : vector<8x4xf32>
    %1375 = arith.addf %1373, %1374 : vector<8x4xf32>
    %1376 = arith.mulf %5, %1366 : vector<8x4xf32>
    %1377 = arith.mulf %11, %1363 : vector<8x4xf32>
    %1378 = arith.subf %1376, %1377 : vector<8x4xf32>
    %1379 = arith.mulf %5, %1369 : vector<8x4xf32>
    %1380 = arith.mulf %11, %1372 : vector<8x4xf32>
    %1381 = arith.subf %1379, %1380 : vector<8x4xf32>
    %1382 = arith.mulf %5, %1372 : vector<8x4xf32>
    %1383 = arith.mulf %11, %1369 : vector<8x4xf32>
    %1384 = arith.addf %1382, %1383 : vector<8x4xf32>
    %1385 = arith.mulf %1, %1375 : vector<8x4xf32>
    %1386 = arith.mulf %7, %1384 : vector<8x4xf32>
    %1387 = arith.addf %1385, %1386 : vector<8x4xf32>
    %1388 = arith.mulf %1, %1378 : vector<8x4xf32>
    %1389 = arith.mulf %7, %1381 : vector<8x4xf32>
    %1390 = arith.subf %1388, %1389 : vector<8x4xf32>
    %1391 = arith.mulf %7, %1378 : vector<8x4xf32>
    %1392 = arith.mulf %1, %1381 : vector<8x4xf32>
    %1393 = arith.addf %1391, %1392 : vector<8x4xf32>
    %1394 = arith.mulf %1, %1384 : vector<8x4xf32>
    %1395 = arith.mulf %7, %1375 : vector<8x4xf32>
    %1396 = arith.subf %1394, %1395 : vector<8x4xf32>
    %1397 = arith.mulf %3, %1387 : vector<8x4xf32>
    %1398 = arith.mulf %9, %1393 : vector<8x4xf32>
    %1399 = arith.subf %1397, %1398 : vector<8x4xf32>
    %1400 = arith.mulf %3, %1390 : vector<8x4xf32>
    %1401 = arith.mulf %9, %1396 : vector<8x4xf32>
    %1402 = arith.subf %1400, %1401 : vector<8x4xf32>
    %1403 = arith.mulf %9, %1387 : vector<8x4xf32>
    %1404 = arith.mulf %3, %1393 : vector<8x4xf32>
    %1405 = arith.addf %1403, %1404 : vector<8x4xf32>
    %1406 = arith.mulf %9, %1390 : vector<8x4xf32>
    %1407 = arith.mulf %3, %1396 : vector<8x4xf32>
    %1408 = arith.addf %1406, %1407 : vector<8x4xf32>
    %1409 = arith.mulf %5, %1399 : vector<8x4xf32>
    %1410 = arith.mulf %11, %1402 : vector<8x4xf32>
    %1411 = arith.addf %1409, %1410 : vector<8x4xf32>
    %1412 = arith.mulf %5, %1402 : vector<8x4xf32>
    %1413 = arith.mulf %11, %1399 : vector<8x4xf32>
    %1414 = arith.subf %1412, %1413 : vector<8x4xf32>
    %1415 = arith.mulf %5, %1405 : vector<8x4xf32>
    %1416 = arith.mulf %11, %1408 : vector<8x4xf32>
    %1417 = arith.subf %1415, %1416 : vector<8x4xf32>
    %1418 = arith.mulf %5, %1408 : vector<8x4xf32>
    %1419 = arith.mulf %11, %1405 : vector<8x4xf32>
    %1420 = arith.addf %1418, %1419 : vector<8x4xf32>
    %1421 = arith.mulf %1411, %1411 : vector<8x4xf32>
    %1422 = arith.mulf %1414, %1414 : vector<8x4xf32>
    %1423 = arith.addf %1421, %1422 : vector<8x4xf32>
    %1424 = arith.mulf %1417, %1417 : vector<8x4xf32>
    %1425 = arith.mulf %1420, %1420 : vector<8x4xf32>
    %1426 = arith.addf %1424, %1425 : vector<8x4xf32>
    %1427 = arith.subf %1423, %1426 : vector<8x4xf32>
    %1428 = arith.mulf %1427, %13 : vector<8x4xf32>
    %cst_149 = arith.constant dense<0.000000e+00> : vector<8x32xf32>
    %1429 = tpu.matmul %1428, %17, %cst_149 {dimension_numbers = #tpu.dot_dimension_numbers<[1], [0], [0], [1], [0, 0, 1, 1], [], []>} : vector<8x4xf32>, vector<4x32xf32>, vector<8x32xf32> -> vector<8x32xf32>
    %1430 = arith.addf %1429, %18 : vector<8x32xf32>
    %1431 = math.tanh %1430 : vector<8x32xf32>
    %1432 = arith.mulf %1431, %19 : vector<8x32xf32>
    %1433 = arith.addf %1432, %20 : vector<8x32xf32>
    %1434 = vector.extract_strided_slice %1433 {offsets = [0, 0], sizes = [2, 32], strides = [1, 1]} : vector<8x32xf32> to vector<2x32xf32>
    %1435 = vector.extract_strided_slice %1433 {offsets = [2, 0], sizes = [2, 32], strides = [1, 1]} : vector<8x32xf32> to vector<2x32xf32>
    %1436 = vector.extract_strided_slice %1433 {offsets = [4, 0], sizes = [2, 32], strides = [1, 1]} : vector<8x32xf32> to vector<2x32xf32>
    %1437 = vector.extract_strided_slice %1433 {offsets = [6, 0], sizes = [2, 32], strides = [1, 1]} : vector<8x32xf32> to vector<2x32xf32>
    %1438 = arith.mulf %1434, %1263 : vector<2x32xf32>
    %1439 = arith.mulf %1435, %1436 : vector<2x32xf32>
    %1440 = arith.addf %1438, %1439 : vector<2x32xf32>
    %1441 = math.tanh %1440 : vector<2x32xf32>
    %1442 = arith.mulf %1437, %1441 : vector<2x32xf32>
    %c8_i32 = arith.constant 8 : i32
    %1443 = vector.broadcast %23 : vector<1x32xf32> to vector<2x32xf32>
    %1444 = arith.mulf %1442, %1443 : vector<2x32xf32>
    %cst_150 = arith.constant dense<0.000000e+00> : vector<2xf32>
    %1445 = vector.multi_reduction <add>, %1444, %cst_150 [1] : vector<2x32xf32> to vector<2xf32>
    %1446 = vector.shape_cast %1445 : vector<2xf32> to vector<2x1xf32>
    %1447 = vector.broadcast %24 : vector<1x1xf32> to vector<2x1xf32>
    %1448 = arith.addf %1446, %1447 : vector<2x1xf32>
    %1449 = arith.negf %1448 : vector<2x1xf32>
    %1450 = math.exp %1449 : vector<2x1xf32>
    %cst_151 = arith.constant 1.000000e+00 : f32
    %1451 = vector.broadcast %cst_151 : f32 to vector<2x1xf32>
    %1452 = arith.addf %1451, %1450 : vector<2x1xf32>
    %1453 = arith.divf %1451, %1452 : vector<2x1xf32>
    %c0_152 = arith.constant 0 : index
    %c0_153 = arith.constant 0 : index
    %1454 = vector.load %arg3[%c0_152, %c0_153] : memref<2x1xf32, #tpu.memory_space<vmem>>, vector<2x1xf32>
    tpu.vector_store %arg3[%c0_152, %c0_153], %1453 {strides = array<i32>} : memref<2x1xf32, #tpu.memory_space<vmem>>, vector<2x1xf32>,
    return
  }
  func.func @transform_0(%arg0: i32) -> (i32, i32, i32) {
    %c0_i32 = arith.constant 0 : i32
    %c0_i32_0 = arith.constant 0 : i32
    %c0_i32_1 = arith.constant 0 : i32
    %c0_i32_2 = arith.constant 0 : i32
    return %c0_i32, %c0_i32_0, %c0_i32_1 : i32, i32, i32
  }
  func.func @transform_1(%arg0: i32) -> (i32, i32) {
    %c0_i32 = arith.constant 0 : i32
    %c0_i32_0 = arith.constant 0 : i32
    %c0_i32_1 = arith.constant 0 : i32
    return %c0_i32, %c0_i32_0 : i32, i32
  }
  func.func @transform_2(%arg0: i32) -> (i32, i32) {
    %c0_i32 = arith.constant 0 : i32
    %c0_i32_0 = arith.constant 0 : i32
    %c0_i32_1 = arith.constant 0 : i32
    return %c0_i32, %c0_i32_0 : i32, i32
  }
}

</mosaic_0001>

<bundles_post_ra>
// kernel: tpu_custom_call.1
= control target key start
LH: loop header
LB: loop body
LE: loop exit
PB: predicated region body
PF: predicated region fallthrough
CT: control target
= control target key end

     0   :  { %v4635_v0 = vmov 0.0   ;;  %vm4636_vm0 = vmmov 0   ;;  %vm121_vm1 = vcmask 1043456   ;;  %vm119_vm2 = vcmask 1041408   ;;  %s5924_s1 = inlined_call_operand.vmem [shape: f32[128,32], index: 1, kind: input, shape index: {}]   ;;  %s5925_s0 = inlined_call_operand.vmem [shape: f32[8,2,4], index: 0, kind: input, shape index: {}]   ;;  %s5926_s2 = inlined_call_operand.vmem [shape: f32[2,1], index: 2, kind: output, shape index: {}]  }
   0x1   :  { %4322 = vmatprep.subr.mxu0 %v4635_v0  ;;  %4330 = vmatprep.mubr.msk.f32.mxu0 %vm4636_vm0, %v4635_v0  ;;  %v4667_v1 = vld [vmem:[%s5924_s1 + $0x50] sm:$0xff]  ;;  %v4672_v2 = vld [vmem:[%s5924_s1 + $0x48] sm:$0xff]  ;;  %v4679_v3 = vld [vmem:[%s5924_s1 + $0x40] sm:$0xff]  ;;  %vm123_vm3 = vcmask 1045504   ;;  %v4637_v27 = vmov 683565275  }
   0x2   :  { %4333 = vmatprep.subr.mxu1 %v4635_v0  ;;  %4335 = vmatprep.mubr.msk.f32.mxu1 %vm4636_vm0, %v4635_v0  ;;  %v4686_v4 = vld [vmem:[%s5924_s1 + $0x38] sm:$0xff]  ;;  %v27_v6 = vld [vmem:[%s5925_s0] sm:$0x3]  ;;  %v4638_v29 = vmov 2475754826  }
   0x3   :  { %4323 = vmatpush3.msra.mxu0 %v4667_v1  ;;  %v22_v5 = vld [vmem:[%s5924_s1 + $0x58] sm:$0xff]  ;;  %v4639_v32 = vmov 2131351028   ;;  %v4640_v35 = vmov 2102212464  }
   0x4   :  { %4324 = vmatprep.subr.mxu0 %v4635_v0  ;;  %4334 = vmatpush3.msk.msra.mxu1 %vm121_vm1, %v22_v5  ;;  %v4641_v38 = vmov 920167782   ;;  %v4642_v41 = vmov 1326507024  }
   0x5   :  { %4325 = vmatpush3.msra.mxu0 %v4672_v2  ;;  %4338 = vmatprep.subr.mxu1 %v4635_v0 }
   0x6   :  { %4326 = vmatprep.subr.mxu0 %v4635_v0 }
   0x7   :  { %4327 = vmatpush3.msra.mxu0 %v4679_v3 }
   0x8   :  { %4328 = vmatprep.subr.mxu0 %v4635_v0 }
   0x9   :  { %4329 = vmatpush3.msra.mxu0 %v4686_v4 }
   0xa   :  { %4331 = vmatmul.mubr.f32.vlgmr.msra.gmra.mxu0 %v4635_v0  ;;  %4349 = vmatprep.subr.mxu0 %v4635_v0 }
   0xb   :  { %4351 = vmatprep.mubr.msk.f32.mxu0 %vm4636_vm0, %v4635_v0  ;;  %4350 = vmatpush3.msk.msra.mxu0 %vm121_vm1, %v22_v5 }
   0xc   :  { %4365 = vmatprep.subr.mxu0 %v4635_v0 }
  0xca   :  { %v98_v7 = vpop.f32.mrf.mxu0 }
  0xcb   :  { %v4705_v8 = vadd.f32 %v98_v7, %v27_v6 }
  0xcc   :  { %v4332_v9 = vpop.f32.mrf.mxu0 }
  0xcd   :  { %v113_v10 = vrot.slane %v4705_v8, 6  ;;  %v115_v11 = vrot.slane %v4705_v8, 4  ;;  %v117_v12 = vrot.slane %v4705_v8, 2 }
  0xcf   :  { %v120_v13 = vsel %vm119_vm2, %v4705_v8, %v113_v10 }
  0xd0   :  { %v122_v14 = vsel %vm121_vm1, %v120_v13, %v115_v11  ;;  %v102_v13 = vmul.f32 %v4705_v8, %v4705_v8 }
  0xd1   :  { %v124_v15 = vsel %vm123_vm3, %v122_v14, %v117_v12 }
  0xd2   :  { %v4714_v16 = vmul.f32 0.5, %v124_v15 }
  0xd4   :  { %v129_v17 = vand.u32 2139095040, %v4714_v16  ;;  %v126_v21 = vand.u32 2147483647, %v4714_v16  ;;  %vm128_vm11 = vcmp.lt.s32.totalorder %v4714_v16, 0 }
  0xd6   :  { %v130_v18 = vshrl.u32 %v129_v17, 23  ;;  %v133_v24 = vand.u32 8388607, %v126_v21  ;;  %v103_v17 = vadd.f32 1.0, %v102_v13  ;;  %vm127_vm12 = vcmp.le.f32.partialorder %v126_v21, 0.7853982 }
  0xd8   :  { %v4171_v19 = vadd.s32 4294967169, %v130_v18  ;;  %v134_v43 = vor.u32 8388608, %v133_v24  ;;  %4490 = vrsqrt.f32 %v103_v17 }
  0xda   :  { %v136_v20 = vadd.s32 1, %v4171_v19  ;;  %v174_v57 = vshll.u32 %v134_v43, 8 }
  0xdc   :  { %vm137_vm4 = vcmp.gt.s32.totalorder %v136_v20, 0 }
  0xdd   :  { %v138_v22 = vsel %vm137_vm4, %v136_v20, 0 }
  0xde   :  { %v140_v23 = vand.u32 31, %v138_v22  ;;  %v139_v26 = vshrl.u32 %v138_v22, 5 }
  0xe0   :  { %v141_v25 = vsub.s32 32, %v140_v23  ;;  %v143_v28 = vshll.u32 %v4637_v27, %v140_v23  ;;  %v146_v30 = vshll.u32 %v4638_v29, %v140_v23  ;;  %v149_v34 = vshll.u32 %v4639_v32, %v140_v23 }
  0xe1   :  { %v152_v37 = vshll.u32 %v4640_v35, %v140_v23  ;;  %v155_v40 = vshll.u32 %v4641_v38, %v140_v23  ;;  %vm158_vm5 = vcmp.lt.s32.totalorder %v139_v26, 1  ;;  %vm161_vm6 = vcmp.lt.s32.totalorder %v139_v26, 4 }
  0xe2   :  { %v144_v31 = vshrl.u32 %v4638_v29, %v141_v25  ;;  %v147_v33 = vshrl.u32 %v4639_v32, %v141_v25  ;;  %v150_v36 = vshrl.u32 %v4640_v35, %v141_v25  ;;  %v153_v39 = vshrl.u32 %v4641_v38, %v141_v25 }
  0xe3   :  { %v156_v42 = vshrl.u32 %v4642_v41, %v141_v25  ;;  %v142_v52 = vshrl.u32 %v4637_v27, %v141_v25  ;;  %vm160_vm7 = vcmp.lt.s32.totalorder %v139_v26, 3  ;;  %vm159_vm8 = vcmp.lt.s32.totalorder %v139_v26, 2 }
  0xe4   :  { %v145_v44 = vor.u32 %v144_v31, %v143_v28  ;;  %v148_v45 = vor.u32 %v147_v33, %v146_v30  ;;  %v151_v46 = vor.u32 %v150_v36, %v149_v34  ;;  %v154_v47 = vor.u32 %v153_v39, %v152_v37 }
  0xe5   :  { %v157_v48 = vor.u32 %v156_v42, %v155_v40  ;;  %v4491_v36 = vpop.eup %4490 }
  0xe6   :  { %v163_v49 = vsel %vm161_vm6, %v151_v46, 2102212464  ;;  %v166_v50 = vsel %vm158_vm5, %v145_v44, %v148_v45  ;;  %v170_v51 = vsel %vm158_vm5, %v148_v45, %v151_v46  ;;  %v167_v53 = vsel %vm161_vm6, %v154_v47, 920167782 }
  0xe7   :  { %v171_v54 = vsel %vm161_vm6, %v157_v48, 1326507024  ;;  %v168_v55 = vsel %vm160_vm7, %v151_v46, %v167_v53  ;;  %v162_v58 = vsel %vm158_vm5, %v142_v52, %v145_v44  ;;  %v164_v59 = vsel %vm160_vm7, %v148_v45, %v163_v49 }
  0xe8   :  { %v172_v56 = vsel %vm160_vm7, %v154_v47, %v171_v54  ;;  %v169_v60 = vsel %vm159_vm8, %v166_v50, %v168_v55  ;;  %v165_v7 = vsel %vm159_vm8, %v162_v58, %v164_v59  ;;  %v105_v40 = vadd.f32 1.0, %v4491_v36 }
  0xe9   :  { %v173_v61 = vsel %vm159_vm8, %v170_v51, %v172_v56  ;;  %v4734_v5 = vmul.u32.u64.low %v174_v57, %v169_v60  ;;  %v4735_v6 = vmul.u32.u64.high %v174_v57, %v169_v60, %v4734_v5  ;;  %v181_v10 = vmul.u32 %v174_v57, %v165_v7 }
  0xea   :  { %v4731_v62 = vmul.u32.u64.low %v174_v57, %v173_v61  ;;  %v4732_v63 = vmul.u32.u64.high %v174_v57, %v173_v61, %v4731_v62  ;;  %v106_v45 = vmul.f32 0.5, %v105_v40  ;;  %v341_v53 = vlaneseq }
  0xeb   :  { %v184_v9 = vadd.s32 1, %v4735_v6  ;;  %v109_v57 = vmul.f32 0.5, %v4705_v8  ;;  %vm218_vm7 = vweird.f32 %v4714_v16  ;;  %vm453_vm8 = vcmask 31744  }
  0xec   :  { %vm183_vm9 = vc.u32 %v4732_v63, %v4734_v5  ;;  %v182_v26 = vadd.s32 %v4734_v5, %v4732_v63  ;;  %4492 = vrsqrt.f32 %v106_v45  ;;  %v4747_v55 = vshrl.u32 %v341_v53, 7 }
  0xed   :  { %v185_v11 = vsel %vm183_vm9, %v184_v9, %v4735_v6  ;;  %v110_v61 = vmul.f32 %v4491_v36, %v109_v57  ;;  %vm28_vm9 = vcmask 261120  }
  0xee   :  { %v186_v12 = vadd.s32 %v185_v11, %v181_v10  ;;  %v4751_v5 = vsub.s32 0, %v4747_v55 }
  0xf0   :  { %v187_v14 = vadd.s32 536870912, %v186_v12 }
  0xf2   :  { %v188_v15 = vshrl.u32 %v187_v14, 30 }
  0xf4   :  { %v189_v18 = vshll.u32 %v188_v15, 30  ;;  %v212_v48 = vsub.s32 4, %v188_v15 }
  0xf6   :  { %v190_v19 = vsub.s32 %v186_v12, %v189_v18  ;;  %v213_v51 = vsel %vm128_vm11, %v212_v48, %v188_v15  ;;  %v4759_v48 = vld [vmem:[%s5924_s1] sm:$0xff] }
  0xf7   :  { %v215_v52 = vsel %vm127_vm12, 0, %v213_v51 }
  0xf8   :  { %v192_v20 = vsub.s32 0, %v190_v19  ;;  %v322_v54 = vadd.s32 3, %v215_v52  ;;  %v219_v58 = vand.u32 3, %v215_v52 }
  0xf9   :  { %v4493_v56 = vpop.eup %4492 }
  0xfa   :  { %v4172_v22 = vmin.u32 %v192_v20, %v190_v19  ;;  %v323_v59 = vand.u32 3, %v322_v54  ;;  %v108_v21 = vmul.f32 %v4493_v56, %v106_v45  ;;  %v111_v6 = vmul.f32 %v4493_v56, %v110_v61 }
  0xfb   :  { %vm224_vm13 = vcmp.eq.s32.totalorder %v219_v58, 2  ;;  %vm221_vm15 = vcmp.eq.s32.totalorder %v219_v58, 0  ;;  %vm220_vm5 = vcmp.lt.s32.totalorder %v219_v58, 2 }
  0xfc   :  { %v194_v23 = vclz %v4172_v22  ;;  %vm328_vm14 = vcmp.eq.s32.totalorder %v323_v59, 2  ;;  %vm325_vm4 = vcmp.eq.s32.totalorder %v323_v59, 0  ;;  %vm324_vm6 = vcmp.lt.s32.totalorder %v323_v59, 2  ;;  %v4773_v59 = vld [vmem:[%s5924_s1 + $0x8] sm:$0xff] }
  0xfd   :  { %v349_v20 = vrot.slane %v111_v6, %v4751_v5 }
  0xfe   :  { %v4173_v24 = vadd.s32 4294967294, %v194_v23 }
 0x100   :  { %vm4174_vm10 = vcmp.lt.s32.totalorder %v4173_v24, 0 }
 0x101   :  { %v197_v25 = vsel %vm4174_vm10, 0, %v4173_v24 }
 0x102   :  { %v198_v28 = vsub.s32 32, %v197_v25  ;;  %v202_v30 = vsub.s32 4294967266, %v197_v25  ;;  %v199_v31 = vshll.u32 %v190_v19, %v197_v25  ;;  %v344_v19 = vrot.slane %v108_v21, %v4751_v5 }
 0x104   :  { %v200_v33 = vshrl.u32 %v182_v26, %v198_v28  ;;  %v203_v34 = vadd.s32 127, %v202_v30 }
 0x106   :  { %v201_v37 = vor.u32 %v200_v33, %v199_v31  ;;  %v204_v39 = vshll.u32 %v203_v34, 23 }
 0x108   :  { %v205_v42 = vor.u32 4788187, %v204_v39  ;;  %v208_v44 = vcvt.s32.f32 %v201_v37 }
 0x10a   :  { %v206_v43 = vand.u32 2147483647, %v205_v42 }
 0x10c   :  { %v209_v46 = vmul.f32 %v208_v44, %v206_v43 }
 0x10e   :  { %v210_v47 = vxor.u32 2147483648, %v209_v46 }
 0x110   :  { %v211_v49 = vsel %vm128_vm11, %v210_v47, %v209_v46 }
 0x111   :  { %v214_v50 = vsel %vm127_vm12, %v4714_v16, %v211_v49  ;;  %v4764_v49 = vld [vmem:[%s5924_s1 + $0x18] sm:$0xff] }
 0x112   :  { %4494 = vcosq.f32 %v214_v50 }
 0x113   :  { %4496 = vsinq.f32 %v214_v50 }
 0x11f   :  { %v4495_v60 = vpop.eup %4494 }
 0x120   :  { %v4497_v62 = vpop.eup %4496  ;;  %v225_v63 = vxor.u32 2147483648, %v4495_v60 }
 0x121   :  { %v222_v7 = vxor.u32 2147483648, %v4497_v62 }
 0x122   :  { %v226_v9 = vsel %vm224_vm13, %v225_v63, %v4497_v62  ;;  %v330_v10 = vsel %vm328_vm14, %v225_v63, %v4497_v62 }
 0x123   :  { %v223_v8 = vsel %vm221_vm15, %v4495_v60, %v222_v7  ;;  %v327_v11 = vsel %vm325_vm4, %v4495_v60, %v222_v7  ;;  %v4778_v60 = vld [vmem:[%s5924_s1 + $0x20] sm:$0xff] }
 0x124   :  { %v227_v12 = vsel %vm220_vm5, %v223_v8, %v226_v9  ;;  %v331_v13 = vsel %vm324_vm6, %v327_v11, %v330_v10 }
 0x125   :  { %v228_v14 = vsel %vm218_vm7, nan, %v227_v12  ;;  %v332_v15 = vsel %vm218_vm7, nan, %v331_v13 }
 0x126   :  { %v333_v17 = vsub.f32 0.0, %v332_v15  ;;  %v335_v18 = vmul.f32 0.70710677, %v228_v14 }
 0x128   :  { %v337_v22 = vmul.f32 0.70710677, %v333_v17  ;;  %v339_v23 = vsub.f32 0.0, %v333_v17  ;;  %v345_v24 = vmul.f32 %v344_v19, %v335_v18  ;;  %v350_v25 = vmul.f32 %v349_v20, %v335_v18 }
 0x12a   :  { %v340_v26 = vmul.f32 0.70710677, %v339_v23  ;;  %v351_v28 = vsub.f32 %v345_v24, %v350_v25  ;;  %v357_v30 = vadd.f32 %v350_v25, %v345_v24  ;;  %v358_v31 = vmul.f32 %v349_v20, %v337_v22 }
 0x12b   :  { %v352_v33 = vmul.f32 %v344_v19, %v337_v22 }
 0x12c   :  { %v353_v16 = vmul.f32 %v349_v20, %v340_v26  ;;  %v359_v34 = vmul.f32 %v344_v19, %v340_v26  ;;  %v365_v36 = vmul.f32 %v351_v28, %v349_v20  ;;  %v371_v37 = vmul.f32 %v357_v30, %v349_v20 }
 0x12d   :  { %v361_v42 = vmul.f32 %v351_v28, %v344_v19  ;;  %v367_v43 = vmul.f32 %v357_v30, %v344_v19 }
 0x12e   :  { %v354_v39 = vsub.f32 %v352_v33, %v353_v16  ;;  %v360_v40 = vadd.f32 %v359_v34, %v358_v31 }
 0x130   :  { %v362_v44 = vmul.f32 %v354_v39, %v349_v20  ;;  %v364_v45 = vmul.f32 %v354_v39, %v344_v19  ;;  %v368_v46 = vmul.f32 %v360_v40, %v349_v20  ;;  %v370_v47 = vmul.f32 %v360_v40, %v344_v19  ;;  %v4795_v19 = vld [vmem:[%s5924_s1 + $0x10] sm:$0xff]  ;;  %v4800_v20 = vld [vmem:[%s5924_s1 + $0x28] sm:$0xff] }
 0x132   :  { %v363_v50 = vadd.f32 %v362_v44, %v361_v42  ;;  %v366_v51 = vsub.f32 %v364_v45, %v365_v36  ;;  %v369_v52 = vsub.f32 %v367_v43, %v368_v46  ;;  %v372_v53 = vadd.f32 %v371_v37, %v370_v47 }
 0x134   :  { %v373_v54 = vmul.f32 %v363_v50, %v4759_v48  ;;  %v374_v56 = vmul.f32 %v372_v53, %v4764_v49  ;;  %v376_v57 = vmul.f32 %v366_v51, %v4759_v48  ;;  %v377_v58 = vmul.f32 %v369_v52, %v4764_v49 }
 0x135   :  { %v379_v61 = vmul.f32 %v366_v51, %v4764_v49  ;;  %v380_v62 = vmul.f32 %v369_v52, %v4759_v48  ;;  %v382_v21 = vmul.f32 %v372_v53, %v4759_v48  ;;  %v383_v63 = vmul.f32 %v363_v50, %v4764_v49 }
 0x136   :  { %v375_v6 = vadd.f32 %v374_v56, %v373_v54  ;;  %v378_v7 = vsub.f32 %v376_v57, %v377_v58 }
 0x137   :  { %v381_v9 = vadd.f32 %v380_v62, %v379_v61  ;;  %v384_v10 = vsub.f32 %v382_v21, %v383_v63 }
 0x138   :  { %v385_v8 = vmul.f32 %v375_v6, %v4773_v59  ;;  %v388_v11 = vmul.f32 %v378_v7, %v4773_v59  ;;  %v391_v12 = vmul.f32 %v375_v6, %v4778_v60  ;;  %v394_v13 = vmul.f32 %v378_v7, %v4778_v60 }
 0x139   :  { %v386_v14 = vmul.f32 %v381_v9, %v4778_v60  ;;  %v389_v15 = vmul.f32 %v384_v10, %v4778_v60  ;;  %v392_v17 = vmul.f32 %v381_v9, %v4773_v59  ;;  %v395_v18 = vmul.f32 %v384_v10, %v4773_v59 }
 0x13b   :  { %v387_v22 = vsub.f32 %v385_v8, %v386_v14  ;;  %v390_v23 = vsub.f32 %v388_v11, %v389_v15  ;;  %v393_v24 = vadd.f32 %v392_v17, %v391_v12  ;;  %v396_v25 = vadd.f32 %v395_v18, %v394_v13 }
 0x13d   :  { %v397_v26 = vmul.f32 %v387_v22, %v4795_v19  ;;  %v398_v28 = vmul.f32 %v390_v23, %v4800_v20  ;;  %v400_v30 = vmul.f32 %v390_v23, %v4795_v19  ;;  %v401_v31 = vmul.f32 %v387_v22, %v4800_v20 }
 0x13e   :  { %v403_v33 = vmul.f32 %v393_v24, %v4795_v19  ;;  %v404_v16 = vmul.f32 %v396_v25, %v4800_v20  ;;  %v406_v34 = vmul.f32 %v396_v25, %v4795_v19  ;;  %v407_v36 = vmul.f32 %v393_v24, %v4800_v20 }
 0x13f   :  { %v399_v37 = vadd.f32 %v398_v28, %v397_v26  ;;  %v402_v39 = vsub.f32 %v400_v30, %v401_v31 }
 0x140   :  { %v405_v40 = vsub.f32 %v403_v33, %v404_v16  ;;  %v408_v42 = vadd.f32 %v407_v36, %v406_v34 }
 0x141   :  { %v409_v43 = vmul.f32 %v399_v37, %v4759_v48  ;;  %v412_v44 = vmul.f32 %v402_v39, %v4759_v48  ;;  %v415_v45 = vmul.f32 %v402_v39, %v4764_v49  ;;  %v419_v46 = vmul.f32 %v399_v37, %v4764_v49  ;;  %v4837_v39 = vld [vmem:[%s5924_s1 + $0x30] sm:$0xff] }
 0x142   :  { %v410_v47 = vmul.f32 %v408_v42, %v4764_v49  ;;  %v413_v50 = vmul.f32 %v405_v40, %v4764_v49  ;;  %v416_v51 = vmul.f32 %v405_v40, %v4759_v48  ;;  %v418_v52 = vmul.f32 %v408_v42, %v4759_v48 }
 0x144   :  { %v411_v53 = vadd.f32 %v410_v47, %v409_v43  ;;  %v414_v54 = vsub.f32 %v412_v44, %v413_v50  ;;  %v417_v56 = vadd.f32 %v416_v51, %v415_v45  ;;  %v420_v57 = vsub.f32 %v418_v52, %v419_v46  ;;  %v4854_v43 = vld [vmem:[%s5924_s1 + $0x60] sm:$0xff]  ;;  %v4860_v47 = vld [vmem:[%s5924_s1 + $0x68] sm:$0xff]  ;;  %v4865_v51 = vld [vmem:[%s5924_s1 + $0x70] sm:$0xff] }
 0x146   :  { %v421_v58 = vmul.f32 %v411_v53, %v4773_v59  ;;  %v422_v61 = vmul.f32 %v417_v56, %v4778_v60  ;;  %v424_v62 = vmul.f32 %v414_v54, %v4773_v59  ;;  %v425_v21 = vmul.f32 %v420_v57, %v4778_v60 }
 0x147   :  { %v427_v63 = vmul.f32 %v411_v53, %v4778_v60  ;;  %v428_v6 = vmul.f32 %v417_v56, %v4773_v59  ;;  %v430_v7 = vmul.f32 %v414_v54, %v4778_v60  ;;  %v431_v9 = vmul.f32 %v420_v57, %v4773_v59 }
 0x148   :  { %v423_v10 = vsub.f32 %v421_v58, %v422_v61  ;;  %v426_v8 = vsub.f32 %v424_v62, %v425_v21 }
 0x149   :  { %v429_v11 = vadd.f32 %v428_v6, %v427_v63  ;;  %v432_v12 = vadd.f32 %v431_v9, %v430_v7 }
 0x14a   :  { %v433_v13 = vmul.f32 %v423_v10, %v4795_v19  ;;  %v434_v14 = vmul.f32 %v426_v8, %v4800_v20  ;;  %v436_v15 = vmul.f32 %v426_v8, %v4795_v19  ;;  %v437_v17 = vmul.f32 %v423_v10, %v4800_v20 }
 0x14b   :  { %v439_v18 = vmul.f32 %v429_v11, %v4795_v19  ;;  %v440_v22 = vmul.f32 %v432_v12, %v4800_v20  ;;  %v442_v23 = vmul.f32 %v432_v12, %v4795_v19  ;;  %v443_v24 = vmul.f32 %v429_v11, %v4800_v20 }
 0x14c   :  { %v435_v25 = vadd.f32 %v434_v14, %v433_v13  ;;  %v438_v26 = vsub.f32 %v436_v15, %v437_v17 }
 0x14d   :  { %v441_v28 = vsub.f32 %v439_v18, %v440_v22  ;;  %v444_v30 = vadd.f32 %v443_v24, %v442_v23 }
 0x14e   :  { %v445_v31 = vmul.f32 %v435_v25, %v435_v25  ;;  %v446_v33 = vmul.f32 %v438_v26, %v438_v26 }
 0x14f   :  { %v448_v16 = vmul.f32 %v441_v28, %v441_v28  ;;  %v449_v34 = vmul.f32 %v444_v30, %v444_v30 }
 0x150   :  { %v447_v36 = vadd.f32 %v446_v33, %v445_v31 }
 0x151   :  { %v450_v37 = vadd.f32 %v449_v34, %v448_v16 }
 0x153   :  { %v451_v40 = vsub.f32 %v447_v36, %v450_v37 }
 0x155   :  { %v452_v42 = vmul.f32 %v451_v40, %v4837_v39 }
 0x157   :  { %4336 = vmatmul.mubr.msk.f32.vlgmr.msra.gmra.mxu1 %vm453_vm8, %v452_v42 }
 0x158   :  { %4339 = vmatpush3.msra.mxu1 %v4667_v1  ;;  %4346 = vmatprep.mubr.msk.f32.mxu1 %vm4636_vm0, %v4635_v0 }
 0x159   :  { %4340 = vmatprep.subr.mxu1 %v4635_v0 }
 0x15a   :  { %4341 = vmatpush3.msra.mxu1 %v4672_v2 }
 0x15b   :  { %4342 = vmatprep.subr.mxu1 %v4635_v0 }
 0x15c   :  { %4343 = vmatpush3.msra.mxu1 %v4679_v3 }
 0x15d   :  { %4344 = vmatprep.subr.mxu1 %v4635_v0 }
 0x15e   :  { %4345 = vmatpush3.msra.mxu1 %v4686_v4 }
 0x15f   :  { %4354 = vmatprep.subr.mxu1 %v4635_v0 }
 0x217   :  { %v526_v44 = vpop.f32.mrf.mxu1 }
 0x218   :  { %v527_v45 = vadd.f32 %v526_v44, %v4854_v43 }
 0x219   :  { %v4337_v46 = vpop.f32.mrf.mxu1 }
 0x21a   :  { %4498 = vtanh.f32 %v527_v45 }
 0x227   :  { %v4499_v50 = vpop.eup %4498 }
 0x228   :  { %v531_v52 = vmul.f32 %v4499_v50, %v4860_v47 }
 0x22a   :  { %v532_v53 = vadd.f32 %v531_v52, %v4865_v51 }
 0x22c   :  { %v535_v54 = vrot.slane %v532_v53, 2  ;;  %v533_v57 = vmul.f32 0.0, %v532_v53 }
 0x22e   :  { %v537_v56 = vmul.f32 %v535_v54, %v532_v53 }
 0x230   :  { %v539_v58 = vrot.slane %v537_v56, 2 }
 0x232   :  { %v4869_v61 = vadd.f32 %v539_v58, %v533_v57 }
 0x234   :  { %4500 = vtanh.f32 %v4869_v61 }
 0x241   :  { %v4501_v62 = vpop.eup %4500 }
 0x242   :  { %v544_v21 = vrot.slane %v4501_v62, 2 }
 0x244   :  { %v546_v63 = vmul.f32 %v544_v21, %v532_v53 }
 0x246   :  { %v550_v6 = vrot.slane %v546_v63, 6 }
 0x248   :  { %4347 = vmatmul.mubr.msk.f32.vlgmr.msra.gmra.mxu1 %vm28_vm9, %v550_v6 }
 0x249   :  { %4355 = vmatpush3.msra.mxu1 %v4667_v1  ;;  %4362 = vmatprep.mubr.msk.f32.mxu1 %vm4636_vm0, %v4635_v0  ;;  %v4181_v1 = vld [vmem:[%s5925_s0 + $0x2] sm:$0x3] }
 0x24a   :  { %4356 = vmatprep.subr.mxu1 %v4635_v0 }
 0x24b   :  { %4357 = vmatpush3.msra.mxu1 %v4672_v2 }
 0x24c   :  { %4358 = vmatprep.subr.mxu1 %v4635_v0 }
 0x24d   :  { %4359 = vmatpush3.msra.mxu1 %v4679_v3 }
 0x24e   :  { %4360 = vmatprep.subr.mxu1 %v4635_v0 }
 0x24f   :  { %4361 = vmatpush3.msra.mxu1 %v4686_v4 }
 0x250   :  { %4381 = vmatprep.subr.mxu1 %v4635_v0 }
 0x308   :  { %v619_v7 = vpop.f32.mrf.mxu1 }
 0x309   :  { %v4886_v9 = vadd.f32 %v4181_v1, %v619_v7 }
 0x30a   :  { %v4348_v10 = vpop.f32.mrf.mxu1 }
 0x30b   :  { %v634_v2 = vrot.slane %v4886_v9, 6  ;;  %v636_v8 = vrot.slane %v4886_v9, 4  ;;  %v638_v3 = vrot.slane %v4886_v9, 2 }
 0x30d   :  { %v640_v11 = vsel %vm119_vm2, %v4886_v9, %v634_v2 }
 0x30e   :  { %v641_v4 = vsel %vm121_vm1, %v640_v11, %v636_v8 }
 0x30f   :  { %v642_v12 = vsel %vm123_vm3, %v641_v4, %v638_v3 }
 0x310   :  { %v4895_v13 = vmul.f32 0.5, %v642_v12 }
 0x312   :  { %v647_v14 = vand.u32 2139095040, %v4895_v13  ;;  %v644_v22 = vand.u32 2147483647, %v4895_v13  ;;  %vm646_vm5 = vcmp.lt.s32.totalorder %v4895_v13, 0 }
 0x314   :  { %v648_v15 = vshrl.u32 %v647_v14, 23  ;;  %v651_v25 = vand.u32 8388607, %v644_v22  ;;  %vm645_vm6 = vcmp.le.f32.partialorder %v644_v22, 0.7853982 }
 0x316   :  { %v4183_v17 = vadd.s32 4294967169, %v648_v15  ;;  %v652_v45 = vor.u32 8388608, %v651_v25  ;;  %v623_v25 = vmul.f32 %v4886_v9, %v4886_v9 }
 0x318   :  { %v654_v18 = vadd.s32 1, %v4183_v17  ;;  %v692_v7 = vshll.u32 %v652_v45, 8 }
 0x31a   :  { %vm655_vm10 = vcmp.gt.s32.totalorder %v654_v18, 0 }
 0x31b   :  { %v656_v23 = vsel %vm655_vm10, %v654_v18, 0 }
 0x31c   :  { %v658_v24 = vand.u32 31, %v656_v23  ;;  %v657_v28 = vshrl.u32 %v656_v23, 5 }
 0x31e   :  { %v659_v26 = vsub.s32 32, %v658_v24  ;;  %v661_v30 = vshll.u32 %v4637_v27, %v658_v24  ;;  %v664_v31 = vshll.u32 %v4638_v29, %v658_v24  ;;  %v667_v34 = vshll.u32 %v4639_v32, %v658_v24 }
 0x31f   :  { %v670_v37 = vshll.u32 %v4640_v35, %v658_v24  ;;  %v673_v42 = vshll.u32 %v4641_v38, %v658_v24  ;;  %vm676_vm11 = vcmp.lt.s32.totalorder %v657_v28, 1  ;;  %vm679_vm12 = vcmp.lt.s32.totalorder %v657_v28, 4 }
 0x320   :  { %v662_v33 = vshrl.u32 %v4638_v29, %v659_v26  ;;  %v665_v16 = vshrl.u32 %v4639_v32, %v659_v26  ;;  %v668_v36 = vshrl.u32 %v4640_v35, %v659_v26  ;;  %v671_v40 = vshrl.u32 %v4641_v38, %v659_v26 }
 0x321   :  { %v674_v44 = vshrl.u32 %v4642_v41, %v659_v26  ;;  %v660_v62 = vshrl.u32 %v4637_v27, %v659_v26  ;;  %vm678_vm13 = vcmp.lt.s32.totalorder %v657_v28, 3  ;;  %vm677_vm14 = vcmp.lt.s32.totalorder %v657_v28, 2 }
 0x322   :  { %v663_v46 = vor.u32 %v662_v33, %v661_v30  ;;  %v666_v50 = vor.u32 %v665_v16, %v664_v31  ;;  %v669_v52 = vor.u32 %v668_v36, %v667_v34  ;;  %v672_v53 = vor.u32 %v671_v40, %v670_v37 }
 0x323   :  { %v675_v54 = vor.u32 %v674_v44, %v673_v42  ;;  %v624_v30 = vadd.f32 1.0, %v623_v25 }
 0x324   :  { %v681_v56 = vsel %vm679_vm12, %v669_v52, 2102212464  ;;  %v684_v57 = vsel %vm676_vm11, %v663_v46, %v666_v50  ;;  %v688_v58 = vsel %vm676_vm11, %v666_v50, %v669_v52  ;;  %v685_v21 = vsel %vm679_vm12, %v672_v53, 920167782 }
 0x325   :  { %v689_v63 = vsel %vm679_vm12, %v675_v54, 1326507024  ;;  %v686_v6 = vsel %vm678_vm13, %v669_v52, %v685_v21  ;;  %v680_v10 = vsel %vm676_vm11, %v660_v62, %v663_v46  ;;  %v682_v2 = vsel %vm678_vm13, %v666_v50, %v681_v56 }
 0x326   :  { %v690_v1 = vsel %vm678_vm13, %v672_v53, %v689_v63  ;;  %v687_v8 = vsel %vm677_vm14, %v684_v57, %v686_v6  ;;  %v683_v15 = vsel %vm677_vm14, %v680_v10, %v682_v2  ;;  %4502 = vrsqrt.f32 %v624_v30 }
 0x327   :  { %v691_v3 = vsel %vm677_vm14, %v688_v58, %v690_v1  ;;  %v4915_v12 = vmul.u32.u64.low %v692_v7, %v687_v8  ;;  %v4916_v14 = vmul.u32.u64.high %v692_v7, %v687_v8, %v4915_v12  ;;  %v699_v18 = vmul.u32 %v692_v7, %v683_v15 }
 0x328   :  { %v4912_v11 = vmul.u32.u64.low %v692_v7, %v691_v3  ;;  %v4913_v4 = vmul.u32.u64.high %v692_v7, %v691_v3, %v4912_v11 }
 0x329   :  { %v702_v17 = vadd.s32 1, %v4916_v14 }
 0x32a   :  { %vm701_vm15 = vc.u32 %v4913_v4, %v4915_v12  ;;  %v700_v42 = vadd.s32 %v4915_v12, %v4913_v4  ;;  %v630_v12 = vmul.f32 0.5, %v4886_v9 }
 0x32b   :  { %v703_v23 = vsel %vm701_vm15, %v702_v17, %v4916_v14  ;;  %vm736_vm15 = vweird.f32 %v4895_v13 }
 0x32c   :  { %v704_v24 = vadd.s32 %v703_v23, %v699_v18 }
 0x32e   :  { %v705_v26 = vadd.s32 536870912, %v704_v24 }
 0x330   :  { %v706_v28 = vshrl.u32 %v705_v26, 30 }
 0x332   :  { %v707_v31 = vshll.u32 %v706_v28, 30  ;;  %v730_v7 = vsub.s32 4, %v706_v28 }
 0x333   :  { %v4503_v53 = vpop.eup %4502 }
 0x334   :  { %v708_v33 = vsub.s32 %v704_v24, %v707_v31  ;;  %v626_v57 = vadd.f32 1.0, %v4503_v53  ;;  %v731_v8 = vsel %vm646_vm5, %v730_v7, %v706_v28  ;;  %v631_v18 = vmul.f32 %v4503_v53, %v630_v12 }
 0x335   :  { %v733_v3 = vsel %vm645_vm6, 0, %v731_v8 }
 0x336   :  { %v710_v16 = vsub.s32 0, %v708_v33  ;;  %v627_v63 = vmul.f32 0.5, %v626_v57  ;;  %v840_v11 = vadd.s32 3, %v733_v3  ;;  %v737_v14 = vand.u32 3, %v733_v3 }
 0x338   :  { %v4184_v34 = vmin.u32 %v710_v16, %v708_v33  ;;  %4504 = vrsqrt.f32 %v627_v63  ;;  %v841_v15 = vand.u32 3, %v840_v11  ;;  %vm742_vm7 = vcmp.eq.s32.totalorder %v737_v14, 2 }
 0x339   :  { %vm739_vm11 = vcmp.eq.s32.totalorder %v737_v14, 0  ;;  %vm738_vm13 = vcmp.lt.s32.totalorder %v737_v14, 2 }
 0x33a   :  { %v712_v36 = vclz %v4184_v34  ;;  %vm846_vm10 = vcmp.eq.s32.totalorder %v841_v15, 2  ;;  %vm843_vm12 = vcmp.eq.s32.totalorder %v841_v15, 0  ;;  %vm842_vm14 = vcmp.lt.s32.totalorder %v841_v15, 2 }
 0x33c   :  { %v4185_v37 = vadd.s32 4294967294, %v712_v36 }
 0x33e   :  { %vm4186_vm4 = vcmp.lt.s32.totalorder %v4185_v37, 0 }
 0x33f   :  { %v715_v40 = vsel %vm4186_vm4, 0, %v4185_v37 }
 0x340   :  { %v716_v44 = vsub.s32 32, %v715_v40  ;;  %v720_v45 = vsub.s32 4294967266, %v715_v40  ;;  %v717_v46 = vshll.u32 %v708_v33, %v715_v40 }
 0x342   :  { %v718_v50 = vshrl.u32 %v700_v42, %v716_v44  ;;  %v721_v52 = vadd.s32 127, %v720_v45 }
 0x344   :  { %v719_v54 = vor.u32 %v718_v50, %v717_v46  ;;  %v722_v56 = vshll.u32 %v721_v52, 23 }
 0x345   :  { %v4505_v4 = vpop.eup %4504 }
 0x346   :  { %v723_v58 = vor.u32 4788187, %v722_v56  ;;  %v726_v21 = vcvt.s32.f32 %v719_v54  ;;  %v629_v24 = vmul.f32 %v4505_v4, %v627_v63  ;;  %v632_v26 = vmul.f32 %v4505_v4, %v631_v18 }
 0x348   :  { %v724_v62 = vand.u32 2147483647, %v723_v58  ;;  %v862_v42 = vrot.slane %v629_v24, %v4751_v5  ;;  %v867_v44 = vrot.slane %v632_v26, %v4751_v5 }
 0x34a   :  { %v727_v6 = vmul.f32 %v726_v21, %v724_v62 }
 0x34c   :  { %v728_v1 = vxor.u32 2147483648, %v727_v6 }
 0x34e   :  { %v729_v10 = vsel %vm646_vm5, %v728_v1, %v727_v6 }
 0x34f   :  { %v732_v2 = vsel %vm645_vm6, %v4895_v13, %v729_v10 }
 0x350   :  { %4506 = vcosq.f32 %v732_v2 }
 0x351   :  { %4508 = vsinq.f32 %v732_v2 }
 0x35d   :  { %v4507_v17 = vpop.eup %4506 }
 0x35e   :  { %v4509_v23 = vpop.eup %4508  ;;  %v743_v25 = vxor.u32 2147483648, %v4507_v17 }
 0x35f   :  { %v740_v22 = vxor.u32 2147483648, %v4509_v23 }
 0x360   :  { %v744_v30 = vsel %vm742_vm7, %v743_v25, %v4509_v23  ;;  %v848_v28 = vsel %vm846_vm10, %v743_v25, %v4509_v23 }
 0x361   :  { %v741_v31 = vsel %vm739_vm11, %v4507_v17, %v740_v22  ;;  %v845_v33 = vsel %vm843_vm12, %v4507_v17, %v740_v22 }
 0x362   :  { %v745_v9 = vsel %vm738_vm13, %v741_v31, %v744_v30  ;;  %v849_v16 = vsel %vm842_vm14, %v845_v33, %v848_v28 }
 0x363   :  { %v746_v34 = vsel %vm736_vm15, nan, %v745_v9  ;;  %v850_v36 = vsel %vm736_vm15, nan, %v849_v16 }
 0x364   :  { %v851_v37 = vsub.f32 0.0, %v850_v36  ;;  %v853_v40 = vmul.f32 0.70710677, %v746_v34 }
 0x366   :  { %v855_v45 = vmul.f32 0.70710677, %v851_v37  ;;  %v857_v46 = vsub.f32 0.0, %v851_v37  ;;  %v863_v50 = vmul.f32 %v862_v42, %v853_v40  ;;  %v868_v52 = vmul.f32 %v867_v44, %v853_v40 }
 0x368   :  { %v858_v53 = vmul.f32 0.70710677, %v857_v46  ;;  %v869_v54 = vsub.f32 %v863_v50, %v868_v52  ;;  %v875_v56 = vadd.f32 %v868_v52, %v863_v50  ;;  %v876_v57 = vmul.f32 %v867_v44, %v855_v45 }
 0x369   :  { %v870_v58 = vmul.f32 %v862_v42, %v855_v45 }
 0x36a   :  { %v871_v13 = vmul.f32 %v867_v44, %v858_v53  ;;  %v877_v62 = vmul.f32 %v862_v42, %v858_v53  ;;  %v883_v21 = vmul.f32 %v869_v54, %v867_v44  ;;  %v889_v63 = vmul.f32 %v875_v56, %v867_v44 }
 0x36b   :  { %v879_v7 = vmul.f32 %v869_v54, %v862_v42  ;;  %v885_v10 = vmul.f32 %v875_v56, %v862_v42 }
 0x36c   :  { %v872_v6 = vsub.f32 %v870_v58, %v871_v13  ;;  %v878_v1 = vadd.f32 %v877_v62, %v876_v57 }
 0x36e   :  { %v880_v2 = vmul.f32 %v872_v6, %v867_v44  ;;  %v882_v8 = vmul.f32 %v872_v6, %v862_v42  ;;  %v886_v3 = vmul.f32 %v878_v1, %v867_v44  ;;  %v888_v11 = vmul.f32 %v878_v1, %v862_v42 }
 0x370   :  { %v881_v4 = vadd.f32 %v880_v2, %v879_v7  ;;  %v884_v12 = vsub.f32 %v882_v8, %v883_v21  ;;  %v887_v14 = vsub.f32 %v885_v10, %v886_v3  ;;  %v890_v15 = vadd.f32 %v889_v63, %v888_v11 }
 0x372   :  { %v891_v17 = vmul.f32 %v881_v4, %v4759_v48  ;;  %v892_v18 = vmul.f32 %v890_v15, %v4764_v49  ;;  %v894_v23 = vmul.f32 %v884_v12, %v4759_v48  ;;  %v895_v24 = vmul.f32 %v887_v14, %v4764_v49 }
 0x373   :  { %v897_v25 = vmul.f32 %v884_v12, %v4764_v49  ;;  %v898_v26 = vmul.f32 %v887_v14, %v4759_v48  ;;  %v900_v22 = vmul.f32 %v890_v15, %v4759_v48  ;;  %v901_v30 = vmul.f32 %v881_v4, %v4764_v49 }
 0x374   :  { %v893_v28 = vadd.f32 %v892_v18, %v891_v17  ;;  %v896_v31 = vsub.f32 %v894_v23, %v895_v24 }
 0x375   :  { %v899_v33 = vadd.f32 %v898_v26, %v897_v25  ;;  %v902_v9 = vsub.f32 %v900_v22, %v901_v30 }
 0x376   :  { %v903_v16 = vmul.f32 %v893_v28, %v4773_v59  ;;  %v906_v34 = vmul.f32 %v896_v31, %v4773_v59  ;;  %v909_v36 = vmul.f32 %v893_v28, %v4778_v60  ;;  %v912_v37 = vmul.f32 %v896_v31, %v4778_v60 }
 0x377   :  { %v904_v40 = vmul.f32 %v899_v33, %v4778_v60  ;;  %v907_v42 = vmul.f32 %v902_v9, %v4778_v60  ;;  %v910_v44 = vmul.f32 %v899_v33, %v4773_v59  ;;  %v913_v45 = vmul.f32 %v902_v9, %v4773_v59 }
 0x379   :  { %v905_v46 = vsub.f32 %v903_v16, %v904_v40  ;;  %v908_v50 = vsub.f32 %v906_v34, %v907_v42  ;;  %v911_v52 = vadd.f32 %v910_v44, %v909_v36  ;;  %v914_v53 = vadd.f32 %v913_v45, %v912_v37 }
 0x37b   :  { %v915_v54 = vmul.f32 %v905_v46, %v4795_v19  ;;  %v916_v56 = vmul.f32 %v908_v50, %v4800_v20  ;;  %v918_v57 = vmul.f32 %v908_v50, %v4795_v19  ;;  %v919_v58 = vmul.f32 %v905_v46, %v4800_v20 }
 0x37c   :  { %v921_v13 = vmul.f32 %v911_v52, %v4795_v19  ;;  %v922_v62 = vmul.f32 %v914_v53, %v4800_v20  ;;  %v924_v21 = vmul.f32 %v914_v53, %v4795_v19  ;;  %v925_v63 = vmul.f32 %v911_v52, %v4800_v20 }
 0x37d   :  { %v917_v6 = vadd.f32 %v916_v56, %v915_v54  ;;  %v920_v1 = vsub.f32 %v918_v57, %v919_v58 }
 0x37e   :  { %v923_v7 = vsub.f32 %v921_v13, %v922_v62  ;;  %v926_v10 = vadd.f32 %v925_v63, %v924_v21 }
 0x37f   :  { %v927_v2 = vmul.f32 %v917_v6, %v4759_v48  ;;  %v930_v8 = vmul.f32 %v920_v1, %v4759_v48  ;;  %v933_v3 = vmul.f32 %v920_v1, %v4764_v49  ;;  %v937_v11 = vmul.f32 %v917_v6, %v4764_v49 }
 0x380   :  { %v928_v4 = vmul.f32 %v926_v10, %v4764_v49  ;;  %v931_v12 = vmul.f32 %v923_v7, %v4764_v49  ;;  %v934_v14 = vmul.f32 %v923_v7, %v4759_v48  ;;  %v936_v15 = vmul.f32 %v926_v10, %v4759_v48 }
 0x382   :  { %v929_v17 = vadd.f32 %v928_v4, %v927_v2  ;;  %v932_v18 = vsub.f32 %v930_v8, %v931_v12  ;;  %v935_v23 = vadd.f32 %v934_v14, %v933_v3  ;;  %v938_v24 = vsub.f32 %v936_v15, %v937_v11 }
 0x384   :  { %v939_v25 = vmul.f32 %v929_v17, %v4773_v59  ;;  %v940_v26 = vmul.f32 %v935_v23, %v4778_v60  ;;  %v942_v22 = vmul.f32 %v932_v18, %v4773_v59  ;;  %v943_v30 = vmul.f32 %v938_v24, %v4778_v60 }
 0x385   :  { %v945_v28 = vmul.f32 %v929_v17, %v4778_v60  ;;  %v946_v49 = vmul.f32 %v935_v23, %v4773_v59  ;;  %v948_v31 = vmul.f32 %v932_v18, %v4778_v60  ;;  %v949_v48 = vmul.f32 %v938_v24, %v4773_v59 }
 0x386   :  { %v941_v33 = vsub.f32 %v939_v25, %v940_v26  ;;  %v944_v9 = vsub.f32 %v942_v22, %v943_v30 }
 0x387   :  { %v947_v16 = vadd.f32 %v946_v49, %v945_v28  ;;  %v950_v34 = vadd.f32 %v949_v48, %v948_v31 }
 0x388   :  { %v951_v36 = vmul.f32 %v941_v33, %v4795_v19  ;;  %v952_v37 = vmul.f32 %v944_v9, %v4800_v20  ;;  %v954_v40 = vmul.f32 %v944_v9, %v4795_v19  ;;  %v955_v42 = vmul.f32 %v941_v33, %v4800_v20 }
 0x389   :  { %v957_v44 = vmul.f32 %v947_v16, %v4795_v19  ;;  %v958_v45 = vmul.f32 %v950_v34, %v4800_v20  ;;  %v960_v60 = vmul.f32 %v950_v34, %v4795_v19  ;;  %v961_v59 = vmul.f32 %v947_v16, %v4800_v20  ;;  %v4985_v19 = vld [vmem:[%s5924_s1 + $0x58] sm:$0xff] }
 0x38a   :  { %v953_v46 = vadd.f32 %v952_v37, %v951_v36  ;;  %v956_v50 = vsub.f32 %v954_v40, %v955_v42 }
 0x38b   :  { %v959_v52 = vsub.f32 %v957_v44, %v958_v45  ;;  %v962_v53 = vadd.f32 %v961_v59, %v960_v60 }
 0x38c   :  { %v963_v54 = vmul.f32 %v953_v46, %v953_v46  ;;  %v964_v56 = vmul.f32 %v956_v50, %v956_v50 }
 0x38d   :  { %v966_v57 = vmul.f32 %v959_v52, %v959_v52  ;;  %v967_v58 = vmul.f32 %v962_v53, %v962_v53 }
 0x38e   :  { %v965_v13 = vadd.f32 %v964_v56, %v963_v54 }
 0x38f   :  { %v968_v62 = vadd.f32 %v967_v58, %v966_v57 }
 0x391   :  { %v969_v21 = vsub.f32 %v965_v13, %v968_v62 }
 0x393   :  { %v970_v63 = vmul.f32 %v969_v21, %v4837_v39 }
 0x395   :  { %4352 = vmatmul.mubr.msk.f32.vlgmr.msra.gmra.mxu0 %vm453_vm8, %v970_v63 }
 0x396   :  { %4366 = vmatpush3.msk.msra.mxu0 %vm121_vm1, %v4985_v19  ;;  %4367 = vmatprep.mubr.msk.f32.mxu0 %vm4636_vm0, %v4635_v0 }
 0x397   :  { %4370 = vmatprep.subr.mxu0 %v4635_v0 }
 0x455   :  { %v1040_v20 = vpop.f32.mrf.mxu0 }
 0x456   :  { %v1041_v6 = vadd.f32 %v1040_v20, %v4854_v43 }
 0x457   :  { %v4353_v1 = vpop.f32.mrf.mxu0 }
 0x458   :  { %4510 = vtanh.f32 %v1041_v6 }
 0x465   :  { %v4511_v39 = vpop.eup %4510 }
 0x466   :  { %v1045_v7 = vmul.f32 %v4511_v39, %v4860_v47  ;;  %v4193_v47 = vld [vmem:[%s5925_s0 + $0x4] sm:$0x3] }
 0x468   :  { %v1046_v10 = vadd.f32 %v1045_v7, %v4865_v51 }
 0x46a   :  { %v1049_v2 = vrot.slane %v1046_v10, 2  ;;  %v1047_v3 = vmul.f32 %v1046_v10, %v4869_v61 }
 0x46c   :  { %v1051_v8 = vmul.f32 %v1049_v2, %v1046_v10 }
 0x46e   :  { %v1053_v11 = vrot.slane %v1051_v8, 2 }
 0x470   :  { %v4996_v4 = vadd.f32 %v1053_v11, %v1047_v3 }
 0x472   :  { %4512 = vtanh.f32 %v4996_v4 }
 0x47f   :  { %v4513_v12 = vpop.eup %4512 }
 0x480   :  { %v1058_v14 = vrot.slane %v4513_v12, 2 }
 0x482   :  { %v1060_v15 = vmul.f32 %v1058_v14, %v1046_v10 }
 0x484   :  { %v1064_v43 = vrot.slane %v1060_v15, 6 }
 0x486   :  { %4363 = vmatmul.mubr.msk.f32.vlgmr.msra.gmra.mxu1 %vm28_vm9, %v1064_v43 }
 0x487   :  { %4382 = vmatpush3.msk.msra.mxu1 %vm121_vm1, %v4985_v19  ;;  %4383 = vmatprep.mubr.msk.f32.mxu1 %vm4636_vm0, %v4635_v0 }
 0x488   :  { %4386 = vmatprep.subr.mxu1 %v4635_v0 }
 0x546   :  { %v1133_v51 = vpop.f32.mrf.mxu1 }
 0x547   :  { %v5008_v61 = vadd.f32 %v4193_v47, %v1133_v51 }
 0x548   :  { %v4364_v17 = vpop.f32.mrf.mxu1 }
 0x549   :  { %v1148_v18 = vrot.slane %v5008_v61, 6  ;;  %v1150_v23 = vrot.slane %v5008_v61, 4  ;;  %v1152_v24 = vrot.slane %v5008_v61, 2 }
 0x54b   :  { %v1154_v25 = vsel %vm119_vm2, %v5008_v61, %v1148_v18 }
 0x54c   :  { %v1155_v26 = vsel %vm121_vm1, %v1154_v25, %v1150_v23  ;;  %v1137_v25 = vmul.f32 %v5008_v61, %v5008_v61 }
 0x54d   :  { %v1156_v22 = vsel %vm123_vm3, %v1155_v26, %v1152_v24 }
 0x54e   :  { %v5017_v30 = vmul.f32 0.5, %v1156_v22 }
 0x550   :  { %v1161_v28 = vand.u32 2139095040, %v5017_v30  ;;  %v1158_v33 = vand.u32 2147483647, %v5017_v30  ;;  %vm1160_vm13 = vcmp.lt.s32.totalorder %v5017_v30, 0 }
 0x552   :  { %v1162_v49 = vshrl.u32 %v1161_v28, 23  ;;  %v1165_v34 = vand.u32 8388607, %v1158_v33  ;;  %v1138_v28 = vadd.f32 1.0, %v1137_v25  ;;  %vm1159_vm14 = vcmp.le.f32.partialorder %v1158_v33, 0.7853982 }
 0x554   :  { %v4195_v31 = vadd.s32 4294967169, %v1162_v49  ;;  %v1166_v54 = vor.u32 8388608, %v1165_v34  ;;  %4514 = vrsqrt.f32 %v1138_v28 }
 0x556   :  { %v1168_v48 = vadd.s32 1, %v4195_v31  ;;  %v1206_v2 = vshll.u32 %v1166_v54, 8 }
 0x558   :  { %vm1169_vm4 = vcmp.gt.s32.totalorder %v1168_v48, 0 }
 0x559   :  { %v1170_v9 = vsel %vm1169_vm4, %v1168_v48, 0 }
 0x55a   :  { %v1172_v16 = vand.u32 31, %v1170_v9  ;;  %v1171_v37 = vshrl.u32 %v1170_v9, 5 }
 0x55c   :  { %v1173_v36 = vsub.s32 32, %v1172_v16  ;;  %v1175_v40 = vshll.u32 %v4637_v27, %v1172_v16  ;;  %v1178_v42 = vshll.u32 %v4638_v29, %v1172_v16  ;;  %v1181_v60 = vshll.u32 %v4639_v32, %v1172_v16 }
 0x55d   :  { %v1184_v46 = vshll.u32 %v4640_v35, %v1172_v16  ;;  %v1187_v52 = vshll.u32 %v4641_v38, %v1172_v16  ;;  %vm1190_vm5 = vcmp.lt.s32.totalorder %v1171_v37, 1  ;;  %vm1193_vm6 = vcmp.lt.s32.totalorder %v1171_v37, 4 }
 0x55e   :  { %v1176_v44 = vshrl.u32 %v4638_v29, %v1173_v36  ;;  %v1179_v45 = vshrl.u32 %v4639_v32, %v1173_v36  ;;  %v1182_v59 = vshrl.u32 %v4640_v35, %v1173_v36  ;;  %v1185_v50 = vshrl.u32 %v4641_v38, %v1173_v36 }
 0x55f   :  { %v1188_v53 = vshrl.u32 %v4642_v41, %v1173_v36  ;;  %v1174_v6 = vshrl.u32 %v4637_v27, %v1173_v36  ;;  %vm1192_vm7 = vcmp.lt.s32.totalorder %v1171_v37, 3  ;;  %vm1191_vm10 = vcmp.lt.s32.totalorder %v1171_v37, 2 }
 0x560   :  { %v1177_v56 = vor.u32 %v1176_v44, %v1175_v40  ;;  %v1180_v57 = vor.u32 %v1179_v45, %v1178_v42  ;;  %v1183_v58 = vor.u32 %v1182_v59, %v1181_v60  ;;  %v1186_v13 = vor.u32 %v1185_v50, %v1184_v46 }
 0x561   :  { %v1189_v62 = vor.u32 %v1188_v53, %v1187_v52  ;;  %v4515_v59 = vpop.eup %4514 }
 0x562   :  { %v1195_v21 = vsel %vm1193_vm6, %v1183_v58, 2102212464  ;;  %v1198_v63 = vsel %vm1190_vm5, %v1177_v56, %v1180_v57  ;;  %v1202_v20 = vsel %vm1190_vm5, %v1180_v57, %v1183_v58  ;;  %v1199_v1 = vsel %vm1193_vm6, %v1186_v13, 920167782 }
 0x563   :  { %v1203_v39 = vsel %vm1193_vm6, %v1189_v62, 1326507024  ;;  %v1200_v7 = vsel %vm1192_vm7, %v1183_v58, %v1199_v1  ;;  %v1194_v8 = vsel %vm1190_vm5, %v1174_v6, %v1177_v56  ;;  %v1196_v3 = vsel %vm1192_vm7, %v1180_v57, %v1195_v21 }
 0x564   :  { %v1204_v10 = vsel %vm1192_vm7, %v1186_v13, %v1203_v39  ;;  %v1201_v11 = vsel %vm1191_vm10, %v1198_v63, %v1200_v7  ;;  %v1197_v51 = vsel %vm1191_vm10, %v1194_v8, %v1196_v3  ;;  %v1140_v52 = vadd.f32 1.0, %v4515_v59 }
 0x565   :  { %v1205_v12 = vsel %vm1191_vm10, %v1202_v20, %v1204_v10  ;;  %v5037_v43 = vmul.u32.u64.low %v1206_v2, %v1201_v11  ;;  %v5038_v47 = vmul.u32.u64.high %v1206_v2, %v1201_v11, %v5037_v43  ;;  %v1213_v18 = vmul.u32 %v1206_v2, %v1197_v51 }
 0x566   :  { %v5034_v14 = vmul.u32.u64.low %v1206_v2, %v1205_v12  ;;  %v5035_v15 = vmul.u32.u64.high %v1206_v2, %v1205_v12, %v5034_v14  ;;  %v1141_v57 = vmul.f32 0.5, %v1140_v52  ;;  %v1144_v7 = vmul.f32 0.5, %v5008_v61 }
 0x567   :  { %v1216_v17 = vadd.s32 1, %v5038_v47 }
 0x568   :  { %vm1215_vm11 = vc.u32 %v5035_v15, %v5037_v43  ;;  %v1214_v37 = vadd.s32 %v5037_v43, %v5035_v15  ;;  %4516 = vrsqrt.f32 %v1141_v57  ;;  %v1145_v3 = vmul.f32 %v4515_v59, %v1144_v7 }
 0x569   :  { %v1217_v23 = vsel %vm1215_vm11, %v1216_v17, %v5038_v47  ;;  %vm1250_vm11 = vweird.f32 %v5017_v30 }
 0x56a   :  { %v1218_v24 = vadd.s32 %v1217_v23, %v1213_v18 }
 0x56c   :  { %v1219_v26 = vadd.s32 536870912, %v1218_v24 }
 0x56e   :  { %v1220_v22 = vshrl.u32 %v1219_v26, 30 }
 0x570   :  { %v1221_v49 = vshll.u32 %v1220_v22, 30  ;;  %v1244_v62 = vsub.s32 4, %v1220_v22 }
 0x572   :  { %v1222_v31 = vsub.s32 %v1218_v24, %v1221_v49  ;;  %v1245_v20 = vsel %vm1160_vm13, %v1244_v62, %v1220_v22 }
 0x573   :  { %v1247_v6 = vsel %vm1159_vm14, 0, %v1245_v20  ;;  %v5063_v20 = vld [vmem:[%s5924_s1 + $0x18] sm:$0xff] }
 0x574   :  { %v1224_v48 = vsub.s32 0, %v1222_v31  ;;  %v1354_v1 = vadd.s32 3, %v1247_v6  ;;  %v1251_v10 = vand.u32 3, %v1247_v6 }
 0x575   :  { %v4517_v39 = vpop.eup %4516 }
 0x576   :  { %v4196_v9 = vmin.u32 %v1224_v48, %v1222_v31  ;;  %v1355_v2 = vand.u32 3, %v1354_v1  ;;  %v1143_v12 = vmul.f32 %v4517_v39, %v1141_v57  ;;  %v1146_v15 = vmul.f32 %v4517_v39, %v1145_v3 }
 0x577   :  { %vm1256_vm15 = vcmp.eq.s32.totalorder %v1251_v10, 2  ;;  %vm1253_vm5 = vcmp.eq.s32.totalorder %v1251_v10, 0  ;;  %vm1252_vm7 = vcmp.lt.s32.totalorder %v1251_v10, 2 }
 0x578   :  { %v1226_v16 = vclz %v4196_v9  ;;  %vm1360_vm4 = vcmp.eq.s32.totalorder %v1355_v2, 2  ;;  %vm1357_vm6 = vcmp.eq.s32.totalorder %v1355_v2, 0  ;;  %vm1356_vm10 = vcmp.lt.s32.totalorder %v1355_v2, 2 }
 0x579   :  { %v1376_v22 = vrot.slane %v1143_v12, %v4751_v5  ;;  %v1381_v28 = vrot.slane %v1146_v15, %v4751_v5  ;;  %v5075_v15 = vld [vmem:[%s5924_s1 + $0x8] sm:$0xff] }
 0x57a   :  { %v4197_v34 = vadd.s32 4294967294, %v1226_v16 }
 0x57c   :  { %vm4198_vm12 = vcmp.lt.s32.totalorder %v4197_v34, 0 }
 0x57d   :  { %v1229_v36 = vsel %vm4198_vm12, 0, %v4197_v34 }
 0x57e   :  { %v1230_v40 = vsub.s32 32, %v1229_v36  ;;  %v1234_v42 = vsub.s32 4294967266, %v1229_v36  ;;  %v1231_v44 = vshll.u32 %v1222_v31, %v1229_v36 }
 0x580   :  { %v1232_v45 = vshrl.u32 %v1214_v37, %v1230_v40  ;;  %v1235_v60 = vadd.s32 127, %v1234_v42 }
 0x582   :  { %v1233_v46 = vor.u32 %v1232_v45, %v1231_v44  ;;  %v1236_v50 = vshll.u32 %v1235_v60, 23 }
 0x584   :  { %v1237_v53 = vor.u32 4788187, %v1236_v50  ;;  %v1240_v56 = vcvt.s32.f32 %v1233_v46 }
 0x586   :  { %v1238_v54 = vand.u32 2147483647, %v1237_v53 }
 0x588   :  { %v1241_v58 = vmul.f32 %v1240_v56, %v1238_v54 }
 0x58a   :  { %v1242_v13 = vxor.u32 2147483648, %v1241_v58 }
 0x58c   :  { %v1243_v21 = vsel %vm1160_vm13, %v1242_v13, %v1241_v58 }
 0x58d   :  { %v1246_v63 = vsel %vm1159_vm14, %v5017_v30, %v1243_v21  ;;  %v5057_v21 = vld [vmem:[%s5924_s1] sm:$0xff] }
 0x58e   :  { %4518 = vcosq.f32 %v1246_v63 }
 0x58f   :  { %4520 = vsinq.f32 %v1246_v63 }
 0x59b   :  { %v4519_v8 = vpop.eup %4518 }
 0x59c   :  { %v4521_v11 = vpop.eup %4520  ;;  %v1257_v14 = vxor.u32 2147483648, %v4519_v8 }
 0x59d   :  { %v1254_v33 = vxor.u32 2147483648, %v4521_v11 }
 0x59e   :  { %v1258_v43 = vsel %vm1256_vm15, %v1257_v14, %v4521_v11  ;;  %v1362_v47 = vsel %vm1360_vm4, %v1257_v14, %v4521_v11 }
 0x59f   :  { %v1255_v51 = vsel %vm1253_vm5, %v4519_v8, %v1254_v33  ;;  %v1359_v17 = vsel %vm1357_vm6, %v4519_v8, %v1254_v33 }
 0x5a0   :  { %v1259_v61 = vsel %vm1252_vm7, %v1255_v51, %v1258_v43  ;;  %v1363_v18 = vsel %vm1356_vm10, %v1359_v17, %v1362_v47  ;;  %v5082_v47 = vld [vmem:[%s5924_s1 + $0x20] sm:$0xff] }
 0x5a1   :  { %v1260_v23 = vsel %vm1250_vm11, nan, %v1259_v61  ;;  %v1364_v24 = vsel %vm1250_vm11, nan, %v1363_v18 }
 0x5a2   :  { %v1365_v25 = vsub.f32 0.0, %v1364_v24  ;;  %v1367_v26 = vmul.f32 0.70710677, %v1260_v23 }
 0x5a4   :  { %v1369_v49 = vmul.f32 0.70710677, %v1365_v25  ;;  %v1371_v31 = vsub.f32 0.0, %v1365_v25  ;;  %v1377_v48 = vmul.f32 %v1376_v22, %v1367_v26  ;;  %v1382_v9 = vmul.f32 %v1381_v28, %v1367_v26 }
 0x5a6   :  { %v1372_v16 = vmul.f32 0.70710677, %v1371_v31  ;;  %v1383_v34 = vsub.f32 %v1377_v48, %v1382_v9  ;;  %v1389_v36 = vadd.f32 %v1382_v9, %v1377_v48  ;;  %v1390_v37 = vmul.f32 %v1381_v28, %v1369_v49  ;;  %v5099_v48 = vld [vmem:[%s5924_s1 + $0x28] sm:$0xff] }
 0x5a7   :  { %v1384_v40 = vmul.f32 %v1376_v22, %v1369_v49  ;;  %v5093_v49 = vld [vmem:[%s5924_s1 + $0x10] sm:$0xff] }
 0x5a8   :  { %v1385_v30 = vmul.f32 %v1381_v28, %v1372_v16  ;;  %v1391_v42 = vmul.f32 %v1376_v22, %v1372_v16  ;;  %v1397_v44 = vmul.f32 %v1383_v34, %v1381_v28  ;;  %v1403_v45 = vmul.f32 %v1389_v36, %v1381_v28 }
 0x5a9   :  { %v1393_v46 = vmul.f32 %v1383_v34, %v1376_v22  ;;  %v1399_v50 = vmul.f32 %v1389_v36, %v1376_v22 }
 0x5aa   :  { %v1386_v60 = vsub.f32 %v1384_v40, %v1385_v30  ;;  %v1392_v59 = vadd.f32 %v1391_v42, %v1390_v37 }
 0x5ac   :  { %v1394_v52 = vmul.f32 %v1386_v60, %v1381_v28  ;;  %v1396_v53 = vmul.f32 %v1386_v60, %v1376_v22  ;;  %v1400_v54 = vmul.f32 %v1392_v59, %v1381_v28  ;;  %v1402_v56 = vmul.f32 %v1392_v59, %v1376_v22 }
 0x5ae   :  { %v1395_v57 = vadd.f32 %v1394_v52, %v1393_v46  ;;  %v1398_v58 = vsub.f32 %v1396_v53, %v1397_v44  ;;  %v1401_v13 = vsub.f32 %v1399_v50, %v1400_v54  ;;  %v1404_v62 = vadd.f32 %v1403_v45, %v1402_v56 }
 0x5b0   :  { %v1405_v63 = vmul.f32 %v5057_v21, %v1395_v57  ;;  %v1406_v6 = vmul.f32 %v5063_v20, %v1404_v62  ;;  %v1408_v1 = vmul.f32 %v5057_v21, %v1398_v58  ;;  %v1409_v39 = vmul.f32 %v5063_v20, %v1401_v13 }
 0x5b1   :  { %v1411_v7 = vmul.f32 %v5063_v20, %v1398_v58  ;;  %v1412_v10 = vmul.f32 %v5057_v21, %v1401_v13  ;;  %v1414_v2 = vmul.f32 %v5057_v21, %v1404_v62  ;;  %v1415_v8 = vmul.f32 %v5063_v20, %v1395_v57 }
 0x5b2   :  { %v1407_v3 = vadd.f32 %v1406_v6, %v1405_v63  ;;  %v1410_v11 = vsub.f32 %v1408_v1, %v1409_v39 }
 0x5b3   :  { %v1413_v12 = vadd.f32 %v1412_v10, %v1411_v7  ;;  %v1416_v14 = vsub.f32 %v1414_v2, %v1415_v8 }
 0x5b4   :  { %v1417_v33 = vmul.f32 %v5075_v15, %v1407_v3  ;;  %v1420_v43 = vmul.f32 %v5075_v15, %v1410_v11  ;;  %v1423_v51 = vmul.f32 %v5082_v47, %v1407_v3  ;;  %v1426_v17 = vmul.f32 %v5082_v47, %v1410_v11 }
 0x5b5   :  { %v1418_v61 = vmul.f32 %v5082_v47, %v1413_v12  ;;  %v1421_v18 = vmul.f32 %v5082_v47, %v1416_v14  ;;  %v1424_v23 = vmul.f32 %v5075_v15, %v1413_v12  ;;  %v1427_v24 = vmul.f32 %v5075_v15, %v1416_v14 }
 0x5b7   :  { %v1419_v25 = vsub.f32 %v1417_v33, %v1418_v61  ;;  %v1422_v26 = vsub.f32 %v1420_v43, %v1421_v18  ;;  %v1425_v22 = vadd.f32 %v1424_v23, %v1423_v51  ;;  %v1428_v28 = vadd.f32 %v1427_v24, %v1426_v17 }
 0x5b9   :  { %v1429_v31 = vmul.f32 %v5093_v49, %v1419_v25  ;;  %v1430_v9 = vmul.f32 %v5099_v48, %v1422_v26  ;;  %v1432_v16 = vmul.f32 %v5093_v49, %v1422_v26  ;;  %v1433_v34 = vmul.f32 %v5099_v48, %v1419_v25 }
 0x5ba   :  { %v1435_v36 = vmul.f32 %v5093_v49, %v1425_v22  ;;  %v1436_v37 = vmul.f32 %v5099_v48, %v1428_v28  ;;  %v1438_v40 = vmul.f32 %v5093_v49, %v1428_v28  ;;  %v1439_v30 = vmul.f32 %v5099_v48, %v1425_v22 }
 0x5bb   :  { %v1431_v42 = vadd.f32 %v1430_v9, %v1429_v31  ;;  %v1434_v44 = vsub.f32 %v1432_v16, %v1433_v34 }
 0x5bc   :  { %v1437_v45 = vsub.f32 %v1435_v36, %v1436_v37  ;;  %v1440_v60 = vadd.f32 %v1439_v30, %v1438_v40 }
 0x5bd   :  { %v1441_v59 = vmul.f32 %v5057_v21, %v1431_v42  ;;  %v1444_v46 = vmul.f32 %v5057_v21, %v1434_v44  ;;  %v1447_v50 = vmul.f32 %v5063_v20, %v1434_v44  ;;  %v1451_v52 = vmul.f32 %v5063_v20, %v1431_v42  ;;  %v5135_v42 = vld [vmem:[%s5924_s1 + $0x30] sm:$0xff] }
 0x5be   :  { %v1442_v53 = vmul.f32 %v5063_v20, %v1440_v60  ;;  %v1445_v54 = vmul.f32 %v5063_v20, %v1437_v45  ;;  %v1448_v56 = vmul.f32 %v5057_v21, %v1437_v45  ;;  %v1450_v57 = vmul.f32 %v5057_v21, %v1440_v60  ;;  %v5142_v45 = vld [vmem:[%s5924_s1 + $0x50] sm:$0xff]  ;;  %v5151_v60 = vld [vmem:[%s5924_s1 + $0x48] sm:$0xff] }
 0x5c0   :  { %v1443_v58 = vadd.f32 %v1442_v53, %v1441_v59  ;;  %v1446_v13 = vsub.f32 %v1444_v46, %v1445_v54  ;;  %v1449_v62 = vadd.f32 %v1448_v56, %v1447_v50  ;;  %v1452_v63 = vsub.f32 %v1450_v57, %v1451_v52  ;;  %v5158_v59 = vld [vmem:[%s5924_s1 + $0x40] sm:$0xff]  ;;  %v5165_v46 = vld [vmem:[%s5924_s1 + $0x38] sm:$0xff]  ;;  %v5178_v57 = vld [vmem:[%s5924_s1 + $0x68] sm:$0xff] }
 0x5c1   :  { %v5172_v52 = vld [vmem:[%s5924_s1 + $0x60] sm:$0xff] }
 0x5c2   :  { %v1453_v6 = vmul.f32 %v5075_v15, %v1443_v58  ;;  %v1454_v1 = vmul.f32 %v5082_v47, %v1449_v62  ;;  %v1456_v39 = vmul.f32 %v5075_v15, %v1446_v13  ;;  %v1457_v7 = vmul.f32 %v5082_v47, %v1452_v63 }
 0x5c3   :  { %v1459_v10 = vmul.f32 %v5082_v47, %v1443_v58  ;;  %v1460_v2 = vmul.f32 %v5075_v15, %v1449_v62  ;;  %v1462_v8 = vmul.f32 %v5082_v47, %v1446_v13  ;;  %v1463_v3 = vmul.f32 %v5075_v15, %v1452_v63  ;;  %v5184_v13 = vld [vmem:[%s5924_s1 + $0x70] sm:$0xff] }
 0x5c4   :  { %v1455_v11 = vsub.f32 %v1453_v6, %v1454_v1  ;;  %v1458_v12 = vsub.f32 %v1456_v39, %v1457_v7 }
 0x5c5   :  { %v1461_v14 = vadd.f32 %v1460_v2, %v1459_v10  ;;  %v1464_v33 = vadd.f32 %v1463_v3, %v1462_v8 }
 0x5c6   :  { %v1465_v43 = vmul.f32 %v5093_v49, %v1455_v11  ;;  %v1466_v51 = vmul.f32 %v5099_v48, %v1458_v12  ;;  %v1468_v17 = vmul.f32 %v5093_v49, %v1458_v12  ;;  %v1469_v61 = vmul.f32 %v5099_v48, %v1455_v11 }
 0x5c7   :  { %v1471_v18 = vmul.f32 %v5093_v49, %v1461_v14  ;;  %v1472_v23 = vmul.f32 %v5099_v48, %v1464_v33  ;;  %v1474_v24 = vmul.f32 %v5093_v49, %v1464_v33  ;;  %v1475_v25 = vmul.f32 %v5099_v48, %v1461_v14 }
 0x5c8   :  { %v1467_v26 = vadd.f32 %v1466_v51, %v1465_v43  ;;  %v1470_v22 = vsub.f32 %v1468_v17, %v1469_v61 }
 0x5c9   :  { %v1473_v28 = vsub.f32 %v1471_v18, %v1472_v23  ;;  %v1476_v31 = vadd.f32 %v1475_v25, %v1474_v24 }
 0x5ca   :  { %v1477_v9 = vmul.f32 %v1467_v26, %v1467_v26  ;;  %v1478_v16 = vmul.f32 %v1470_v22, %v1470_v22 }
 0x5cb   :  { %v1480_v34 = vmul.f32 %v1473_v28, %v1473_v28  ;;  %v1481_v36 = vmul.f32 %v1476_v31, %v1476_v31 }
 0x5cc   :  { %v1479_v37 = vadd.f32 %v1478_v16, %v1477_v9 }
 0x5cd   :  { %v1482_v40 = vadd.f32 %v1481_v36, %v1480_v34 }
 0x5cf   :  { %v1483_v30 = vsub.f32 %v1479_v37, %v1482_v40 }
 0x5d1   :  { %v1484_v44 = vmul.f32 %v5135_v42, %v1483_v30 }
 0x5d3   :  { %4368 = vmatmul.mubr.msk.f32.vlgmr.msra.gmra.mxu0 %vm453_vm8, %v1484_v44 }
 0x5d4   :  { %4371 = vmatpush3.msra.mxu0 %v5142_v45  ;;  %4378 = vmatprep.mubr.msk.f32.mxu0 %vm4636_vm0, %v4635_v0 }
 0x5d5   :  { %4372 = vmatprep.subr.mxu0 %v4635_v0 }
 0x5d6   :  { %4373 = vmatpush3.msra.mxu0 %v5151_v60 }
 0x5d7   :  { %4374 = vmatprep.subr.mxu0 %v4635_v0 }
 0x5d8   :  { %4375 = vmatpush3.msra.mxu0 %v5158_v59 }
 0x5d9   :  { %4376 = vmatprep.subr.mxu0 %v4635_v0 }
 0x5da   :  { %4377 = vmatpush3.msra.mxu0 %v5165_v46 }
 0x5db   :  { %4397 = vmatprep.subr.mxu0 %v4635_v0 }
 0x693   :  { %v1554_v50 = vpop.f32.mrf.mxu0 }
 0x694   :  { %v1555_v53 = vadd.f32 %v5172_v52, %v1554_v50 }
 0x695   :  { %v4369_v54 = vpop.f32.mrf.mxu0 }
 0x696   :  { %4522 = vtanh.f32 %v1555_v53 }
 0x6a3   :  { %v4523_v56 = vpop.eup %4522 }
 0x6a4   :  { %v1559_v58 = vmul.f32 %v5178_v57, %v4523_v56 }
 0x6a6   :  { %v1560_v62 = vadd.f32 %v5184_v13, %v1559_v58 }
 0x6a8   :  { %v1563_v63 = vrot.slane %v1560_v62, 2  ;;  %v1561_v1 = vmul.f32 %v1560_v62, %v4996_v4  ;;  %v4205_v4 = vld [vmem:[%s5925_s0 + $0x6] sm:$0x3] }
 0x6aa   :  { %v1565_v6 = vmul.f32 %v1563_v63, %v1560_v62 }
 0x6ac   :  { %v1567_v39 = vrot.slane %v1565_v6, 2 }
 0x6ae   :  { %v5188_v7 = vadd.f32 %v1567_v39, %v1561_v1 }
 0x6b0   :  { %4524 = vtanh.f32 %v5188_v7 }
 0x6bd   :  { %v4525_v10 = vpop.eup %4524 }
 0x6be   :  { %v1572_v2 = vrot.slane %v4525_v10, 2 }
 0x6c0   :  { %v1574_v8 = vmul.f32 %v1572_v2, %v1560_v62 }
 0x6c2   :  { %v1578_v3 = vrot.slane %v1574_v8, 6 }
 0x6c4   :  { %4379 = vmatmul.mubr.msk.f32.vlgmr.msra.gmra.mxu0 %vm28_vm9, %v1578_v3 }
 0x6c5   :  { %4398 = vmatpush3.msk.msra.mxu0 %vm121_vm1, %v4985_v19  ;;  %4399 = vmatprep.mubr.msk.f32.mxu0 %vm4636_vm0, %v4635_v0 }
 0x6c6   :  { %4402 = vmatprep.subr.mxu0 %v4635_v0 }
 0x784   :  { %v1647_v11 = vpop.f32.mrf.mxu0 }
 0x785   :  { %v5200_v12 = vadd.f32 %v4205_v4, %v1647_v11 }
 0x786   :  { %v4380_v14 = vpop.f32.mrf.mxu0 }
 0x787   :  { %v1662_v33 = vrot.slane %v5200_v12, 6  ;;  %v1664_v43 = vrot.slane %v5200_v12, 4  ;;  %v1666_v51 = vrot.slane %v5200_v12, 2 }
 0x789   :  { %v1668_v19 = vsel %vm119_vm2, %v5200_v12, %v1662_v33 }
 0x78a   :  { %v1669_v17 = vsel %vm121_vm1, %v1668_v19, %v1664_v43 }
 0x78b   :  { %v1670_v61 = vsel %vm123_vm3, %v1669_v17, %v1666_v51 }
 0x78c   :  { %v5209_v18 = vmul.f32 0.5, %v1670_v61 }
 0x78e   :  { %v1675_v23 = vand.u32 2139095040, %v5209_v18  ;;  %v1672_v22 = vand.u32 2147483647, %v5209_v18  ;;  %vm1674_vm7 = vcmp.lt.s32.totalorder %v5209_v18, 0 }
 0x790   :  { %v1676_v24 = vshrl.u32 %v1675_v23, 23  ;;  %v1679_v9 = vand.u32 8388607, %v1672_v22  ;;  %vm1673_vm10 = vcmp.le.f32.partialorder %v1672_v22, 0.7853982 }
 0x792   :  { %v4207_v25 = vadd.s32 4294967169, %v1676_v24  ;;  %v1680_v62 = vor.u32 8388608, %v1679_v9 }
 0x794   :  { %v1682_v26 = vadd.s32 1, %v4207_v25  ;;  %v1720_v51 = vshll.u32 %v1680_v62, 8 }
 0x796   :  { %vm1683_vm12 = vcmp.gt.s32.totalorder %v1682_v26, 0 }
 0x797   :  { %v1684_v28 = vsel %vm1683_vm12, %v1682_v26, 0 }
 0x798   :  { %v1686_v31 = vand.u32 31, %v1684_v28  ;;  %v1685_v34 = vshrl.u32 %v1684_v28, 5 }
 0x79a   :  { %v1687_v16 = vsub.s32 32, %v1686_v31  ;;  %v1689_v36 = vshll.u32 %v4637_v27, %v1686_v31  ;;  %v1692_v37 = vshll.u32 %v4638_v29, %v1686_v31  ;;  %v1695_v44 = vshll.u32 %v4639_v32, %v1686_v31 }
 0x79b   :  { %v1698_v53 = vshll.u32 %v4640_v35, %v1686_v31  ;;  %v1701_v56 = vshll.u32 %v4641_v38, %v1686_v31  ;;  %vm1704_vm13 = vcmp.lt.s32.totalorder %v1685_v34, 1  ;;  %vm1707_vm14 = vcmp.lt.s32.totalorder %v1685_v34, 4 }
 0x79c   :  { %v1690_v40 = vshrl.u32 %v4638_v29, %v1687_v16  ;;  %v1693_v30 = vshrl.u32 %v4639_v32, %v1687_v16  ;;  %v1696_v50 = vshrl.u32 %v4640_v35, %v1687_v16  ;;  %v1699_v54 = vshrl.u32 %v4641_v38, %v1687_v16 }
 0x79d   :  { %v1702_v58 = vshrl.u32 %v4642_v41, %v1687_v16  ;;  %v1688_v4 = vshrl.u32 %v4637_v27, %v1687_v16  ;;  %vm1706_vm15 = vcmp.lt.s32.totalorder %v1685_v34, 3  ;;  %vm1705_vm4 = vcmp.lt.s32.totalorder %v1685_v34, 2 }
 0x79e   :  { %v1691_v63 = vor.u32 %v1690_v40, %v1689_v36  ;;  %v1694_v6 = vor.u32 %v1693_v30, %v1692_v37  ;;  %v1697_v1 = vor.u32 %v1696_v50, %v1695_v44  ;;  %v1700_v39 = vor.u32 %v1699_v54, %v1698_v53 }
 0x79f   :  { %v1703_v10 = vor.u32 %v1702_v58, %v1701_v56  ;;  %v1651_v37 = vmul.f32 %v5200_v12, %v5200_v12 }
 0x7a0   :  { %v1709_v2 = vsel %vm1707_vm14, %v1697_v1, 2102212464  ;;  %v1712_v8 = vsel %vm1704_vm13, %v1691_v63, %v1694_v6  ;;  %v1716_v3 = vsel %vm1704_vm13, %v1694_v6, %v1697_v1  ;;  %v1713_v11 = vsel %vm1707_vm14, %v1700_v39, 920167782 }
 0x7a1   :  { %v1717_v14 = vsel %vm1707_vm14, %v1703_v10, 1326507024  ;;  %v1714_v33 = vsel %vm1706_vm15, %v1697_v1, %v1713_v11  ;;  %v1708_v19 = vsel %vm1704_vm13, %v1688_v4, %v1691_v63  ;;  %v1710_v17 = vsel %vm1706_vm15, %v1694_v6, %v1709_v2 }
 0x7a2   :  { %v1718_v43 = vsel %vm1706_vm15, %v1700_v39, %v1717_v14  ;;  %v1715_v61 = vsel %vm1705_vm4, %v1712_v8, %v1714_v33  ;;  %v1711_v31 = vsel %vm1705_vm4, %v1708_v19, %v1710_v17  ;;  %v1652_v44 = vadd.f32 1.0, %v1651_v37 }
 0x7a3   :  { %v1719_v23 = vsel %vm1705_vm4, %v1716_v3, %v1718_v43  ;;  %v5229_v26 = vmul.u32.u64.low %v1720_v51, %v1715_v61  ;;  %v5230_v28 = vmul.u32.u64.high %v1720_v51, %v1715_v61, %v5229_v26  ;;  %v1727_v16 = vmul.u32 %v1720_v51, %v1711_v31 }
 0x7a4   :  { %v5226_v24 = vmul.u32.u64.low %v1720_v51, %v1719_v23  ;;  %v5227_v25 = vmul.u32.u64.high %v1720_v51, %v1719_v23, %v5226_v24  ;;  %4526 = vrsqrt.f32 %v1652_v44 }
 0x7a5   :  { %v1730_v9 = vadd.s32 1, %v5230_v28 }
 0x7a6   :  { %vm1729_vm5 = vc.u32 %v5227_v25, %v5229_v26  ;;  %v1728_v6 = vadd.s32 %v5229_v26, %v5227_v25 }
 0x7a7   :  { %v1731_v34 = vsel %vm1729_vm5, %v1730_v9, %v5230_v28  ;;  %vm1764_vm5 = vweird.f32 %v5209_v18 }
 0x7a8   :  { %v1732_v36 = vadd.s32 %v1731_v34, %v1727_v16  ;;  %v1658_v16 = vmul.f32 0.5, %v5200_v12 }
 0x7aa   :  { %v1733_v40 = vadd.s32 536870912, %v1732_v36 }
 0x7ac   :  { %v1734_v30 = vshrl.u32 %v1733_v40, 30 }
 0x7ae   :  { %v1735_v50 = vshll.u32 %v1734_v30, 30  ;;  %v1758_v23 = vsub.s32 4, %v1734_v30 }
 0x7b0   :  { %v1736_v53 = vsub.s32 %v1732_v36, %v1735_v50  ;;  %v1759_v26 = vsel %vm1674_vm7, %v1758_v23, %v1734_v30 }
 0x7b1   :  { %v4527_v3 = vpop.eup %4526  ;;  %v1761_v28 = vsel %vm1673_vm10, 0, %v1759_v26 }
 0x7b2   :  { %v1738_v54 = vsub.s32 0, %v1736_v53  ;;  %v1654_v14 = vadd.f32 1.0, %v4527_v3  ;;  %v1868_v31 = vadd.s32 3, %v1761_v28  ;;  %v1765_v34 = vand.u32 3, %v1761_v28 }
 0x7b3   :  { %v1659_v40 = vmul.f32 %v4527_v3, %v1658_v16 }
 0x7b4   :  { %v4208_v56 = vmin.u32 %v1738_v54, %v1736_v53  ;;  %v1655_v19 = vmul.f32 0.5, %v1654_v14  ;;  %v1869_v36 = vand.u32 3, %v1868_v31  ;;  %vm1770_vm11 = vcmp.eq.s32.totalorder %v1765_v34, 2 }
 0x7b5   :  { %vm1767_vm13 = vcmp.eq.s32.totalorder %v1765_v34, 0  ;;  %vm1766_vm15 = vcmp.lt.s32.totalorder %v1765_v34, 2 }
 0x7b6   :  { %v1740_v58 = vclz %v4208_v56  ;;  %4528 = vrsqrt.f32 %v1655_v19  ;;  %vm1874_vm12 = vcmp.eq.s32.totalorder %v1869_v36, 2  ;;  %vm1871_vm14 = vcmp.eq.s32.totalorder %v1869_v36, 0 }
 0x7b7   :  { %vm1870_vm4 = vcmp.lt.s32.totalorder %v1869_v36, 2 }
 0x7b8   :  { %v4209_v62 = vadd.s32 4294967294, %v1740_v58 }
 0x7ba   :  { %vm4210_vm6 = vcmp.lt.s32.totalorder %v4209_v62, 0 }
 0x7bb   :  { %v1743_v63 = vsel %vm4210_vm6, 0, %v4209_v62 }
 0x7bc   :  { %v1744_v1 = vsub.s32 32, %v1743_v63  ;;  %v1748_v39 = vsub.s32 4294967266, %v1743_v63  ;;  %v1745_v10 = vshll.u32 %v1736_v53, %v1743_v63 }
 0x7be   :  { %v1746_v2 = vshrl.u32 %v1728_v6, %v1744_v1  ;;  %v1749_v8 = vadd.s32 127, %v1748_v39 }
 0x7c0   :  { %v1747_v4 = vor.u32 %v1746_v2, %v1745_v10  ;;  %v1750_v11 = vshll.u32 %v1749_v8, 23 }
 0x7c2   :  { %v1751_v33 = vor.u32 4788187, %v1750_v11  ;;  %v1754_v51 = vcvt.s32.f32 %v1747_v4 }
 0x7c3   :  { %v4529_v9 = vpop.eup %4528 }
 0x7c4   :  { %v1752_v43 = vand.u32 2147483647, %v1751_v33  ;;  %v1657_v50 = vmul.f32 %v4529_v9, %v1655_v19  ;;  %v1660_v54 = vmul.f32 %v4529_v9, %v1659_v40 }
 0x7c6   :  { %v1755_v17 = vmul.f32 %v1754_v51, %v1752_v43  ;;  %v1890_v2 = vrot.slane %v1657_v50, %v4751_v5  ;;  %v1895_v8 = vrot.slane %v1660_v54, %v4751_v5 }
 0x7c8   :  { %v1756_v61 = vxor.u32 2147483648, %v1755_v17 }
 0x7ca   :  { %v1757_v24 = vsel %vm1674_vm7, %v1756_v61, %v1755_v17 }
 0x7cb   :  { %v1760_v25 = vsel %vm1673_vm10, %v5209_v18, %v1757_v24 }
 0x7cc   :  { %4530 = vcosq.f32 %v1760_v25 }
 0x7cd   :  { %4532 = vsinq.f32 %v1760_v25 }
 0x7d9   :  { %v4531_v37 = vpop.eup %4530 }
 0x7da   :  { %v4533_v44 = vpop.eup %4532  ;;  %v1771_v53 = vxor.u32 2147483648, %v4531_v37 }
 0x7db   :  { %v1768_v22 = vxor.u32 2147483648, %v4533_v44 }
 0x7dc   :  { %v1772_v56 = vsel %vm1770_vm11, %v1771_v53, %v4533_v44  ;;  %v1876_v30 = vsel %vm1874_vm12, %v1771_v53, %v4533_v44 }
 0x7dd   :  { %v1769_v58 = vsel %vm1767_vm13, %v4531_v37, %v1768_v22  ;;  %v1873_v62 = vsel %vm1871_vm14, %v4531_v37, %v1768_v22 }
 0x7de   :  { %v1773_v12 = vsel %vm1766_vm15, %v1769_v58, %v1772_v56  ;;  %v1877_v63 = vsel %vm1870_vm4, %v1873_v62, %v1876_v30 }
 0x7df   :  { %v1774_v6 = vsel %vm1764_vm5, nan, %v1773_v12  ;;  %v1878_v1 = vsel %vm1764_vm5, nan, %v1877_v63 }
 0x7e0   :  { %v1879_v39 = vsub.f32 0.0, %v1878_v1  ;;  %v1881_v10 = vmul.f32 0.70710677, %v1774_v6 }
 0x7e2   :  { %v1883_v3 = vmul.f32 0.70710677, %v1879_v39  ;;  %v1885_v4 = vsub.f32 0.0, %v1879_v39  ;;  %v1891_v11 = vmul.f32 %v1890_v2, %v1881_v10  ;;  %v1896_v14 = vmul.f32 %v1895_v8, %v1881_v10 }
 0x7e4   :  { %v1886_v33 = vmul.f32 0.70710677, %v1885_v4  ;;  %v1897_v43 = vsub.f32 %v1891_v11, %v1896_v14  ;;  %v1903_v51 = vadd.f32 %v1896_v14, %v1891_v11  ;;  %v1904_v19 = vmul.f32 %v1895_v8, %v1883_v3 }
 0x7e5   :  { %v1898_v17 = vmul.f32 %v1890_v2, %v1883_v3 }
 0x7e6   :  { %v1899_v18 = vmul.f32 %v1895_v8, %v1886_v33  ;;  %v1905_v61 = vmul.f32 %v1890_v2, %v1886_v33  ;;  %v1911_v23 = vmul.f32 %v1897_v43, %v1895_v8  ;;  %v1917_v24 = vmul.f32 %v1903_v51, %v1895_v8 }
 0x7e7   :  { %v1907_v28 = vmul.f32 %v1897_v43, %v1890_v2  ;;  %v1913_v31 = vmul.f32 %v1903_v51, %v1890_v2 }
 0x7e8   :  { %v1900_v25 = vsub.f32 %v1898_v17, %v1899_v18  ;;  %v1906_v26 = vadd.f32 %v1905_v61, %v1904_v19 }
 0x7ea   :  { %v1908_v9 = vmul.f32 %v1900_v25, %v1895_v8  ;;  %v1910_v16 = vmul.f32 %v1900_v25, %v1890_v2  ;;  %v1914_v34 = vmul.f32 %v1906_v26, %v1895_v8  ;;  %v1916_v36 = vmul.f32 %v1906_v26, %v1890_v2 }
 0x7ec   :  { %v1909_v37 = vadd.f32 %v1908_v9, %v1907_v28  ;;  %v1912_v40 = vsub.f32 %v1910_v16, %v1911_v23  ;;  %v1915_v44 = vsub.f32 %v1913_v31, %v1914_v34  ;;  %v1918_v50 = vadd.f32 %v1917_v24, %v1916_v36 }
 0x7ee   :  { %v1919_v53 = vmul.f32 %v5057_v21, %v1909_v37  ;;  %v1920_v54 = vmul.f32 %v5063_v20, %v1918_v50  ;;  %v1922_v22 = vmul.f32 %v5057_v21, %v1912_v40  ;;  %v1923_v56 = vmul.f32 %v5063_v20, %v1915_v44 }
 0x7ef   :  { %v1925_v30 = vmul.f32 %v5063_v20, %v1912_v40  ;;  %v1926_v58 = vmul.f32 %v5057_v21, %v1915_v44  ;;  %v1928_v62 = vmul.f32 %v5057_v21, %v1918_v50  ;;  %v1929_v12 = vmul.f32 %v5063_v20, %v1909_v37 }
 0x7f0   :  { %v1921_v63 = vadd.f32 %v1920_v54, %v1919_v53  ;;  %v1924_v6 = vsub.f32 %v1922_v22, %v1923_v56 }
 0x7f1   :  { %v1927_v1 = vadd.f32 %v1926_v58, %v1925_v30  ;;  %v1930_v39 = vsub.f32 %v1928_v62, %v1929_v12 }
 0x7f2   :  { %v1931_v10 = vmul.f32 %v5075_v15, %v1921_v63  ;;  %v1934_v2 = vmul.f32 %v5075_v15, %v1924_v6  ;;  %v1937_v8 = vmul.f32 %v5082_v47, %v1921_v63  ;;  %v1940_v3 = vmul.f32 %v5082_v47, %v1924_v6 }
 0x7f3   :  { %v1932_v4 = vmul.f32 %v5082_v47, %v1927_v1  ;;  %v1935_v11 = vmul.f32 %v5082_v47, %v1930_v39  ;;  %v1938_v14 = vmul.f32 %v5075_v15, %v1927_v1  ;;  %v1941_v33 = vmul.f32 %v5075_v15, %v1930_v39 }
 0x7f5   :  { %v1933_v43 = vsub.f32 %v1931_v10, %v1932_v4  ;;  %v1936_v51 = vsub.f32 %v1934_v2, %v1935_v11  ;;  %v1939_v19 = vadd.f32 %v1938_v14, %v1937_v8  ;;  %v1942_v17 = vadd.f32 %v1941_v33, %v1940_v3 }
 0x7f7   :  { %v1943_v18 = vmul.f32 %v5093_v49, %v1933_v43  ;;  %v1944_v61 = vmul.f32 %v5099_v48, %v1936_v51  ;;  %v1946_v23 = vmul.f32 %v5093_v49, %v1936_v51  ;;  %v1947_v24 = vmul.f32 %v5099_v48, %v1933_v43 }
 0x7f8   :  { %v1949_v25 = vmul.f32 %v5093_v49, %v1939_v19  ;;  %v1950_v26 = vmul.f32 %v5099_v48, %v1942_v17  ;;  %v1952_v28 = vmul.f32 %v5093_v49, %v1942_v17  ;;  %v1953_v31 = vmul.f32 %v5099_v48, %v1939_v19 }
 0x7f9   :  { %v1945_v9 = vadd.f32 %v1944_v61, %v1943_v18  ;;  %v1948_v16 = vsub.f32 %v1946_v23, %v1947_v24 }
 0x7fa   :  { %v1951_v34 = vsub.f32 %v1949_v25, %v1950_v26  ;;  %v1954_v36 = vadd.f32 %v1953_v31, %v1952_v28 }
 0x7fb   :  { %v1955_v37 = vmul.f32 %v5057_v21, %v1945_v9  ;;  %v1958_v40 = vmul.f32 %v5057_v21, %v1948_v16  ;;  %v1961_v44 = vmul.f32 %v5063_v20, %v1948_v16  ;;  %v1965_v50 = vmul.f32 %v5063_v20, %v1945_v9 }
 0x7fc   :  { %v1956_v53 = vmul.f32 %v5063_v20, %v1954_v36  ;;  %v1959_v54 = vmul.f32 %v5063_v20, %v1951_v34  ;;  %v1962_v22 = vmul.f32 %v5057_v21, %v1951_v34  ;;  %v1964_v56 = vmul.f32 %v5057_v21, %v1954_v36 }
 0x7fe   :  { %v1957_v30 = vadd.f32 %v1956_v53, %v1955_v37  ;;  %v1960_v58 = vsub.f32 %v1958_v40, %v1959_v54  ;;  %v1963_v62 = vadd.f32 %v1962_v22, %v1961_v44  ;;  %v1966_v12 = vsub.f32 %v1964_v56, %v1965_v50 }
 0x800   :  { %v1967_v63 = vmul.f32 %v5075_v15, %v1957_v30  ;;  %v1968_v6 = vmul.f32 %v5082_v47, %v1963_v62  ;;  %v1970_v1 = vmul.f32 %v5075_v15, %v1960_v58  ;;  %v1971_v39 = vmul.f32 %v5082_v47, %v1966_v12 }
 0x801   :  { %v1973_v10 = vmul.f32 %v5082_v47, %v1957_v30  ;;  %v1974_v20 = vmul.f32 %v5075_v15, %v1963_v62  ;;  %v1976_v2 = vmul.f32 %v5082_v47, %v1960_v58  ;;  %v1977_v21 = vmul.f32 %v5075_v15, %v1966_v12 }
 0x802   :  { %v1969_v8 = vsub.f32 %v1967_v63, %v1968_v6  ;;  %v1972_v3 = vsub.f32 %v1970_v1, %v1971_v39 }
 0x803   :  { %v1975_v4 = vadd.f32 %v1974_v20, %v1973_v10  ;;  %v1978_v11 = vadd.f32 %v1977_v21, %v1976_v2 }
 0x804   :  { %v1979_v14 = vmul.f32 %v5093_v49, %v1969_v8  ;;  %v1980_v33 = vmul.f32 %v5099_v48, %v1972_v3  ;;  %v1982_v43 = vmul.f32 %v5093_v49, %v1972_v3  ;;  %v1983_v51 = vmul.f32 %v5099_v48, %v1969_v8 }
 0x805   :  { %v1985_v19 = vmul.f32 %v5093_v49, %v1975_v4  ;;  %v1986_v17 = vmul.f32 %v5099_v48, %v1978_v11  ;;  %v1988_v47 = vmul.f32 %v5093_v49, %v1978_v11  ;;  %v1989_v15 = vmul.f32 %v5099_v48, %v1975_v4 }
 0x806   :  { %v1981_v18 = vadd.f32 %v1980_v33, %v1979_v14  ;;  %v1984_v61 = vsub.f32 %v1982_v43, %v1983_v51 }
 0x807   :  { %v1987_v23 = vsub.f32 %v1985_v19, %v1986_v17  ;;  %v1990_v24 = vadd.f32 %v1989_v15, %v1988_v47 }
 0x808   :  { %v1991_v25 = vmul.f32 %v1981_v18, %v1981_v18  ;;  %v1992_v26 = vmul.f32 %v1984_v61, %v1984_v61 }
 0x809   :  { %v1994_v28 = vmul.f32 %v1987_v23, %v1987_v23  ;;  %v1995_v31 = vmul.f32 %v1990_v24, %v1990_v24 }
 0x80a   :  { %v1993_v9 = vadd.f32 %v1992_v26, %v1991_v25 }
 0x80b   :  { %v1996_v16 = vadd.f32 %v1995_v31, %v1994_v28 }
 0x80d   :  { %v1997_v34 = vsub.f32 %v1993_v9, %v1996_v16 }
 0x80f   :  { %v1998_v36 = vmul.f32 %v5135_v42, %v1997_v34 }
 0x811   :  { %4384 = vmatmul.mubr.msk.f32.vlgmr.msra.gmra.mxu1 %vm453_vm8, %v1998_v36 }
 0x812   :  { %4387 = vmatpush3.msra.mxu1 %v5142_v45  ;;  %4394 = vmatprep.mubr.msk.f32.mxu1 %vm4636_vm0, %v4635_v0 }
 0x813   :  { %4388 = vmatprep.subr.mxu1 %v4635_v0 }
 0x814   :  { %4389 = vmatpush3.msra.mxu1 %v5151_v60 }
 0x815   :  { %4390 = vmatprep.subr.mxu1 %v4635_v0 }
 0x816   :  { %4391 = vmatpush3.msra.mxu1 %v5158_v59 }
 0x817   :  { %4392 = vmatprep.subr.mxu1 %v4635_v0 }
 0x818   :  { %4393 = vmatpush3.msra.mxu1 %v5165_v46 }
 0x819   :  { %4413 = vmatprep.subr.mxu1 %v4635_v0 }
 0x8d1   :  { %v2068_v49 = vpop.f32.mrf.mxu1 }
 0x8d2   :  { %v2069_v48 = vadd.f32 %v5172_v52, %v2068_v49 }
 0x8d3   :  { %v4385_v42 = vpop.f32.mrf.mxu1 }
 0x8d4   :  { %4534 = vtanh.f32 %v2069_v48 }
 0x8e1   :  { %v4535_v45 = vpop.eup %4534 }
 0x8e2   :  { %v2073_v37 = vmul.f32 %v5178_v57, %v4535_v45  ;;  %v5317_v57 = vld [vmem:[%s5924_s1 + $0x58] sm:$0xff] }
 0x8e4   :  { %v2074_v60 = vadd.f32 %v5184_v13, %v2073_v37  ;;  %v4217_v13 = vld [vmem:[%s5925_s0 + $0x8] sm:$0x3] }
 0x8e6   :  { %v2077_v40 = vrot.slane %v2074_v60, 2  ;;  %v2075_v59 = vmul.f32 %v2074_v60, %v5188_v7 }
 0x8e8   :  { %v2079_v44 = vmul.f32 %v2077_v40, %v2074_v60 }
 0x8ea   :  { %v2081_v50 = vrot.slane %v2079_v44, 2 }
 0x8ec   :  { %v5310_v53 = vadd.f32 %v2081_v50, %v2075_v59 }
 0x8ee   :  { %4536 = vtanh.f32 %v5310_v53 }
 0x8fb   :  { %v4537_v46 = vpop.eup %4536 }
 0x8fc   :  { %v2086_v54 = vrot.slane %v4537_v46, 2 }
 0x8fe   :  { %v2088_v22 = vmul.f32 %v2086_v54, %v2074_v60 }
 0x900   :  { %v2092_v52 = vrot.slane %v2088_v22, 6 }
 0x902   :  { %4395 = vmatmul.mubr.msk.f32.vlgmr.msra.gmra.mxu1 %vm28_vm9, %v2092_v52 }
 0x903   :  { %4414 = vmatpush3.msk.msra.mxu1 %vm121_vm1, %v5317_v57  ;;  %4415 = vmatprep.mubr.msk.f32.mxu1 %vm4636_vm0, %v4635_v0 }
 0x904   :  { %4418 = vmatprep.subr.mxu1 %v4635_v0 }
 0x9c2   :  { %v2161_v7 = vpop.f32.mrf.mxu1 }
 0x9c3   :  { %v5327_v56 = vadd.f32 %v4217_v13, %v2161_v7 }
 0x9c4   :  { %v4396_v30 = vpop.f32.mrf.mxu1 }
 0x9c5   :  { %v2176_v58 = vrot.slane %v5327_v56, 6  ;;  %v2178_v62 = vrot.slane %v5327_v56, 4  ;;  %v2180_v12 = vrot.slane %v5327_v56, 2 }
 0x9c7   :  { %v2182_v63 = vsel %vm119_vm2, %v5327_v56, %v2176_v58 }
 0x9c8   :  { %v2183_v6 = vsel %vm121_vm1, %v2182_v63, %v2178_v62  ;;  %v2165_v63 = vmul.f32 %v5327_v56, %v5327_v56 }
 0x9c9   :  { %v2184_v1 = vsel %vm123_vm3, %v2183_v6, %v2180_v12 }
 0x9ca   :  { %v5336_v39 = vmul.f32 0.5, %v2184_v1 }
 0x9cc   :  { %v2189_v10 = vand.u32 2139095040, %v5336_v39  ;;  %v2186_v8 = vand.u32 2147483647, %v5336_v39  ;;  %vm2188_vm15 = vcmp.lt.s32.totalorder %v5336_v39, 0 }
 0x9ce   :  { %v2190_v20 = vshrl.u32 %v2189_v10, 23  ;;  %v2193_v11 = vand.u32 8388607, %v2186_v8  ;;  %v2166_v10 = vadd.f32 1.0, %v2165_v63  ;;  %vm2187_vm4 = vcmp.le.f32.partialorder %v2186_v8, 0.7853982 }
 0x9d0   :  { %v4219_v2 = vadd.s32 4294967169, %v2190_v20  ;;  %v2194_v25 = vor.u32 8388608, %v2193_v11  ;;  %4538 = vrsqrt.f32 %v2166_v10 }
 0x9d2   :  { %v2196_v21 = vadd.s32 1, %v4219_v2  ;;  %v2234_v40 = vshll.u32 %v2194_v25, 8 }
 0x9d4   :  { %vm2197_vm6 = vcmp.gt.s32.totalorder %v2196_v21, 0 }
 0x9d5   :  { %v2198_v3 = vsel %vm2197_vm6, %v2196_v21, 0 }
 0x9d6   :  { %v2200_v4 = vand.u32 31, %v2198_v3  ;;  %v2199_v33 = vshrl.u32 %v2198_v3, 5 }
 0x9d8   :  { %v2201_v14 = vsub.s32 32, %v2200_v4  ;;  %v2203_v43 = vshll.u32 %v4637_v27, %v2200_v4  ;;  %v2206_v51 = vshll.u32 %v4638_v29, %v2200_v4  ;;  %v2209_v47 = vshll.u32 %v4639_v32, %v2200_v4 }
 0x9d9   :  { %v2212_v18 = vshll.u32 %v4640_v35, %v2200_v4  ;;  %v2215_v23 = vshll.u32 %v4641_v38, %v2200_v4  ;;  %vm2218_vm7 = vcmp.lt.s32.totalorder %v2199_v33, 1  ;;  %vm2221_vm10 = vcmp.lt.s32.totalorder %v2199_v33, 4 }
 0x9da   :  { %v2204_v19 = vshrl.u32 %v4638_v29, %v2201_v14  ;;  %v2207_v17 = vshrl.u32 %v4639_v32, %v2201_v14  ;;  %v2210_v15 = vshrl.u32 %v4640_v35, %v2201_v14  ;;  %v2213_v61 = vshrl.u32 %v4641_v38, %v2201_v14 }
 0x9db   :  { %v2216_v24 = vshrl.u32 %v4642_v41, %v2201_v14  ;;  %v2202_v48 = vshrl.u32 %v4637_v27, %v2201_v14  ;;  %vm2220_vm11 = vcmp.lt.s32.totalorder %v2199_v33, 3  ;;  %vm2219_vm12 = vcmp.lt.s32.totalorder %v2199_v33, 2 }
 0x9dc   :  { %v2205_v26 = vor.u32 %v2204_v19, %v2203_v43  ;;  %v2208_v28 = vor.u32 %v2207_v17, %v2206_v51  ;;  %v2211_v31 = vor.u32 %v2210_v15, %v2209_v47  ;;  %v2214_v9 = vor.u32 %v2213_v61, %v2212_v18 }
 0x9dd   :  { %v2217_v16 = vor.u32 %v2216_v24, %v2215_v23  ;;  %v4539_v15 = vpop.eup %4538 }
 0x9de   :  { %v2223_v34 = vsel %vm2221_vm10, %v2211_v31, 2102212464  ;;  %v2226_v36 = vsel %vm2218_vm7, %v2205_v26, %v2208_v28  ;;  %v2230_v49 = vsel %vm2218_vm7, %v2208_v28, %v2211_v31  ;;  %v2227_v42 = vsel %vm2221_vm10, %v2214_v9, 920167782 }
 0x9df   :  { %v2231_v45 = vsel %vm2221_vm10, %v2217_v16, 1326507024  ;;  %v2228_v37 = vsel %vm2220_vm11, %v2211_v31, %v2227_v42  ;;  %v2222_v44 = vsel %vm2218_vm7, %v2202_v48, %v2205_v26  ;;  %v2224_v59 = vsel %vm2220_vm11, %v2208_v28, %v2223_v34 }
 0x9e0   :  { %v2232_v60 = vsel %vm2220_vm11, %v2214_v9, %v2231_v45  ;;  %v2229_v50 = vsel %vm2219_vm12, %v2226_v36, %v2228_v37  ;;  %v2225_v7 = vsel %vm2219_vm12, %v2222_v44, %v2224_v59  ;;  %v2168_v23 = vadd.f32 1.0, %v4539_v15 }
 0x9e1   :  { %v2233_v46 = vsel %vm2219_vm12, %v2230_v49, %v2232_v60  ;;  %v5356_v52 = vmul.u32.u64.low %v2234_v40, %v2229_v50  ;;  %v5357_v13 = vmul.u32.u64.high %v2234_v40, %v2229_v50, %v5356_v52  ;;  %v2241_v58 = vmul.u32 %v2234_v40, %v2225_v7 }
 0x9e2   :  { %v5353_v54 = vmul.u32.u64.low %v2234_v40, %v2233_v46  ;;  %v5354_v22 = vmul.u32.u64.high %v2234_v40, %v2233_v46, %v5353_v54  ;;  %v2169_v28 = vmul.f32 0.5, %v2168_v23  ;;  %v2172_v37 = vmul.f32 0.5, %v5327_v56 }
 0x9e3   :  { %v2244_v30 = vadd.s32 1, %v5357_v13 }
 0x9e4   :  { %vm2243_vm13 = vc.u32 %v5354_v22, %v5356_v52  ;;  %v2242_v33 = vadd.s32 %v5356_v52, %v5354_v22  ;;  %4540 = vrsqrt.f32 %v2169_v28  ;;  %v2173_v59 = vmul.f32 %v4539_v15, %v2172_v37 }
 0x9e5   :  { %v2245_v62 = vsel %vm2243_vm13, %v2244_v30, %v5357_v13  ;;  %vm2278_vm13 = vweird.f32 %v5336_v39 }
 0x9e6   :  { %v2246_v12 = vadd.s32 %v2245_v62, %v2241_v58 }
 0x9e8   :  { %v2247_v6 = vadd.s32 536870912, %v2246_v12 }
 0x9ea   :  { %v2248_v1 = vshrl.u32 %v2247_v6, 30 }
 0x9ec   :  { %v2249_v20 = vshll.u32 %v2248_v1, 30  ;;  %v2272_v16 = vsub.s32 4, %v2248_v1 }
 0x9ee   :  { %v2250_v2 = vsub.s32 %v2246_v12, %v2249_v20  ;;  %v2273_v49 = vsel %vm2188_vm15, %v2272_v16, %v2248_v1 }
 0x9ef   :  { %v2275_v48 = vsel %vm2187_vm4, 0, %v2273_v49  ;;  %v5382_v49 = vld [vmem:[%s5924_s1 + $0x18] sm:$0xff] }
 0x9f0   :  { %v2252_v21 = vsub.s32 0, %v2250_v2  ;;  %v2382_v42 = vadd.s32 3, %v2275_v48  ;;  %v2279_v60 = vand.u32 3, %v2275_v48 }
 0x9f1   :  { %v4541_v45 = vpop.eup %4540 }
 0x9f2   :  { %v4220_v3 = vmin.u32 %v2252_v21, %v2250_v2  ;;  %v2383_v40 = vand.u32 3, %v2382_v42  ;;  %v2171_v46 = vmul.f32 %v4541_v45, %v2169_v28  ;;  %v2174_v22 = vmul.f32 %v4541_v45, %v2173_v59 }
 0x9f3   :  { %vm2284_vm5 = vcmp.eq.s32.totalorder %v2279_v60, 2  ;;  %vm2281_vm7 = vcmp.eq.s32.totalorder %v2279_v60, 0  ;;  %vm2280_vm11 = vcmp.lt.s32.totalorder %v2279_v60, 2 }
 0x9f4   :  { %v2254_v4 = vclz %v4220_v3  ;;  %vm2388_vm6 = vcmp.eq.s32.totalorder %v2383_v40, 2  ;;  %vm2385_vm10 = vcmp.eq.s32.totalorder %v2383_v40, 0  ;;  %vm2384_vm12 = vcmp.lt.s32.totalorder %v2383_v40, 2 }
 0x9f5   :  { %v2404_v1 = vrot.slane %v2171_v46, %v4751_v5  ;;  %v2409_v10 = vrot.slane %v2174_v22, %v4751_v5  ;;  %v5394_v22 = vld [vmem:[%s5924_s1 + $0x8] sm:$0xff] }
 0x9f6   :  { %v4221_v11 = vadd.s32 4294967294, %v2254_v4 }
 0x9f8   :  { %vm4222_vm14 = vcmp.lt.s32.totalorder %v4221_v11, 0 }
 0x9f9   :  { %v2257_v14 = vsel %vm4222_vm14, 0, %v4221_v11 }
 0x9fa   :  { %v2258_v43 = vsub.s32 32, %v2257_v14  ;;  %v2262_v51 = vsub.s32 4294967266, %v2257_v14  ;;  %v2259_v19 = vshll.u32 %v2250_v2, %v2257_v14 }
 0x9fc   :  { %v2260_v17 = vshrl.u32 %v2242_v33, %v2258_v43  ;;  %v2263_v47 = vadd.s32 127, %v2262_v51 }
 0x9fe   :  { %v2261_v18 = vor.u32 %v2260_v17, %v2259_v19  ;;  %v2264_v61 = vshll.u32 %v2263_v47, 23 }
 0xa00   :  { %v2265_v24 = vor.u32 4788187, %v2264_v61  ;;  %v2268_v26 = vcvt.s32.f32 %v2261_v18 }
 0xa02   :  { %v2266_v25 = vand.u32 2147483647, %v2265_v24 }
 0xa04   :  { %v2269_v31 = vmul.f32 %v2268_v26, %v2266_v25 }
 0xa06   :  { %v2270_v9 = vxor.u32 2147483648, %v2269_v31 }
 0xa08   :  { %v2271_v34 = vsel %vm2188_vm15, %v2270_v9, %v2269_v31 }
 0xa09   :  { %v2274_v36 = vsel %vm2187_vm4, %v5336_v39, %v2271_v34  ;;  %v5376_v34 = vld [vmem:[%s5924_s1] sm:$0xff] }
 0xa0a   :  { %4542 = vcosq.f32 %v2274_v36 }
 0xa0b   :  { %4544 = vsinq.f32 %v2274_v36 }
 0xa17   :  { %v4543_v44 = vpop.eup %4542 }
 0xa18   :  { %v4545_v50 = vpop.eup %4544  ;;  %v2285_v54 = vxor.u32 2147483648, %v4543_v44 }
 0xa19   :  { %v2282_v8 = vxor.u32 2147483648, %v4545_v50 }
 0xa1a   :  { %v2286_v52 = vsel %vm2284_vm5, %v2285_v54, %v4545_v50  ;;  %v2390_v13 = vsel %vm2388_vm6, %v2285_v54, %v4545_v50 }
 0xa1b   :  { %v2283_v7 = vsel %vm2281_vm7, %v4543_v44, %v2282_v8  ;;  %v2387_v30 = vsel %vm2385_vm10, %v4543_v44, %v2282_v8 }
 0xa1c   :  { %v2287_v56 = vsel %vm2280_vm11, %v2283_v7, %v2286_v52  ;;  %v2391_v58 = vsel %vm2384_vm12, %v2387_v30, %v2390_v13  ;;  %v5401_v13 = vld [vmem:[%s5924_s1 + $0x20] sm:$0xff] }
 0xa1d   :  { %v2288_v62 = vsel %vm2278_vm13, nan, %v2287_v56  ;;  %v2392_v12 = vsel %vm2278_vm13, nan, %v2391_v58 }
 0xa1e   :  { %v2393_v63 = vsub.f32 0.0, %v2392_v12  ;;  %v2395_v6 = vmul.f32 0.70710677, %v2288_v62 }
 0xa20   :  { %v2397_v20 = vmul.f32 0.70710677, %v2393_v63  ;;  %v2399_v2 = vsub.f32 0.0, %v2393_v63  ;;  %v2405_v21 = vmul.f32 %v2404_v1, %v2395_v6  ;;  %v2410_v3 = vmul.f32 %v2409_v10, %v2395_v6 }
 0xa22   :  { %v2400_v4 = vmul.f32 0.70710677, %v2399_v2  ;;  %v2411_v11 = vsub.f32 %v2405_v21, %v2410_v3  ;;  %v2417_v14 = vadd.f32 %v2410_v3, %v2405_v21  ;;  %v2418_v33 = vmul.f32 %v2409_v10, %v2397_v20  ;;  %v5418_v21 = vld [vmem:[%s5924_s1 + $0x28] sm:$0xff] }
 0xa23   :  { %v2412_v43 = vmul.f32 %v2404_v1, %v2397_v20  ;;  %v5412_v20 = vld [vmem:[%s5924_s1 + $0x10] sm:$0xff] }
 0xa24   :  { %v2413_v39 = vmul.f32 %v2409_v10, %v2400_v4  ;;  %v2419_v51 = vmul.f32 %v2404_v1, %v2400_v4  ;;  %v2425_v19 = vmul.f32 %v2411_v11, %v2409_v10  ;;  %v2431_v17 = vmul.f32 %v2417_v14, %v2409_v10 }
 0xa25   :  { %v2421_v18 = vmul.f32 %v2411_v11, %v2404_v1  ;;  %v2427_v61 = vmul.f32 %v2417_v14, %v2404_v1 }
 0xa26   :  { %v2414_v47 = vsub.f32 %v2412_v43, %v2413_v39  ;;  %v2420_v15 = vadd.f32 %v2419_v51, %v2418_v33 }
 0xa28   :  { %v2422_v23 = vmul.f32 %v2414_v47, %v2409_v10  ;;  %v2424_v24 = vmul.f32 %v2414_v47, %v2404_v1  ;;  %v2428_v25 = vmul.f32 %v2420_v15, %v2409_v10  ;;  %v2430_v26 = vmul.f32 %v2420_v15, %v2404_v1 }
 0xa2a   :  { %v2423_v28 = vadd.f32 %v2422_v23, %v2421_v18  ;;  %v2426_v31 = vsub.f32 %v2424_v24, %v2425_v19  ;;  %v2429_v9 = vsub.f32 %v2427_v61, %v2428_v25  ;;  %v2432_v16 = vadd.f32 %v2431_v17, %v2430_v26 }
 0xa2c   :  { %v2433_v36 = vmul.f32 %v5376_v34, %v2423_v28  ;;  %v2434_v48 = vmul.f32 %v5382_v49, %v2432_v16  ;;  %v2436_v42 = vmul.f32 %v5376_v34, %v2426_v31  ;;  %v2437_v45 = vmul.f32 %v5382_v49, %v2429_v9 }
 0xa2d   :  { %v2439_v37 = vmul.f32 %v5382_v49, %v2426_v31  ;;  %v2440_v60 = vmul.f32 %v5376_v34, %v2429_v9  ;;  %v2442_v40 = vmul.f32 %v5376_v34, %v2432_v16  ;;  %v2443_v44 = vmul.f32 %v5382_v49, %v2423_v28 }
 0xa2e   :  { %v2435_v59 = vadd.f32 %v2434_v48, %v2433_v36  ;;  %v2438_v50 = vsub.f32 %v2436_v42, %v2437_v45 }
 0xa2f   :  { %v2441_v46 = vadd.f32 %v2440_v60, %v2439_v37  ;;  %v2444_v54 = vsub.f32 %v2442_v40, %v2443_v44 }
 0xa30   :  { %v2445_v8 = vmul.f32 %v5394_v22, %v2435_v59  ;;  %v2448_v52 = vmul.f32 %v5394_v22, %v2438_v50  ;;  %v2451_v7 = vmul.f32 %v5401_v13, %v2435_v59  ;;  %v2454_v30 = vmul.f32 %v5401_v13, %v2438_v50 }
 0xa31   :  { %v2446_v56 = vmul.f32 %v5401_v13, %v2441_v46  ;;  %v2449_v58 = vmul.f32 %v5401_v13, %v2444_v54  ;;  %v2452_v62 = vmul.f32 %v5394_v22, %v2441_v46  ;;  %v2455_v12 = vmul.f32 %v5394_v22, %v2444_v54 }
 0xa33   :  { %v2447_v63 = vsub.f32 %v2445_v8, %v2446_v56  ;;  %v2450_v6 = vsub.f32 %v2448_v52, %v2449_v58  ;;  %v2453_v1 = vadd.f32 %v2452_v62, %v2451_v7  ;;  %v2456_v10 = vadd.f32 %v2455_v12, %v2454_v30 }
 0xa35   :  { %v2457_v2 = vmul.f32 %v5412_v20, %v2447_v63  ;;  %v2458_v3 = vmul.f32 %v5418_v21, %v2450_v6  ;;  %v2460_v4 = vmul.f32 %v5412_v20, %v2450_v6  ;;  %v2461_v11 = vmul.f32 %v5418_v21, %v2447_v63 }
 0xa36   :  { %v2463_v14 = vmul.f32 %v5412_v20, %v2453_v1  ;;  %v2464_v33 = vmul.f32 %v5418_v21, %v2456_v10  ;;  %v2466_v43 = vmul.f32 %v5412_v20, %v2456_v10  ;;  %v2467_v39 = vmul.f32 %v5418_v21, %v2453_v1 }
 0xa37   :  { %v2459_v51 = vadd.f32 %v2458_v3, %v2457_v2  ;;  %v2462_v19 = vsub.f32 %v2460_v4, %v2461_v11 }
 0xa38   :  { %v2465_v17 = vsub.f32 %v2463_v14, %v2464_v33  ;;  %v2468_v47 = vadd.f32 %v2467_v39, %v2466_v43 }
 0xa39   :  { %v2469_v15 = vmul.f32 %v5376_v34, %v2459_v51  ;;  %v2472_v18 = vmul.f32 %v5376_v34, %v2462_v19  ;;  %v2475_v61 = vmul.f32 %v5382_v49, %v2462_v19  ;;  %v2479_v23 = vmul.f32 %v5382_v49, %v2459_v51  ;;  %v5454_v51 = vld [vmem:[%s5924_s1 + $0x30] sm:$0xff] }
 0xa3a   :  { %v2470_v24 = vmul.f32 %v5382_v49, %v2468_v47  ;;  %v2473_v25 = vmul.f32 %v5382_v49, %v2465_v17  ;;  %v2476_v26 = vmul.f32 %v5376_v34, %v2465_v17  ;;  %v2478_v28 = vmul.f32 %v5376_v34, %v2468_v47  ;;  %v5461_v17 = vld [vmem:[%s5924_s1 + $0x50] sm:$0xff]  ;;  %v5470_v47 = vld [vmem:[%s5924_s1 + $0x48] sm:$0xff] }
 0xa3c   :  { %v2471_v31 = vadd.f32 %v2470_v24, %v2469_v15  ;;  %v2474_v9 = vsub.f32 %v2472_v18, %v2473_v25  ;;  %v2477_v16 = vadd.f32 %v2476_v26, %v2475_v61  ;;  %v2480_v36 = vsub.f32 %v2478_v28, %v2479_v23  ;;  %v5477_v15 = vld [vmem:[%s5924_s1 + $0x40] sm:$0xff]  ;;  %v5484_v18 = vld [vmem:[%s5924_s1 + $0x38] sm:$0xff]  ;;  %v5497_v28 = vld [vmem:[%s5924_s1 + $0x68] sm:$0xff] }
 0xa3d   :  { %v5491_v23 = vld [vmem:[%s5924_s1 + $0x60] sm:$0xff] }
 0xa3e   :  { %v2481_v48 = vmul.f32 %v5394_v22, %v2471_v31  ;;  %v2482_v42 = vmul.f32 %v5401_v13, %v2477_v16  ;;  %v2484_v45 = vmul.f32 %v5394_v22, %v2474_v9  ;;  %v2485_v37 = vmul.f32 %v5401_v13, %v2480_v36 }
 0xa3f   :  { %v2487_v60 = vmul.f32 %v5401_v13, %v2471_v31  ;;  %v2488_v40 = vmul.f32 %v5394_v22, %v2477_v16  ;;  %v2490_v44 = vmul.f32 %v5401_v13, %v2474_v9  ;;  %v2491_v59 = vmul.f32 %v5394_v22, %v2480_v36  ;;  %v5503_v9 = vld [vmem:[%s5924_s1 + $0x70] sm:$0xff] }
 0xa40   :  { %v2483_v50 = vsub.f32 %v2481_v48, %v2482_v42  ;;  %v2486_v46 = vsub.f32 %v2484_v45, %v2485_v37 }
 0xa41   :  { %v2489_v54 = vadd.f32 %v2488_v40, %v2487_v60  ;;  %v2492_v8 = vadd.f32 %v2491_v59, %v2490_v44 }
 0xa42   :  { %v2493_v52 = vmul.f32 %v5412_v20, %v2483_v50  ;;  %v2494_v7 = vmul.f32 %v5418_v21, %v2486_v46  ;;  %v2496_v30 = vmul.f32 %v5412_v20, %v2486_v46  ;;  %v2497_v56 = vmul.f32 %v5418_v21, %v2483_v50 }
 0xa43   :  { %v2499_v58 = vmul.f32 %v5412_v20, %v2489_v54  ;;  %v2500_v62 = vmul.f32 %v5418_v21, %v2492_v8  ;;  %v2502_v12 = vmul.f32 %v5412_v20, %v2492_v8  ;;  %v2503_v63 = vmul.f32 %v5418_v21, %v2489_v54 }
 0xa44   :  { %v2495_v6 = vadd.f32 %v2494_v7, %v2493_v52  ;;  %v2498_v1 = vsub.f32 %v2496_v30, %v2497_v56 }
 0xa45   :  { %v2501_v10 = vsub.f32 %v2499_v58, %v2500_v62  ;;  %v2504_v2 = vadd.f32 %v2503_v63, %v2502_v12 }
 0xa46   :  { %v2505_v3 = vmul.f32 %v2495_v6, %v2495_v6  ;;  %v2506_v4 = vmul.f32 %v2498_v1, %v2498_v1 }
 0xa47   :  { %v2508_v11 = vmul.f32 %v2501_v10, %v2501_v10  ;;  %v2509_v14 = vmul.f32 %v2504_v2, %v2504_v2 }
 0xa48   :  { %v2507_v33 = vadd.f32 %v2506_v4, %v2505_v3 }
 0xa49   :  { %v2510_v43 = vadd.f32 %v2509_v14, %v2508_v11 }
 0xa4b   :  { %v2511_v39 = vsub.f32 %v2507_v33, %v2510_v43 }
 0xa4d   :  { %v2512_v19 = vmul.f32 %v5454_v51, %v2511_v39 }
 0xa4f   :  { %4400 = vmatmul.mubr.msk.f32.vlgmr.msra.gmra.mxu0 %vm453_vm8, %v2512_v19 }
 0xa50   :  { %4403 = vmatpush3.msra.mxu0 %v5461_v17  ;;  %4410 = vmatprep.mubr.msk.f32.mxu0 %vm4636_vm0, %v4635_v0 }
 0xa51   :  { %4404 = vmatprep.subr.mxu0 %v4635_v0 }
 0xa52   :  { %4405 = vmatpush3.msra.mxu0 %v5470_v47 }
 0xa53   :  { %4406 = vmatprep.subr.mxu0 %v4635_v0 }
 0xa54   :  { %4407 = vmatpush3.msra.mxu0 %v5477_v15 }
 0xa55   :  { %4408 = vmatprep.subr.mxu0 %v4635_v0 }
 0xa56   :  { %4409 = vmatpush3.msra.mxu0 %v5484_v18 }
 0xa57   :  { %4429 = vmatprep.subr.mxu0 %v4635_v0 }
 0xb0f   :  { %v2582_v61 = vpop.f32.mrf.mxu0 }
 0xb10   :  { %v2583_v24 = vadd.f32 %v5491_v23, %v2582_v61 }
 0xb11   :  { %v4401_v25 = vpop.f32.mrf.mxu0 }
 0xb12   :  { %4546 = vtanh.f32 %v2583_v24 }
 0xb1f   :  { %v4547_v26 = vpop.eup %4546 }
 0xb20   :  { %v2587_v31 = vmul.f32 %v5497_v28, %v4547_v26 }
 0xb22   :  { %v2588_v16 = vadd.f32 %v5503_v9, %v2587_v31 }
 0xb24   :  { %v2591_v36 = vrot.slane %v2588_v16, 2  ;;  %v2589_v42 = vmul.f32 %v2588_v16, %v5310_v53  ;;  %v4229_v53 = vld [vmem:[%s5925_s0 + $0xa] sm:$0x3] }
 0xb26   :  { %v2593_v48 = vmul.f32 %v2591_v36, %v2588_v16 }
 0xb28   :  { %v2595_v45 = vrot.slane %v2593_v48, 2 }
 0xb2a   :  { %v5507_v37 = vadd.f32 %v2595_v45, %v2589_v42 }
 0xb2c   :  { %4548 = vtanh.f32 %v5507_v37 }
 0xb39   :  { %v4549_v60 = vpop.eup %4548 }
 0xb3a   :  { %v2600_v40 = vrot.slane %v4549_v60, 2 }
 0xb3c   :  { %v2602_v44 = vmul.f32 %v2600_v40, %v2588_v16 }
 0xb3e   :  { %v2606_v59 = vrot.slane %v2602_v44, 6 }
 0xb40   :  { %4411 = vmatmul.mubr.msk.f32.vlgmr.msra.gmra.mxu0 %vm28_vm9, %v2606_v59 }
 0xb41   :  { %4430 = vmatpush3.msk.msra.mxu0 %vm121_vm1, %v5317_v57  ;;  %4431 = vmatprep.mubr.msk.f32.mxu0 %vm4636_vm0, %v4635_v0 }
 0xb42   :  { %4434 = vmatprep.subr.mxu0 %v4635_v0 }
 0xc00   :  { %v2675_v50 = vpop.f32.mrf.mxu0 }
 0xc01   :  { %v5519_v46 = vadd.f32 %v4229_v53, %v2675_v50 }
 0xc02   :  { %v4412_v54 = vpop.f32.mrf.mxu0 }
 0xc03   :  { %v2690_v8 = vrot.slane %v5519_v46, 6  ;;  %v2692_v52 = vrot.slane %v5519_v46, 4  ;;  %v2694_v7 = vrot.slane %v5519_v46, 2 }
 0xc05   :  { %v2696_v57 = vsel %vm119_vm2, %v5519_v46, %v2690_v8 }
 0xc06   :  { %v2697_v30 = vsel %vm121_vm1, %v2696_v57, %v2692_v52 }
 0xc07   :  { %v2698_v56 = vsel %vm123_vm3, %v2697_v30, %v2694_v7 }
 0xc08   :  { %v5528_v58 = vmul.f32 0.5, %v2698_v56 }
 0xc0a   :  { %v2703_v62 = vand.u32 2139095040, %v5528_v58  ;;  %v2700_v1 = vand.u32 2147483647, %v5528_v58  ;;  %vm2702_vm11 = vcmp.lt.s32.totalorder %v5528_v58, 0 }
 0xc0c   :  { %v2704_v12 = vshrl.u32 %v2703_v62, 23  ;;  %v2707_v3 = vand.u32 8388607, %v2700_v1  ;;  %vm2701_vm12 = vcmp.le.f32.partialorder %v2700_v1, 0.7853982 }
 0xc0e   :  { %v4231_v63 = vadd.s32 4294967169, %v2704_v12  ;;  %v2708_v16 = vor.u32 8388608, %v2707_v3 }
 0xc10   :  { %v2710_v6 = vadd.s32 1, %v4231_v63  ;;  %v2748_v7 = vshll.u32 %v2708_v16, 8 }
 0xc12   :  { %vm2711_vm14 = vcmp.gt.s32.totalorder %v2710_v6, 0 }
 0xc13   :  { %v2712_v10 = vsel %vm2711_vm14, %v2710_v6, 0 }
 0xc14   :  { %v2714_v2 = vand.u32 31, %v2712_v10  ;;  %v2713_v11 = vshrl.u32 %v2712_v10, 5 }
 0xc16   :  { %v2715_v4 = vsub.s32 32, %v2714_v2  ;;  %v2717_v14 = vshll.u32 %v4637_v27, %v2714_v2  ;;  %v2720_v33 = vshll.u32 %v4638_v29, %v2714_v2  ;;  %v2723_v19 = vshll.u32 %v4639_v32, %v2714_v2 }
 0xc17   :  { %v2726_v24 = vshll.u32 %v4640_v35, %v2714_v2  ;;  %v2729_v26 = vshll.u32 %v4641_v38, %v2714_v2  ;;  %vm2732_vm15 = vcmp.lt.s32.totalorder %v2713_v11, 1  ;;  %vm2735_vm4 = vcmp.lt.s32.totalorder %v2713_v11, 4 }
 0xc18   :  { %v2718_v43 = vshrl.u32 %v4638_v29, %v2715_v4  ;;  %v2721_v39 = vshrl.u32 %v4639_v32, %v2715_v4  ;;  %v2724_v61 = vshrl.u32 %v4640_v35, %v2715_v4  ;;  %v2727_v25 = vshrl.u32 %v4641_v38, %v2715_v4 }
 0xc19   :  { %v2730_v31 = vshrl.u32 %v4642_v41, %v2715_v4  ;;  %v2716_v53 = vshrl.u32 %v4637_v27, %v2715_v4  ;;  %vm2734_vm5 = vcmp.lt.s32.totalorder %v2713_v11, 3  ;;  %vm2733_vm6 = vcmp.lt.s32.totalorder %v2713_v11, 2 }
 0xc1a   :  { %v2719_v36 = vor.u32 %v2718_v43, %v2717_v14  ;;  %v2722_v48 = vor.u32 %v2721_v39, %v2720_v33  ;;  %v2725_v42 = vor.u32 %v2724_v61, %v2723_v19  ;;  %v2728_v45 = vor.u32 %v2727_v25, %v2726_v24 }
 0xc1b   :  { %v2731_v60 = vor.u32 %v2730_v31, %v2729_v26  ;;  %v2679_v33 = vmul.f32 %v5519_v46, %v5519_v46 }
 0xc1c   :  { %v2737_v40 = vsel %vm2735_vm4, %v2725_v42, 2102212464  ;;  %v2740_v44 = vsel %vm2732_vm15, %v2719_v36, %v2722_v48  ;;  %v2744_v59 = vsel %vm2732_vm15, %v2722_v48, %v2725_v42  ;;  %v2741_v50 = vsel %vm2735_vm4, %v2728_v45, 920167782 }
 0xc1d   :  { %v2745_v54 = vsel %vm2735_vm4, %v2731_v60, 1326507024  ;;  %v2742_v8 = vsel %vm2734_vm5, %v2725_v42, %v2741_v50  ;;  %v2736_v57 = vsel %vm2732_vm15, %v2716_v53, %v2719_v36  ;;  %v2738_v30 = vsel %vm2734_vm5, %v2722_v48, %v2737_v40 }
 0xc1e   :  { %v2746_v52 = vsel %vm2734_vm5, %v2728_v45, %v2745_v54  ;;  %v2743_v56 = vsel %vm2733_vm6, %v2740_v44, %v2742_v8  ;;  %v2739_v2 = vsel %vm2733_vm6, %v2736_v57, %v2738_v30  ;;  %v2680_v19 = vadd.f32 1.0, %v2679_v33 }
 0xc1f   :  { %v2747_v62 = vsel %vm2733_vm6, %v2744_v59, %v2746_v52  ;;  %v5548_v6 = vmul.u32.u64.low %v2748_v7, %v2743_v56  ;;  %v5549_v10 = vmul.u32.u64.high %v2748_v7, %v2743_v56, %v5548_v6  ;;  %v2755_v4 = vmul.u32 %v2748_v7, %v2739_v2 }
 0xc20   :  { %v5545_v12 = vmul.u32.u64.low %v2748_v7, %v2747_v62  ;;  %v5546_v63 = vmul.u32.u64.high %v2748_v7, %v2747_v62, %v5545_v12  ;;  %4550 = vrsqrt.f32 %v2680_v19 }
 0xc21   :  { %v2758_v3 = vadd.s32 1, %v5549_v10 }
 0xc22   :  { %vm2757_vm7 = vc.u32 %v5546_v63, %v5548_v6  ;;  %v2756_v48 = vadd.s32 %v5548_v6, %v5546_v63 }
 0xc23   :  { %v2759_v11 = vsel %vm2757_vm7, %v2758_v3, %v5549_v10  ;;  %vm2792_vm7 = vweird.f32 %v5528_v58 }
 0xc24   :  { %v2760_v14 = vadd.s32 %v2759_v11, %v2755_v4  ;;  %v2686_v4 = vmul.f32 0.5, %v5519_v46 }
 0xc26   :  { %v2761_v43 = vadd.s32 536870912, %v2760_v14 }
 0xc28   :  { %v2762_v39 = vshrl.u32 %v2761_v43, 30 }
 0xc2a   :  { %v2763_v61 = vshll.u32 %v2762_v39, 30  ;;  %v2786_v62 = vsub.s32 4, %v2762_v39 }
 0xc2c   :  { %v2764_v24 = vsub.s32 %v2760_v14, %v2763_v61  ;;  %v2787_v6 = vsel %vm2702_vm11, %v2786_v62, %v2762_v39 }
 0xc2d   :  { %v4551_v59 = vpop.eup %4550  ;;  %v2789_v10 = vsel %vm2701_vm12, 0, %v2787_v6 }
 0xc2e   :  { %v2766_v25 = vsub.s32 0, %v2764_v24  ;;  %v2682_v54 = vadd.f32 1.0, %v4551_v59  ;;  %v2896_v2 = vadd.s32 3, %v2789_v10  ;;  %v2793_v11 = vand.u32 3, %v2789_v10 }
 0xc2f   :  { %v2687_v43 = vmul.f32 %v4551_v59, %v2686_v4 }
 0xc30   :  { %v4232_v26 = vmin.u32 %v2766_v25, %v2764_v24  ;;  %v2683_v57 = vmul.f32 0.5, %v2682_v54  ;;  %v2897_v14 = vand.u32 3, %v2896_v2  ;;  %vm2798_vm13 = vcmp.eq.s32.totalorder %v2793_v11, 2 }
 0xc31   :  { %vm2795_vm15 = vcmp.eq.s32.totalorder %v2793_v11, 0  ;;  %vm2794_vm5 = vcmp.lt.s32.totalorder %v2793_v11, 2 }
 0xc32   :  { %v2768_v31 = vclz %v4232_v26  ;;  %4552 = vrsqrt.f32 %v2683_v57  ;;  %vm2902_vm14 = vcmp.eq.s32.totalorder %v2897_v14, 2  ;;  %vm2899_vm4 = vcmp.eq.s32.totalorder %v2897_v14, 0 }
 0xc33   :  { %vm2898_vm6 = vcmp.lt.s32.totalorder %v2897_v14, 2 }
 0xc34   :  { %v4233_v16 = vadd.s32 4294967294, %v2768_v31 }
 0xc36   :  { %vm4234_vm10 = vcmp.lt.s32.totalorder %v4233_v16, 0 }
 0xc37   :  { %v2771_v36 = vsel %vm4234_vm10, 0, %v4233_v16 }
 0xc38   :  { %v2772_v42 = vsub.s32 32, %v2771_v36  ;;  %v2776_v45 = vsub.s32 4294967266, %v2771_v36  ;;  %v2773_v60 = vshll.u32 %v2764_v24, %v2771_v36 }
 0xc3a   :  { %v2774_v40 = vshrl.u32 %v2756_v48, %v2772_v42  ;;  %v2777_v44 = vadd.s32 127, %v2776_v45 }
 0xc3c   :  { %v2775_v53 = vor.u32 %v2774_v40, %v2773_v60  ;;  %v2778_v50 = vshll.u32 %v2777_v44, 23 }
 0xc3e   :  { %v2779_v8 = vor.u32 4788187, %v2778_v50  ;;  %v2782_v7 = vcvt.s32.f32 %v2775_v53 }
 0xc3f   :  { %v4553_v3 = vpop.eup %4552 }
 0xc40   :  { %v2780_v52 = vand.u32 2147483647, %v2779_v8  ;;  %v2685_v61 = vmul.f32 %v4553_v3, %v2683_v57  ;;  %v2688_v25 = vmul.f32 %v4553_v3, %v2687_v43 }
 0xc42   :  { %v2783_v30 = vmul.f32 %v2782_v7, %v2780_v52  ;;  %v2918_v40 = vrot.slane %v2685_v61, %v4751_v5  ;;  %v2923_v44 = vrot.slane %v2688_v25, %v4751_v5 }
 0xc44   :  { %v2784_v56 = vxor.u32 2147483648, %v2783_v30 }
 0xc46   :  { %v2785_v12 = vsel %vm2702_vm11, %v2784_v56, %v2783_v30 }
 0xc47   :  { %v2788_v63 = vsel %vm2701_vm12, %v5528_v58, %v2785_v12 }
 0xc48   :  { %4554 = vcosq.f32 %v2788_v63 }
 0xc49   :  { %4556 = vsinq.f32 %v2788_v63 }
 0xc55   :  { %v4555_v33 = vpop.eup %4554 }
 0xc56   :  { %v4557_v19 = vpop.eup %4556  ;;  %v2799_v24 = vxor.u32 2147483648, %v4555_v33 }
 0xc57   :  { %v2796_v1 = vxor.u32 2147483648, %v4557_v19 }
 0xc58   :  { %v2800_v26 = vsel %vm2798_vm13, %v2799_v24, %v4557_v19  ;;  %v2904_v39 = vsel %vm2902_vm14, %v2799_v24, %v4557_v19 }
 0xc59   :  { %v2797_v31 = vsel %vm2795_vm15, %v4555_v33, %v2796_v1  ;;  %v2901_v16 = vsel %vm2899_vm4, %v4555_v33, %v2796_v1 }
 0xc5a   :  { %v2801_v46 = vsel %vm2794_vm5, %v2797_v31, %v2800_v26  ;;  %v2905_v36 = vsel %vm2898_vm6, %v2901_v16, %v2904_v39 }
 0xc5b   :  { %v2802_v48 = vsel %vm2792_vm7, nan, %v2801_v46  ;;  %v2906_v42 = vsel %vm2792_vm7, nan, %v2905_v36 }
 0xc5c   :  { %v2907_v45 = vsub.f32 0.0, %v2906_v42  ;;  %v2909_v60 = vmul.f32 0.70710677, %v2802_v48 }
 0xc5e   :  { %v2911_v59 = vmul.f32 0.70710677, %v2907_v45  ;;  %v2913_v53 = vsub.f32 0.0, %v2907_v45  ;;  %v2919_v50 = vmul.f32 %v2918_v40, %v2909_v60  ;;  %v2924_v54 = vmul.f32 %v2923_v44, %v2909_v60 }
 0xc60   :  { %v2914_v8 = vmul.f32 0.70710677, %v2913_v53  ;;  %v2925_v52 = vsub.f32 %v2919_v50, %v2924_v54  ;;  %v2931_v7 = vadd.f32 %v2924_v54, %v2919_v50  ;;  %v2932_v57 = vmul.f32 %v2923_v44, %v2911_v59 }
 0xc61   :  { %v2926_v30 = vmul.f32 %v2918_v40, %v2911_v59 }
 0xc62   :  { %v2927_v58 = vmul.f32 %v2923_v44, %v2914_v8  ;;  %v2933_v56 = vmul.f32 %v2918_v40, %v2914_v8  ;;  %v2939_v62 = vmul.f32 %v2925_v52, %v2923_v44  ;;  %v2945_v12 = vmul.f32 %v2931_v7, %v2923_v44 }
 0xc63   :  { %v2935_v10 = vmul.f32 %v2925_v52, %v2918_v40  ;;  %v2941_v2 = vmul.f32 %v2931_v7, %v2918_v40 }
 0xc64   :  { %v2928_v63 = vsub.f32 %v2926_v30, %v2927_v58  ;;  %v2934_v6 = vadd.f32 %v2933_v56, %v2932_v57 }
 0xc66   :  { %v2936_v3 = vmul.f32 %v2928_v63, %v2923_v44  ;;  %v2938_v4 = vmul.f32 %v2928_v63, %v2918_v40  ;;  %v2942_v11 = vmul.f32 %v2934_v6, %v2923_v44  ;;  %v2944_v14 = vmul.f32 %v2934_v6, %v2918_v40 }
 0xc68   :  { %v2937_v33 = vadd.f32 %v2936_v3, %v2935_v10  ;;  %v2940_v43 = vsub.f32 %v2938_v4, %v2939_v62  ;;  %v2943_v19 = vsub.f32 %v2941_v2, %v2942_v11  ;;  %v2946_v61 = vadd.f32 %v2945_v12, %v2944_v14 }
 0xc6a   :  { %v2947_v24 = vmul.f32 %v5376_v34, %v2937_v33  ;;  %v2948_v25 = vmul.f32 %v5382_v49, %v2946_v61  ;;  %v2950_v1 = vmul.f32 %v5376_v34, %v2940_v43  ;;  %v2951_v26 = vmul.f32 %v5382_v49, %v2943_v19 }
 0xc6b   :  { %v2953_v39 = vmul.f32 %v5382_v49, %v2940_v43  ;;  %v2954_v31 = vmul.f32 %v5376_v34, %v2943_v19  ;;  %v2956_v16 = vmul.f32 %v5376_v34, %v2946_v61  ;;  %v2957_v46 = vmul.f32 %v5382_v49, %v2937_v33 }
 0xc6c   :  { %v2949_v36 = vadd.f32 %v2948_v25, %v2947_v24  ;;  %v2952_v48 = vsub.f32 %v2950_v1, %v2951_v26 }
 0xc6d   :  { %v2955_v42 = vadd.f32 %v2954_v31, %v2953_v39  ;;  %v2958_v45 = vsub.f32 %v2956_v16, %v2957_v46 }
 0xc6e   :  { %v2959_v60 = vmul.f32 %v5394_v22, %v2949_v36  ;;  %v2962_v40 = vmul.f32 %v5394_v22, %v2952_v48  ;;  %v2965_v44 = vmul.f32 %v5401_v13, %v2949_v36  ;;  %v2968_v59 = vmul.f32 %v5401_v13, %v2952_v48 }
 0xc6f   :  { %v2960_v53 = vmul.f32 %v5401_v13, %v2955_v42  ;;  %v2963_v50 = vmul.f32 %v5401_v13, %v2958_v45  ;;  %v2966_v54 = vmul.f32 %v5394_v22, %v2955_v42  ;;  %v2969_v8 = vmul.f32 %v5394_v22, %v2958_v45 }
 0xc71   :  { %v2961_v52 = vsub.f32 %v2959_v60, %v2960_v53  ;;  %v2964_v7 = vsub.f32 %v2962_v40, %v2963_v50  ;;  %v2967_v57 = vadd.f32 %v2966_v54, %v2965_v44  ;;  %v2970_v30 = vadd.f32 %v2969_v8, %v2968_v59 }
 0xc73   :  { %v2971_v58 = vmul.f32 %v5412_v20, %v2961_v52  ;;  %v2972_v56 = vmul.f32 %v5418_v21, %v2964_v7  ;;  %v2974_v62 = vmul.f32 %v5412_v20, %v2964_v7  ;;  %v2975_v12 = vmul.f32 %v5418_v21, %v2961_v52 }
 0xc74   :  { %v2977_v63 = vmul.f32 %v5412_v20, %v2967_v57  ;;  %v2978_v6 = vmul.f32 %v5418_v21, %v2970_v30  ;;  %v2980_v10 = vmul.f32 %v5412_v20, %v2970_v30  ;;  %v2981_v2 = vmul.f32 %v5418_v21, %v2967_v57 }
 0xc75   :  { %v2973_v3 = vadd.f32 %v2972_v56, %v2971_v58  ;;  %v2976_v4 = vsub.f32 %v2974_v62, %v2975_v12 }
 0xc76   :  { %v2979_v11 = vsub.f32 %v2977_v63, %v2978_v6  ;;  %v2982_v14 = vadd.f32 %v2981_v2, %v2980_v10 }
 0xc77   :  { %v2983_v33 = vmul.f32 %v5376_v34, %v2973_v3  ;;  %v2986_v43 = vmul.f32 %v5376_v34, %v2976_v4  ;;  %v2989_v19 = vmul.f32 %v5382_v49, %v2976_v4  ;;  %v2993_v61 = vmul.f32 %v5382_v49, %v2973_v3 }
 0xc78   :  { %v2984_v24 = vmul.f32 %v5382_v49, %v2982_v14  ;;  %v2987_v25 = vmul.f32 %v5382_v49, %v2979_v11  ;;  %v2990_v1 = vmul.f32 %v5376_v34, %v2979_v11  ;;  %v2992_v26 = vmul.f32 %v5376_v34, %v2982_v14 }
 0xc7a   :  { %v2985_v39 = vadd.f32 %v2984_v24, %v2983_v33  ;;  %v2988_v31 = vsub.f32 %v2986_v43, %v2987_v25  ;;  %v2991_v16 = vadd.f32 %v2990_v1, %v2989_v19  ;;  %v2994_v46 = vsub.f32 %v2992_v26, %v2993_v61 }
 0xc7c   :  { %v2995_v36 = vmul.f32 %v5394_v22, %v2985_v39  ;;  %v2996_v48 = vmul.f32 %v5401_v13, %v2991_v16  ;;  %v2998_v42 = vmul.f32 %v5394_v22, %v2988_v31  ;;  %v2999_v45 = vmul.f32 %v5401_v13, %v2994_v46 }
 0xc7d   :  { %v3001_v60 = vmul.f32 %v5401_v13, %v2985_v39  ;;  %v3002_v49 = vmul.f32 %v5394_v22, %v2991_v16  ;;  %v3004_v40 = vmul.f32 %v5401_v13, %v2988_v31  ;;  %v3005_v34 = vmul.f32 %v5394_v22, %v2994_v46 }
 0xc7e   :  { %v2997_v44 = vsub.f32 %v2995_v36, %v2996_v48  ;;  %v3000_v59 = vsub.f32 %v2998_v42, %v2999_v45 }
 0xc7f   :  { %v3003_v53 = vadd.f32 %v3002_v49, %v3001_v60  ;;  %v3006_v50 = vadd.f32 %v3005_v34, %v3004_v40 }
 0xc80   :  { %v3007_v54 = vmul.f32 %v5412_v20, %v2997_v44  ;;  %v3008_v8 = vmul.f32 %v5418_v21, %v3000_v59  ;;  %v3010_v52 = vmul.f32 %v5412_v20, %v3000_v59  ;;  %v3011_v7 = vmul.f32 %v5418_v21, %v2997_v44 }
 0xc81   :  { %v3013_v57 = vmul.f32 %v5412_v20, %v3003_v53  ;;  %v3014_v30 = vmul.f32 %v5418_v21, %v3006_v50  ;;  %v3016_v13 = vmul.f32 %v5412_v20, %v3006_v50  ;;  %v3017_v22 = vmul.f32 %v5418_v21, %v3003_v53 }
 0xc82   :  { %v3009_v58 = vadd.f32 %v3008_v8, %v3007_v54  ;;  %v3012_v56 = vsub.f32 %v3010_v52, %v3011_v7 }
 0xc83   :  { %v3015_v62 = vsub.f32 %v3013_v57, %v3014_v30  ;;  %v3018_v12 = vadd.f32 %v3017_v22, %v3016_v13 }
 0xc84   :  { %v3019_v63 = vmul.f32 %v3009_v58, %v3009_v58  ;;  %v3020_v6 = vmul.f32 %v3012_v56, %v3012_v56 }
 0xc85   :  { %v3022_v10 = vmul.f32 %v3015_v62, %v3015_v62  ;;  %v3023_v2 = vmul.f32 %v3018_v12, %v3018_v12 }
 0xc86   :  { %v3021_v3 = vadd.f32 %v3020_v6, %v3019_v63 }
 0xc87   :  { %v3024_v4 = vadd.f32 %v3023_v2, %v3022_v10 }
 0xc89   :  { %v3025_v11 = vsub.f32 %v3021_v3, %v3024_v4 }
 0xc8b   :  { %v3026_v14 = vmul.f32 %v5454_v51, %v3025_v11 }
 0xc8d   :  { %4416 = vmatmul.mubr.msk.f32.vlgmr.msra.gmra.mxu1 %vm453_vm8, %v3026_v14 }
 0xc8e   :  { %4419 = vmatpush3.msra.mxu1 %v5461_v17  ;;  %4426 = vmatprep.mubr.msk.f32.mxu1 %vm4636_vm0, %v4635_v0 }
 0xc8f   :  { %4420 = vmatprep.subr.mxu1 %v4635_v0 }
 0xc90   :  { %4421 = vmatpush3.msra.mxu1 %v5470_v47 }
 0xc91   :  { %4422 = vmatprep.subr.mxu1 %v4635_v0 }
 0xc92   :  { %4423 = vmatpush3.msra.mxu1 %v5477_v15 }
 0xc93   :  { %4424 = vmatprep.subr.mxu1 %v4635_v0 }
 0xc94   :  { %4425 = vmatpush3.msra.mxu1 %v5484_v18 }
 0xc95   :  { %4445 = vmatprep.subr.mxu1 %v4635_v0 }
 0xd4d   :  { %v3096_v20 = vpop.f32.mrf.mxu1 }
 0xd4e   :  { %v3097_v21 = vadd.f32 %v5491_v23, %v3096_v20 }
 0xd4f   :  { %v4417_v51 = vpop.f32.mrf.mxu1 }
 0xd50   :  { %4558 = vtanh.f32 %v3097_v21 }
 0xd5d   :  { %v4559_v17 = vpop.eup %4558 }
 0xd5e   :  { %v3101_v33 = vmul.f32 %v5497_v28, %v4559_v17  ;;  %v4620_v28 = vld [vmem:[%s5924_s1 + $0x58] sm:$0xff] }
 0xd60   :  { %v3102_v47 = vadd.f32 %v5503_v9, %v3101_v33  ;;  %v4241_v9 = vld [vmem:[%s5925_s0 + $0xc] sm:$0x3] }
 0xd62   :  { %v3105_v43 = vrot.slane %v3102_v47, 2  ;;  %v3103_v15 = vmul.f32 %v3102_v47, %v5507_v37 }
 0xd64   :  { %v3107_v19 = vmul.f32 %v3105_v43, %v3102_v47 }
 0xd66   :  { %v3109_v61 = vrot.slane %v3107_v19, 2 }
 0xd68   :  { %v5629_v24 = vadd.f32 %v3109_v61, %v3103_v15 }
 0xd6a   :  { %4560 = vtanh.f32 %v5629_v24 }
 0xd77   :  { %v4561_v18 = vpop.eup %4560 }
 0xd78   :  { %v3114_v25 = vrot.slane %v4561_v18, 2 }
 0xd7a   :  { %v3116_v1 = vmul.f32 %v3114_v25, %v3102_v47 }
 0xd7c   :  { %v3120_v23 = vrot.slane %v3116_v1, 6 }
 0xd7e   :  { %4427 = vmatmul.mubr.msk.f32.vlgmr.msra.gmra.mxu1 %vm28_vm9, %v3120_v23 }
 0xd7f   :  { %4446 = vmatpush3.msk.msra.mxu1 %vm121_vm1, %v4620_v28  ;;  %4447 = vmatprep.mubr.msk.f32.mxu1 %vm4636_vm0, %v4635_v0 }
 0xe3e   :  { %v3189_v37 = vpop.f32.mrf.mxu1 }
 0xe3f   :  { %v5642_v26 = vadd.f32 %v4241_v9, %v3189_v37 }
 0xe40   :  { %v4428_v39 = vpop.f32.mrf.mxu1 }
 0xe41   :  { %v3204_v31 = vrot.slane %v5642_v26, 6  ;;  %v3206_v16 = vrot.slane %v5642_v26, 4  ;;  %v3208_v46 = vrot.slane %v5642_v26, 2 }
 0xe43   :  { %v3210_v36 = vsel %vm119_vm2, %v5642_v26, %v3204_v31 }
 0xe44   :  { %v3211_v48 = vsel %vm121_vm1, %v3210_v36, %v3206_v16 }
 0xe45   :  { %v3212_v42 = vsel %vm123_vm3, %v3211_v48, %v3208_v46  ;;  %v3193_v46 = vmul.f32 %v5642_v26, %v5642_v26 }
 0xe46   :  { %v5651_v45 = vmul.f32 0.5, %v3212_v42 }
 0xe47   :  { %v3194_v42 = vadd.f32 1.0, %v3193_v46 }
 0xe48   :  { %v3217_v60 = vand.u32 2139095040, %v5651_v45  ;;  %v3214_v44 = vand.u32 2147483647, %v5651_v45  ;;  %vm3216_vm5 = vcmp.lt.s32.totalorder %v5651_v45, 0 }
 0xe49   :  { %4562 = vrsqrt.f32 %v3194_v42 }
 0xe4a   :  { %v3218_v49 = vshrl.u32 %v3217_v60, 23  ;;  %v3221_v50 = vand.u32 8388607, %v3214_v44  ;;  %vm3215_vm6 = vcmp.le.f32.partialorder %v3214_v44, 0.7853982 }
 0xe4c   :  { %v4243_v40 = vadd.s32 4294967169, %v3218_v49  ;;  %v3222_v63 = vor.u32 8388608, %v3221_v50 }
 0xe4e   :  { %v3224_v34 = vadd.s32 1, %v4243_v40  ;;  %v3262_v43 = vshll.u32 %v3222_v63, 8 }
 0xe50   :  { %vm3225_vm10 = vcmp.gt.s32.totalorder %v3224_v34, 0 }
 0xe51   :  { %v3226_v59 = vsel %vm3225_vm10, %v3224_v34, 0 }
 0xe52   :  { %v3228_v53 = vand.u32 31, %v3226_v59  ;;  %v3227_v8 = vshrl.u32 %v3226_v59, 5 }
 0xe54   :  { %v3229_v54 = vsub.s32 32, %v3228_v53  ;;  %v3231_v52 = vshll.u32 %v4637_v27, %v3228_v53  ;;  %v3234_v7 = vshll.u32 %v4638_v29, %v3228_v53  ;;  %v3237_v13 = vshll.u32 %v4639_v32, %v3228_v53 }
 0xe55   :  { %v3240_v58 = vshll.u32 %v4640_v35, %v3228_v53  ;;  %v3243_v62 = vshll.u32 %v4641_v38, %v3228_v53  ;;  %vm3246_vm11 = vcmp.lt.s32.totalorder %v3227_v8, 1  ;;  %vm3249_vm12 = vcmp.lt.s32.totalorder %v3227_v8, 4 }
 0xe56   :  { %v3232_v57 = vshrl.u32 %v4638_v29, %v3229_v54  ;;  %v3235_v30 = vshrl.u32 %v4639_v32, %v3229_v54  ;;  %v3238_v22 = vshrl.u32 %v4640_v35, %v3229_v54  ;;  %v3241_v56 = vshrl.u32 %v4641_v38, %v3229_v54 }
 0xe57   :  { %v3244_v12 = vshrl.u32 %v4642_v41, %v3229_v54  ;;  %v3230_v21 = vshrl.u32 %v4637_v27, %v3229_v54  ;;  %vm3248_vm13 = vcmp.lt.s32.totalorder %v3227_v8, 3  ;;  %vm3247_vm14 = vcmp.lt.s32.totalorder %v3227_v8, 2 }
 0xe58   :  { %v3233_v6 = vor.u32 %v3232_v57, %v3231_v52  ;;  %v3236_v10 = vor.u32 %v3235_v30, %v3234_v7  ;;  %v3239_v2 = vor.u32 %v3238_v22, %v3237_v13  ;;  %v3242_v3 = vor.u32 %v3241_v56, %v3240_v58  ;;  %v4563_v13 = vpop.eup %4562 }
 0xe59   :  { %v3245_v4 = vor.u32 %v3244_v12, %v3243_v62  ;;  %v3196_v56 = vadd.f32 1.0, %v4563_v13 }
 0xe5a   :  { %v3251_v11 = vsel %vm3249_vm12, %v3239_v2, 2102212464  ;;  %v3254_v14 = vsel %vm3246_vm11, %v3233_v6, %v3236_v10  ;;  %v3258_v20 = vsel %vm3246_vm11, %v3236_v10, %v3239_v2  ;;  %v3255_v51 = vsel %vm3249_vm12, %v3242_v3, 920167782 }
 0xe5b   :  { %v3259_v17 = vsel %vm3249_vm12, %v3245_v4, 1326507024  ;;  %v3256_v33 = vsel %vm3248_vm13, %v3239_v2, %v3255_v51  ;;  %v3250_v19 = vsel %vm3246_vm11, %v3230_v21, %v3233_v6  ;;  %v3252_v15 = vsel %vm3248_vm13, %v3236_v10, %v3251_v11 }
 0xe5c   :  { %v3260_v47 = vsel %vm3248_vm13, %v3242_v3, %v3259_v17  ;;  %v3257_v61 = vsel %vm3247_vm14, %v3254_v14, %v3256_v33  ;;  %v3253_v9 = vsel %vm3247_vm14, %v3250_v19, %v3252_v15  ;;  %v3197_v6 = vmul.f32 0.5, %v3196_v56 }
 0xe5d   :  { %v3261_v18 = vsel %vm3247_vm14, %v3258_v20, %v3260_v47  ;;  %v5671_v23 = vmul.u32.u64.low %v3262_v43, %v3257_v61  ;;  %v5672_v28 = vmul.u32.u64.high %v3262_v43, %v3257_v61, %v5671_v23  ;;  %v3269_v39 = vmul.u32 %v3262_v43, %v3253_v9 }
 0xe5e   :  { %v5668_v25 = vmul.u32.u64.low %v3262_v43, %v3261_v18  ;;  %v5669_v1 = vmul.u32.u64.high %v3262_v43, %v3261_v18, %v5668_v25  ;;  %4564 = vrsqrt.f32 %v3197_v6  ;;  %v3200_v17 = vmul.f32 0.5, %v5642_v26 }
 0xe5f   :  { %v3272_v37 = vadd.s32 1, %v5672_v28 }
 0xe60   :  { %vm3271_vm15 = vc.u32 %v5669_v1, %v5671_v23  ;;  %v3270_v54 = vadd.s32 %v5671_v23, %v5669_v1  ;;  %v3201_v19 = vmul.f32 %v4563_v13, %v3200_v17 }
 0xe61   :  { %v3273_v31 = vsel %vm3271_vm15, %v3272_v37, %v5672_v28  ;;  %vm3306_vm15 = vweird.f32 %v5651_v45 }
 0xe62   :  { %v3274_v16 = vadd.s32 %v3273_v31, %v3269_v39 }
 0xe64   :  { %v3275_v36 = vadd.s32 536870912, %v3274_v16 }
 0xe66   :  { %v3276_v48 = vshrl.u32 %v3275_v36, 30 }
 0xe68   :  { %v3277_v60 = vshll.u32 %v3276_v48, 30  ;;  %v3300_v3 = vsub.s32 4, %v3276_v48 }
 0xe6a   :  { %v3278_v49 = vsub.s32 %v3274_v16, %v3277_v60  ;;  %v3301_v14 = vsel %vm3216_vm5, %v3300_v3, %v3276_v48  ;;  %v5691_v3 = vld [vmem:[%s5924_s1] sm:$0xff] }
 0xe6b   :  { %v3303_v20 = vsel %vm3215_vm6, 0, %v3301_v14  ;;  %v4565_v51 = vpop.eup %4564 }
 0xe6c   :  { %v3280_v40 = vsub.s32 0, %v3278_v49  ;;  %v3410_v21 = vadd.s32 3, %v3303_v20  ;;  %v3307_v33 = vand.u32 3, %v3303_v20  ;;  %v3199_v61 = vmul.f32 %v4565_v51, %v3197_v6 }
 0xe6d   :  { %v3202_v25 = vmul.f32 %v4565_v51, %v3201_v19 }
 0xe6e   :  { %v4244_v34 = vmin.u32 %v3280_v40, %v3278_v49  ;;  %v3411_v47 = vand.u32 3, %v3410_v21  ;;  %vm3312_vm7 = vcmp.eq.s32.totalorder %v3307_v33, 2  ;;  %vm3309_vm11 = vcmp.eq.s32.totalorder %v3307_v33, 0 }
 0xe6f   :  { %vm3308_vm13 = vcmp.lt.s32.totalorder %v3307_v33, 2  ;;  %v3432_v36 = vrot.slane %v3199_v61, %v4751_v5  ;;  %v3437_v48 = vrot.slane %v3202_v25, %v4751_v5 }
 0xe70   :  { %v3282_v59 = vclz %v4244_v34  ;;  %vm3416_vm10 = vcmp.eq.s32.totalorder %v3411_v47, 2  ;;  %vm3413_vm12 = vcmp.eq.s32.totalorder %v3411_v47, 0  ;;  %vm3412_vm14 = vcmp.lt.s32.totalorder %v3411_v47, 2 }
 0xe72   :  { %v4245_v53 = vadd.s32 4294967294, %v3282_v59 }
 0xe74   :  { %vm4246_vm4 = vcmp.lt.s32.totalorder %v4245_v53, 0 }
 0xe75   :  { %v3285_v50 = vsel %vm4246_vm4, 0, %v4245_v53 }
 0xe76   :  { %v3286_v8 = vsub.s32 32, %v3285_v50  ;;  %v3290_v52 = vsub.s32 4294967266, %v3285_v50  ;;  %v3287_v7 = vshll.u32 %v3278_v49, %v3285_v50 }
 0xe78   :  { %v3288_v57 = vshrl.u32 %v3270_v54, %v3286_v8  ;;  %v3291_v30 = vadd.s32 127, %v3290_v52 }
 0xe7a   :  { %v3289_v22 = vor.u32 %v3288_v57, %v3287_v7  ;;  %v3292_v58 = vshll.u32 %v3291_v30, 23 }
 0xe7c   :  { %v3293_v62 = vor.u32 4788187, %v3292_v58  ;;  %v3296_v63 = vcvt.s32.f32 %v3289_v22 }
 0xe7e   :  { %v3294_v12 = vand.u32 2147483647, %v3293_v62 }
 0xe80   :  { %v3297_v10 = vmul.f32 %v3296_v63, %v3294_v12 }
 0xe82   :  { %v3298_v2 = vxor.u32 2147483648, %v3297_v10 }
 0xe84   :  { %v3299_v4 = vsel %vm3216_vm5, %v3298_v2, %v3297_v10 }
 0xe85   :  { %v3302_v11 = vsel %vm3215_vm6, %v5651_v45, %v3299_v4 }
 0xe86   :  { %4566 = vcosq.f32 %v3302_v11 }
 0xe87   :  { %4568 = vsinq.f32 %v3302_v11  ;;  %v5697_v11 = vld [vmem:[%s5924_s1 + $0x18] sm:$0xff] }
 0xe93   :  { %v4567_v43 = vpop.eup %4566 }
 0xe94   :  { %v4569_v15 = vpop.eup %4568  ;;  %v3313_v18 = vxor.u32 2147483648, %v4567_v43 }
 0xe95   :  { %v3310_v44 = vxor.u32 2147483648, %v4569_v15 }
 0xe96   :  { %v3314_v1 = vsel %vm3312_vm7, %v3313_v18, %v4569_v15  ;;  %v3418_v23 = vsel %vm3416_vm10, %v3313_v18, %v4569_v15  ;;  %v5709_v18 = vld [vmem:[%s5924_s1 + $0x8] sm:$0xff] }
 0xe97   :  { %v3311_v28 = vsel %vm3309_vm11, %v4567_v43, %v3310_v44  ;;  %v3415_v9 = vsel %vm3413_vm12, %v4567_v43, %v3310_v44 }
 0xe98   :  { %v3315_v26 = vsel %vm3308_vm13, %v3311_v28, %v3314_v1  ;;  %v3419_v37 = vsel %vm3412_vm14, %v3415_v9, %v3418_v23  ;;  %v5716_v1 = vld [vmem:[%s5924_s1 + $0x20] sm:$0xff] }
 0xe99   :  { %v3316_v39 = vsel %vm3306_vm15, nan, %v3315_v26  ;;  %v3420_v31 = vsel %vm3306_vm15, nan, %v3419_v37 }
 0xe9a   :  { %v3421_v16 = vsub.f32 0.0, %v3420_v31  ;;  %v3423_v46 = vmul.f32 0.70710677, %v3316_v39 }
 0xe9c   :  { %v3425_v42 = vmul.f32 0.70710677, %v3421_v16  ;;  %v3427_v60 = vsub.f32 0.0, %v3421_v16  ;;  %v3433_v49 = vmul.f32 %v3432_v36, %v3423_v46  ;;  %v3438_v40 = vmul.f32 %v3437_v48, %v3423_v46 }
 0xe9e   :  { %v3428_v34 = vmul.f32 0.70710677, %v3427_v60  ;;  %v3439_v59 = vsub.f32 %v3433_v49, %v3438_v40  ;;  %v3445_v53 = vadd.f32 %v3438_v40, %v3433_v49  ;;  %v3446_v50 = vmul.f32 %v3437_v48, %v3425_v42  ;;  %v5733_v60 = vld [vmem:[%s5924_s1 + $0x28] sm:$0xff] }
 0xe9f   :  { %v3440_v54 = vmul.f32 %v3432_v36, %v3425_v42 }
 0xea0   :  { %v3441_v45 = vmul.f32 %v3437_v48, %v3428_v34  ;;  %v3447_v8 = vmul.f32 %v3432_v36, %v3428_v34  ;;  %v3453_v52 = vmul.f32 %v3439_v59, %v3437_v48  ;;  %v3459_v7 = vmul.f32 %v3445_v53, %v3437_v48 }
 0xea1   :  { %v3449_v13 = vmul.f32 %v3439_v59, %v3432_v36  ;;  %v3455_v22 = vmul.f32 %v3445_v53, %v3432_v36 }
 0xea2   :  { %v3442_v57 = vsub.f32 %v3440_v54, %v3441_v45  ;;  %v3448_v30 = vadd.f32 %v3447_v8, %v3446_v50 }
 0xea4   :  { %v3450_v58 = vmul.f32 %v3442_v57, %v3437_v48  ;;  %v3452_v56 = vmul.f32 %v3442_v57, %v3432_v36  ;;  %v3456_v62 = vmul.f32 %v3448_v30, %v3437_v48  ;;  %v3458_v12 = vmul.f32 %v3448_v30, %v3432_v36  ;;  %v5727_v48 = vld [vmem:[%s5924_s1 + $0x10] sm:$0xff] }
 0xea6   :  { %v3451_v63 = vadd.f32 %v3450_v58, %v3449_v13  ;;  %v3454_v6 = vsub.f32 %v3452_v56, %v3453_v52  ;;  %v3457_v10 = vsub.f32 %v3455_v22, %v3456_v62  ;;  %v3460_v2 = vadd.f32 %v3459_v7, %v3458_v12 }
 0xea8   :  { %v3461_v4 = vmul.f32 %v5691_v3, %v3451_v63  ;;  %v3462_v14 = vmul.f32 %v5697_v11, %v3460_v2  ;;  %v3464_v20 = vmul.f32 %v5691_v3, %v3454_v6  ;;  %v3465_v21 = vmul.f32 %v5697_v11, %v3457_v10 }
 0xea9   :  { %v3467_v51 = vmul.f32 %v5697_v11, %v3454_v6  ;;  %v3468_v17 = vmul.f32 %v5691_v3, %v3457_v10  ;;  %v3470_v33 = vmul.f32 %v5691_v3, %v3460_v2  ;;  %v3471_v47 = vmul.f32 %v5697_v11, %v3451_v63 }
 0xeaa   :  { %v3463_v43 = vadd.f32 %v3462_v14, %v3461_v4  ;;  %v3466_v19 = vsub.f32 %v3464_v20, %v3465_v21 }
 0xeab   :  { %v3469_v15 = vadd.f32 %v3468_v17, %v3467_v51  ;;  %v3472_v61 = vsub.f32 %v3470_v33, %v3471_v47 }
 0xeac   :  { %v3473_v25 = vmul.f32 %v5709_v18, %v3463_v43  ;;  %v3476_v44 = vmul.f32 %v5709_v18, %v3466_v19  ;;  %v3479_v23 = vmul.f32 %v5716_v1, %v3463_v43  ;;  %v3482_v28 = vmul.f32 %v5716_v1, %v3466_v19 }
 0xead   :  { %v3474_v9 = vmul.f32 %v5716_v1, %v3469_v15  ;;  %v3477_v26 = vmul.f32 %v5716_v1, %v3472_v61  ;;  %v3480_v37 = vmul.f32 %v5709_v18, %v3469_v15  ;;  %v3483_v39 = vmul.f32 %v5709_v18, %v3472_v61 }
 0xeaf   :  { %v3475_v31 = vsub.f32 %v3473_v25, %v3474_v9  ;;  %v3478_v16 = vsub.f32 %v3476_v44, %v3477_v26  ;;  %v3481_v46 = vadd.f32 %v3480_v37, %v3479_v23  ;;  %v3484_v36 = vadd.f32 %v3483_v39, %v3482_v28 }
 0xeb1   :  { %v3485_v42 = vmul.f32 %v5727_v48, %v3475_v31  ;;  %v3486_v49 = vmul.f32 %v5733_v60, %v3478_v16  ;;  %v3488_v40 = vmul.f32 %v5727_v48, %v3478_v16  ;;  %v3489_v34 = vmul.f32 %v5733_v60, %v3475_v31 }
 0xeb2   :  { %v3491_v59 = vmul.f32 %v5727_v48, %v3481_v46  ;;  %v3492_v53 = vmul.f32 %v5733_v60, %v3484_v36  ;;  %v3494_v50 = vmul.f32 %v5727_v48, %v3484_v36  ;;  %v3495_v54 = vmul.f32 %v5733_v60, %v3481_v46 }
 0xeb3   :  { %v3487_v45 = vadd.f32 %v3486_v49, %v3485_v42  ;;  %v3490_v8 = vsub.f32 %v3488_v40, %v3489_v34 }
 0xeb4   :  { %v3493_v52 = vsub.f32 %v3491_v59, %v3492_v53  ;;  %v3496_v7 = vadd.f32 %v3495_v54, %v3494_v50  ;;  %v5769_v54 = vld [vmem:[%s5924_s1 + $0x30] sm:$0xff] }
 0xeb5   :  { %v3497_v57 = vmul.f32 %v5691_v3, %v3487_v45  ;;  %v3500_v30 = vmul.f32 %v5691_v3, %v3490_v8  ;;  %v3503_v13 = vmul.f32 %v5697_v11, %v3490_v8  ;;  %v3507_v22 = vmul.f32 %v5697_v11, %v3487_v45  ;;  %v4628_v8 = vld [vmem:[%s5924_s1 + $0x50] sm:$0xff] }
 0xeb6   :  { %v3498_v58 = vmul.f32 %v5697_v11, %v3496_v7  ;;  %v3501_v56 = vmul.f32 %v5697_v11, %v3493_v52  ;;  %v3504_v62 = vmul.f32 %v5691_v3, %v3493_v52  ;;  %v3506_v12 = vmul.f32 %v5691_v3, %v3496_v7  ;;  %v4629_v52 = vld [vmem:[%s5924_s1 + $0x48] sm:$0xff]  ;;  %v4630_v7 = vld [vmem:[%s5924_s1 + $0x40] sm:$0xff] }
 0xeb8   :  { %v3499_v63 = vadd.f32 %v3498_v58, %v3497_v57  ;;  %v3502_v6 = vsub.f32 %v3500_v30, %v3501_v56  ;;  %v3505_v10 = vadd.f32 %v3504_v62, %v3503_v13  ;;  %v3508_v2 = vsub.f32 %v3506_v12, %v3507_v22  ;;  %v4631_v57 = vld [vmem:[%s5924_s1 + $0x38] sm:$0xff]  ;;  %v5793_v13 = vld [vmem:[%s5924_s1 + $0x60] sm:$0xff]  ;;  %v5805_v12 = vld [vmem:[%s5924_s1 + $0x70] sm:$0xff] }
 0xeba   :  { %v3509_v4 = vmul.f32 %v5709_v18, %v3499_v63  ;;  %v3510_v14 = vmul.f32 %v5716_v1, %v3505_v10  ;;  %v3512_v20 = vmul.f32 %v5709_v18, %v3502_v6  ;;  %v3513_v21 = vmul.f32 %v5716_v1, %v3508_v2 }
 0xebb   :  { %v3515_v51 = vmul.f32 %v5716_v1, %v3499_v63  ;;  %v3516_v17 = vmul.f32 %v5709_v18, %v3505_v10  ;;  %v3518_v33 = vmul.f32 %v5716_v1, %v3502_v6  ;;  %v3519_v47 = vmul.f32 %v5709_v18, %v3508_v2 }
 0xebc   :  { %v3511_v43 = vsub.f32 %v3509_v4, %v3510_v14  ;;  %v3514_v19 = vsub.f32 %v3512_v20, %v3513_v21 }
 0xebd   :  { %v3517_v15 = vadd.f32 %v3516_v17, %v3515_v51  ;;  %v3520_v61 = vadd.f32 %v3519_v47, %v3518_v33  ;;  %v4253_v33 = vld [vmem:[%s5925_s0 + $0xe] sm:$0x3] }
 0xebe   :  { %v3521_v25 = vmul.f32 %v5727_v48, %v3511_v43  ;;  %v3522_v44 = vmul.f32 %v5733_v60, %v3514_v19  ;;  %v3524_v23 = vmul.f32 %v5727_v48, %v3514_v19  ;;  %v3525_v28 = vmul.f32 %v5733_v60, %v3511_v43 }
 0xebf   :  { %v3527_v9 = vmul.f32 %v5727_v48, %v3517_v15  ;;  %v3528_v26 = vmul.f32 %v5733_v60, %v3520_v61  ;;  %v3530_v37 = vmul.f32 %v5727_v48, %v3520_v61  ;;  %v3531_v39 = vmul.f32 %v5733_v60, %v3517_v15 }
 0xec0   :  { %v3523_v31 = vadd.f32 %v3522_v44, %v3521_v25  ;;  %v3526_v16 = vsub.f32 %v3524_v23, %v3525_v28 }
 0xec1   :  { %v3529_v46 = vsub.f32 %v3527_v9, %v3528_v26  ;;  %v3532_v36 = vadd.f32 %v3531_v39, %v3530_v37 }
 0xec2   :  { %v3533_v42 = vmul.f32 %v3523_v31, %v3523_v31  ;;  %v3534_v49 = vmul.f32 %v3526_v16, %v3526_v16 }
 0xec3   :  { %v3536_v40 = vmul.f32 %v3529_v46, %v3529_v46  ;;  %v3537_v34 = vmul.f32 %v3532_v36, %v3532_v36 }
 0xec4   :  { %v3535_v59 = vadd.f32 %v3534_v49, %v3533_v42 }
 0xec5   :  { %v3538_v53 = vadd.f32 %v3537_v34, %v3536_v40 }
 0xec7   :  { %v3539_v50 = vsub.f32 %v3535_v59, %v3538_v53 }
 0xec9   :  { %v3540_v45 = vmul.f32 %v5769_v54, %v3539_v50 }
 0xecb   :  { %4432 = vmatmul.mubr.msk.f32.vlgmr.msra.gmra.mxu0 %vm453_vm8, %v3540_v45 }
 0xecc   :  { %4435 = vmatpush3.msra.mxu0 %v4628_v8  ;;  %4442 = vmatprep.mubr.msk.f32.mxu0 %vm4636_vm0, %v4635_v0 }
 0xecd   :  { %4436 = vmatprep.subr.mxu0 %v4635_v0 }
 0xece   :  { %4437 = vmatpush3.msra.mxu0 %v4629_v52 }
 0xecf   :  { %4438 = vmatprep.subr.mxu0 %v4635_v0 }
 0xed0   :  { %4439 = vmatpush3.msra.mxu0 %v4630_v7 }
 0xed1   :  { %4440 = vmatprep.subr.mxu0 %v4635_v0  ;;  %v5799_v0 = vld [vmem:[%s5924_s1 + $0x68] sm:$0xff] }
 0xed2   :  { %4441 = vmatpush3.msra.mxu0 %v4631_v57 }
 0xf8b   :  { %v3610_v30 = vpop.f32.mrf.mxu0 }
 0xf8c   :  { %v3611_v22 = vadd.f32 %v5793_v13, %v3610_v30 }
 0xf8d   :  { %v4433_v58 = vpop.f32.mrf.mxu0 }
 0xf8e   :  { %4570 = vtanh.f32 %v3611_v22 }
 0xf9b   :  { %v4571_v56 = vpop.eup %4570 }
 0xf9c   :  { %v3615_v62 = vmul.f32 %v5799_v0, %v4571_v56 }
 0xf9e   :  { %v3616_v63 = vadd.f32 %v5805_v12, %v3615_v62 }
 0xfa0   :  { %v3619_v6 = vrot.slane %v3616_v63, 2  ;;  %v3617_v2 = vmul.f32 %v3616_v63, %v5629_v24 }
 0xfa2   :  { %v3621_v10 = vmul.f32 %v3619_v6, %v3616_v63 }
 0xfa4   :  { %v3623_v4 = vrot.slane %v3621_v10, 2 }
 0xfa6   :  { %v5809_v14 = vadd.f32 %v3623_v4, %v3617_v2 }
 0xfa8   :  { %4572 = vtanh.f32 %v5809_v14 }
 0xfb5   :  { %v4573_v20 = vpop.eup %4572 }
 0xfb6   :  { %v3628_v21 = vrot.slane %v4573_v20, 2 }
 0xfb8   :  { %v3630_v51 = vmul.f32 %v3628_v21, %v3616_v63 }
 0xfba   :  { %v3634_v17 = vrot.slane %v3630_v51, 6 }
 0xfbc   :  { %4443 = vmatmul.mubr.msk.f32.vlgmr.msra.gmra.mxu0 %vm28_vm9, %v3634_v17 }
0x107c   :  { %v3703_v47 = vpop.f32.mrf.mxu0 }
0x107d   :  { %v5816_v43 = vadd.f32 %v4253_v33, %v3703_v47 }
0x107e   :  { %v4444_v19 = vpop.f32.mrf.mxu0 }
0x107f   :  { %v3718_v24 = vrot.slane %v5816_v43, 6  ;;  %v3720_v15 = vrot.slane %v5816_v43, 4  ;;  %v3722_v61 = vrot.slane %v5816_v43, 2 }
0x1081   :  { %v3724_v25 = vsel %vm119_vm2, %v5816_v43, %v3718_v24 }
0x1082   :  { %v3725_v44 = vsel %vm121_vm1, %v3724_v25, %v3720_v15 }
0x1083   :  { %v3726_v23 = vsel %vm123_vm3, %v3725_v44, %v3722_v61 }
0x1084   :  { %v5825_v28 = vmul.f32 0.5, %v3726_v23  ;;  %v3707_v23 = vmul.f32 %v5816_v43, %v5816_v43 }
0x1086   :  { %v3731_v9 = vand.u32 2139095040, %v5825_v28  ;;  %v3728_v31 = vand.u32 2147483647, %v5825_v28  ;;  %vm3730_vm6 = vcmp.lt.s32.totalorder %v5825_v28, 0 }
0x1088   :  { %v3732_v26 = vshrl.u32 %v3731_v9, 23  ;;  %v3735_v36 = vand.u32 8388607, %v3728_v31  ;;  %vm3729_vm7 = vcmp.le.f32.partialorder %v3728_v31, 0.7853982 }
0x108a   :  { %v4255_v37 = vadd.s32 4294967169, %v3732_v26  ;;  %v3736_v30 = vor.u32 8388608, %v3735_v36 }
0x108c   :  { %v3738_v39 = vadd.s32 1, %v4255_v37  ;;  %v3708_v37 = vadd.f32 1.0, %v3707_v23 }
0x108e   :  { %vm3739_vm0 = vcmp.gt.s32.totalorder %v3738_v39, 0  ;;  %4574 = vrsqrt.f32 %v3708_v37 }
0x108f   :  { %v3740_v16 = vsel %vm3739_vm0, %v3738_v39, 0  ;;  %vm3820_vm0 = vweird.f32 %v5825_v28 }
0x1090   :  { %v3742_v46 = vand.u32 31, %v3740_v16  ;;  %v3741_v49 = vshrl.u32 %v3740_v16, 5 }
0x1092   :  { %v3743_v42 = vsub.s32 32, %v3742_v46  ;;  %v3745_v40 = vshll.u32 %v4637_v27, %v3742_v46  ;;  %v3748_v34 = vshll.u32 %v4638_v29, %v3742_v46  ;;  %v3751_v50 = vshll.u32 %v4639_v32, %v3742_v46 }
0x1093   :  { %v3754_v8 = vshll.u32 %v4640_v35, %v3742_v46  ;;  %v3757_v7 = vshll.u32 %v4641_v38, %v3742_v46  ;;  %vm3760_vm1 = vcmp.lt.s32.totalorder %v3741_v49, 1  ;;  %vm3763_vm2 = vcmp.lt.s32.totalorder %v3741_v49, 4 }
0x1094   :  { %v3746_v59 = vshrl.u32 %v4638_v29, %v3743_v42  ;;  %v3749_v53 = vshrl.u32 %v4639_v32, %v3743_v42  ;;  %v3752_v45 = vshrl.u32 %v4640_v35, %v3743_v42  ;;  %v3755_v52 = vshrl.u32 %v4641_v38, %v3743_v42 }
0x1095   :  { %v3758_v57 = vshrl.u32 %v4642_v41, %v3743_v42  ;;  %v3744_v10 = vshrl.u32 %v4637_v27, %v3743_v42  ;;  %vm3762_vm3 = vcmp.lt.s32.totalorder %v3741_v49, 3  ;;  %vm3761_vm9 = vcmp.lt.s32.totalorder %v3741_v49, 2 }
0x1096   :  { %v3747_v22 = vor.u32 %v3746_v59, %v3745_v40  ;;  %v3750_v58 = vor.u32 %v3749_v53, %v3748_v34  ;;  %v3753_v56 = vor.u32 %v3752_v45, %v3751_v50  ;;  %v3756_v62 = vor.u32 %v3755_v52, %v3754_v8 }
0x1097   :  { %v3759_v29 = vor.u32 %v3758_v57, %v3757_v7  ;;  %v3776_v41 = vshll.u32 %v3736_v30, 8 }
0x1098   :  { %v3765_v63 = vsel %vm3763_vm2, %v3753_v56, 2102212464  ;;  %v3768_v32 = vsel %vm3760_vm1, %v3747_v22, %v3750_v58  ;;  %v3772_v6 = vsel %vm3760_vm1, %v3750_v58, %v3753_v56  ;;  %v3769_v35 = vsel %vm3763_vm2, %v3756_v62, 920167782 }
0x1099   :  { %v3773_v2 = vsel %vm3763_vm2, %v3759_v29, 1326507024  ;;  %v3770_v38 = vsel %vm3762_vm3, %v3753_v56, %v3769_v35  ;;  %v3764_v20 = vsel %vm3760_vm1, %v3744_v10, %v3747_v22  ;;  %v3766_v21 = vsel %vm3762_vm3, %v3750_v58, %v3765_v63 }
0x109a   :  { %v3774_v4 = vsel %vm3762_vm3, %v3756_v62, %v3773_v2  ;;  %v3771_v51 = vsel %vm3761_vm9, %v3768_v32, %v3770_v38  ;;  %v3767_v15 = vsel %vm3761_vm9, %v3764_v20, %v3766_v21  ;;  %vm4165_vm1 = vcmask 7174  }
0x109b   :  { %v3775_v17 = vsel %vm3761_vm9, %v3772_v6, %v3774_v4  ;;  %v5845_v19 = vmul.u32.u64.low %v3776_v41, %v3771_v51  ;;  %v5846_v24 = vmul.u32.u64.high %v3776_v41, %v3771_v51, %v5845_v19  ;;  %v3783_v61 = vmul.u32 %v3776_v41, %v3767_v15  ;;  %v4575_v52 = vpop.eup %4574 }
0x109c   :  { %v5842_v33 = vmul.u32.u64.low %v3776_v41, %v3775_v17  ;;  %v5843_v47 = vmul.u32.u64.high %v3776_v41, %v3775_v17, %v5842_v33  ;;  %v3710_v30 = vadd.f32 1.0, %v4575_v52  ;;  %v3714_v41 = vmul.f32 0.5, %v5816_v43 }
0x109d   :  { %v3786_v27 = vadd.s32 1, %v5846_v24 }
0x109e   :  { %vm3785_vm4 = vc.u32 %v5843_v47, %v5845_v19  ;;  %v3784_v34 = vadd.s32 %v5845_v19, %v5843_v47  ;;  %v3711_v62 = vmul.f32 0.5, %v3710_v30  ;;  %v3715_v17 = vmul.f32 %v4575_v52, %v3714_v41 }
0x109f   :  { %v3787_v25 = vsel %vm3785_vm4, %v3786_v27, %v5846_v24 }
0x10a0   :  { %v3788_v44 = vadd.s32 %v3787_v25, %v3783_v61  ;;  %4576 = vrsqrt.f32 %v3711_v62 }
0x10a2   :  { %v3789_v9 = vadd.s32 536870912, %v3788_v44 }
0x10a4   :  { %v3790_v26 = vshrl.u32 %v3789_v9, 30 }
0x10a6   :  { %v3791_v39 = vshll.u32 %v3790_v26, 30  ;;  %v3814_v32 = vsub.s32 4, %v3790_v26 }
0x10a8   :  { %v3792_v16 = vsub.s32 %v3788_v44, %v3791_v39  ;;  %v3815_v35 = vsel %vm3730_vm6, %v3814_v32, %v3790_v26 }
0x10a9   :  { %v3817_v2 = vsel %vm3729_vm7, 0, %v3815_v35 }
0x10aa   :  { %v3794_v46 = vsub.s32 0, %v3792_v16  ;;  %v3924_v38 = vadd.s32 3, %v3817_v2  ;;  %v3821_v20 = vand.u32 3, %v3817_v2 }
0x10ac   :  { %v4256_v36 = vmin.u32 %v3794_v46, %v3792_v16  ;;  %v3925_v21 = vand.u32 3, %v3924_v38  ;;  %vm3826_vm10 = vcmp.eq.s32.totalorder %v3821_v20, 2  ;;  %vm3823_vm12 = vcmp.eq.s32.totalorder %v3821_v20, 0 }
0x10ad   :  { %v4577_v4 = vpop.eup %4576  ;;  %vm3822_vm14 = vcmp.lt.s32.totalorder %v3821_v20, 2 }
0x10ae   :  { %v3796_v42 = vclz %v4256_v36  ;;  %v3713_v47 = vmul.f32 %v4577_v4, %v3711_v62  ;;  %v3716_v24 = vmul.f32 %v4577_v4, %v3715_v17  ;;  %vm3930_vm11 = vcmp.eq.s32.totalorder %v3925_v21, 2 }
0x10af   :  { %vm3927_vm13 = vcmp.eq.s32.totalorder %v3925_v21, 0  ;;  %vm3926_vm15 = vcmp.lt.s32.totalorder %v3925_v21, 2 }
0x10b0   :  { %v4257_v49 = vadd.s32 4294967294, %v3796_v42  ;;  %v3946_v39 = vrot.slane %v3713_v47, %v4751_v5 }
0x10b2   :  { %vm4258_vm5 = vcmp.lt.s32.totalorder %v4257_v49, 0 }
0x10b3   :  { %v3799_v40 = vsel %vm4258_vm5, 0, %v4257_v49 }
0x10b4   :  { %v3800_v59 = vsub.s32 32, %v3799_v40  ;;  %v3804_v53 = vsub.s32 4294967266, %v3799_v40  ;;  %v3801_v50 = vshll.u32 %v3792_v16, %v3799_v40  ;;  %v3951_v16 = vrot.slane %v3716_v24, %v4751_v5 }
0x10b6   :  { %v3802_v45 = vshrl.u32 %v3784_v34, %v3800_v59  ;;  %v3805_v8 = vadd.s32 127, %v3804_v53 }
0x10b8   :  { %v3803_v7 = vor.u32 %v3802_v45, %v3801_v50  ;;  %v3806_v57 = vshll.u32 %v3805_v8, 23 }
0x10ba   :  { %v3807_v22 = vor.u32 4788187, %v3806_v57  ;;  %v3810_v56 = vcvt.s32.f32 %v3803_v7 }
0x10bc   :  { %v3808_v58 = vand.u32 2147483647, %v3807_v22 }
0x10be   :  { %v3811_v29 = vmul.f32 %v3810_v56, %v3808_v58 }
0x10c0   :  { %v3812_v63 = vxor.u32 2147483648, %v3811_v29 }
0x10c2   :  { %v3813_v6 = vsel %vm3730_vm6, %v3812_v63, %v3811_v29 }
0x10c3   :  { %v3816_v10 = vsel %vm3729_vm7, %v5825_v28, %v3813_v6 }
0x10c4   :  { %4578 = vcosq.f32 %v3816_v10 }
0x10c5   :  { %4580 = vsinq.f32 %v3816_v10 }
0x10d1   :  { %v4579_v51 = vpop.eup %4578 }
0x10d2   :  { %v4581_v33 = vpop.eup %4580  ;;  %v3827_v19 = vxor.u32 2147483648, %v4579_v51 }
0x10d3   :  { %v3824_v31 = vxor.u32 2147483648, %v4581_v33 }
0x10d4   :  { %v3828_v15 = vsel %vm3826_vm10, %v3827_v19, %v4581_v33  ;;  %v3932_v27 = vsel %vm3930_vm11, %v3827_v19, %v4581_v33 }
0x10d5   :  { %v3825_v61 = vsel %vm3823_vm12, %v4579_v51, %v3824_v31  ;;  %v3929_v25 = vsel %vm3927_vm13, %v4579_v51, %v3824_v31 }
0x10d6   :  { %v3829_v43 = vsel %vm3822_vm14, %v3825_v61, %v3828_v15  ;;  %v3933_v44 = vsel %vm3926_vm15, %v3929_v25, %v3932_v27 }
0x10d7   :  { %v3830_v23 = vsel %vm3820_vm0, nan, %v3829_v43  ;;  %v3934_v9 = vsel %vm3820_vm0, nan, %v3933_v44 }
0x10d8   :  { %v3935_v26 = vsub.f32 0.0, %v3934_v9  ;;  %v3937_v37 = vmul.f32 0.70710677, %v3830_v23 }
0x10da   :  { %v3939_v46 = vmul.f32 0.70710677, %v3935_v26  ;;  %v3941_v36 = vsub.f32 0.0, %v3935_v26  ;;  %v3947_v42 = vmul.f32 %v3946_v39, %v3937_v37  ;;  %v3952_v49 = vmul.f32 %v3951_v16, %v3937_v37 }
0x10dc   :  { %v3942_v40 = vmul.f32 0.70710677, %v3941_v36  ;;  %v3953_v34 = vsub.f32 %v3947_v42, %v3952_v49  ;;  %v3959_v59 = vadd.f32 %v3952_v49, %v3947_v42  ;;  %v3960_v53 = vmul.f32 %v3951_v16, %v3939_v46 }
0x10dd   :  { %v3954_v50 = vmul.f32 %v3946_v39, %v3939_v46 }
0x10de   :  { %v3955_v28 = vmul.f32 %v3951_v16, %v3942_v40  ;;  %v3961_v45 = vmul.f32 %v3946_v39, %v3942_v40  ;;  %v3967_v8 = vmul.f32 %v3953_v34, %v3951_v16  ;;  %v3973_v52 = vmul.f32 %v3959_v59, %v3951_v16 }
0x10df   :  { %v3963_v30 = vmul.f32 %v3953_v34, %v3946_v39  ;;  %v3969_v22 = vmul.f32 %v3959_v59, %v3946_v39 }
0x10e0   :  { %v3956_v7 = vsub.f32 %v3954_v50, %v3955_v28  ;;  %v3962_v57 = vadd.f32 %v3961_v45, %v3960_v53 }
0x10e2   :  { %v3964_v58 = vmul.f32 %v3956_v7, %v3951_v16  ;;  %v3966_v56 = vmul.f32 %v3956_v7, %v3946_v39  ;;  %v3970_v62 = vmul.f32 %v3962_v57, %v3951_v16  ;;  %v3972_v29 = vmul.f32 %v3962_v57, %v3946_v39 }
0x10e4   :  { %v3965_v63 = vadd.f32 %v3964_v58, %v3963_v30  ;;  %v3968_v32 = vsub.f32 %v3966_v56, %v3967_v8  ;;  %v3971_v6 = vsub.f32 %v3969_v22, %v3970_v62  ;;  %v3974_v10 = vadd.f32 %v3973_v52, %v3972_v29 }
0x10e6   :  { %v3975_v35 = vmul.f32 %v5691_v3, %v3965_v63  ;;  %v3976_v2 = vmul.f32 %v5697_v11, %v3974_v10  ;;  %v3978_v38 = vmul.f32 %v5691_v3, %v3968_v32  ;;  %v3979_v4 = vmul.f32 %v5697_v11, %v3971_v6 }
0x10e7   :  { %v3981_v41 = vmul.f32 %v5697_v11, %v3968_v32  ;;  %v3982_v20 = vmul.f32 %v5691_v3, %v3971_v6  ;;  %v3984_v21 = vmul.f32 %v5691_v3, %v3974_v10  ;;  %v3985_v51 = vmul.f32 %v5697_v11, %v3965_v63 }
0x10e8   :  { %v3977_v17 = vadd.f32 %v3976_v2, %v3975_v35  ;;  %v3980_v33 = vsub.f32 %v3978_v38, %v3979_v4 }
0x10e9   :  { %v3983_v47 = vadd.f32 %v3982_v20, %v3981_v41  ;;  %v3986_v19 = vsub.f32 %v3984_v21, %v3985_v51 }
0x10ea   :  { %v3987_v24 = vmul.f32 %v5709_v18, %v3977_v17  ;;  %v3990_v31 = vmul.f32 %v5709_v18, %v3980_v33  ;;  %v3993_v15 = vmul.f32 %v5716_v1, %v3977_v17  ;;  %v3996_v27 = vmul.f32 %v5716_v1, %v3980_v33 }
0x10eb   :  { %v3988_v61 = vmul.f32 %v5716_v1, %v3983_v47  ;;  %v3991_v25 = vmul.f32 %v5716_v1, %v3986_v19  ;;  %v3994_v43 = vmul.f32 %v5709_v18, %v3983_v47  ;;  %v3997_v44 = vmul.f32 %v5709_v18, %v3986_v19 }
0x10ed   :  { %v3989_v23 = vsub.f32 %v3987_v24, %v3988_v61  ;;  %v3992_v9 = vsub.f32 %v3990_v31, %v3991_v25  ;;  %v3995_v26 = vadd.f32 %v3994_v43, %v3993_v15  ;;  %v3998_v37 = vadd.f32 %v3997_v44, %v3996_v27 }
0x10ef   :  { %v3999_v39 = vmul.f32 %v5727_v48, %v3989_v23  ;;  %v4000_v16 = vmul.f32 %v5733_v60, %v3992_v9  ;;  %v4002_v46 = vmul.f32 %v5727_v48, %v3992_v9  ;;  %v4003_v36 = vmul.f32 %v5733_v60, %v3989_v23 }
0x10f0   :  { %v4005_v42 = vmul.f32 %v5727_v48, %v3995_v26  ;;  %v4006_v49 = vmul.f32 %v5733_v60, %v3998_v37  ;;  %v4008_v40 = vmul.f32 %v5727_v48, %v3998_v37  ;;  %v4009_v34 = vmul.f32 %v5733_v60, %v3995_v26 }
0x10f1   :  { %v4001_v59 = vadd.f32 %v4000_v16, %v3999_v39  ;;  %v4004_v53 = vsub.f32 %v4002_v46, %v4003_v36 }
0x10f2   :  { %v4007_v50 = vsub.f32 %v4005_v42, %v4006_v49  ;;  %v4010_v28 = vadd.f32 %v4009_v34, %v4008_v40 }
0x10f3   :  { %v4011_v45 = vmul.f32 %v5691_v3, %v4001_v59  ;;  %v4014_v8 = vmul.f32 %v5691_v3, %v4004_v53  ;;  %v4017_v52 = vmul.f32 %v5697_v11, %v4004_v53  ;;  %v4021_v7 = vmul.f32 %v5697_v11, %v4001_v59 }
0x10f4   :  { %v4012_v57 = vmul.f32 %v5697_v11, %v4010_v28  ;;  %v4015_v30 = vmul.f32 %v5697_v11, %v4007_v50  ;;  %v4018_v22 = vmul.f32 %v5691_v3, %v4007_v50  ;;  %v4020_v58 = vmul.f32 %v5691_v3, %v4010_v28 }
0x10f6   :  { %v4013_v56 = vadd.f32 %v4012_v57, %v4011_v45  ;;  %v4016_v62 = vsub.f32 %v4014_v8, %v4015_v30  ;;  %v4019_v29 = vadd.f32 %v4018_v22, %v4017_v52  ;;  %v4022_v63 = vsub.f32 %v4020_v58, %v4021_v7 }
0x10f8   :  { %v4023_v32 = vmul.f32 %v5709_v18, %v4013_v56  ;;  %v4024_v6 = vmul.f32 %v5716_v1, %v4019_v29  ;;  %v4026_v10 = vmul.f32 %v5709_v18, %v4016_v62  ;;  %v4027_v35 = vmul.f32 %v5716_v1, %v4022_v63 }
0x10f9   :  { %v4029_v2 = vmul.f32 %v5716_v1, %v4013_v56  ;;  %v4030_v11 = vmul.f32 %v5709_v18, %v4019_v29  ;;  %v4032_v38 = vmul.f32 %v5716_v1, %v4016_v62  ;;  %v4033_v3 = vmul.f32 %v5709_v18, %v4022_v63 }
0x10fa   :  { %v4025_v4 = vsub.f32 %v4023_v32, %v4024_v6  ;;  %v4028_v41 = vsub.f32 %v4026_v10, %v4027_v35 }
0x10fb   :  { %v4031_v20 = vadd.f32 %v4030_v11, %v4029_v2  ;;  %v4034_v21 = vadd.f32 %v4033_v3, %v4032_v38 }
0x10fc   :  { %v4035_v51 = vmul.f32 %v5727_v48, %v4025_v4  ;;  %v4036_v17 = vmul.f32 %v5733_v60, %v4028_v41  ;;  %v4038_v33 = vmul.f32 %v5727_v48, %v4028_v41  ;;  %v4039_v47 = vmul.f32 %v5733_v60, %v4025_v4 }
0x10fd   :  { %v4041_v19 = vmul.f32 %v5727_v48, %v4031_v20  ;;  %v4042_v24 = vmul.f32 %v5733_v60, %v4034_v21  ;;  %v4044_v1 = vmul.f32 %v5727_v48, %v4034_v21  ;;  %v4045_v18 = vmul.f32 %v5733_v60, %v4031_v20 }
0x10fe   :  { %v4037_v31 = vadd.f32 %v4036_v17, %v4035_v51  ;;  %v4040_v15 = vsub.f32 %v4038_v33, %v4039_v47 }
0x10ff   :  { %v4043_v27 = vsub.f32 %v4041_v19, %v4042_v24  ;;  %v4046_v61 = vadd.f32 %v4045_v18, %v4044_v1 }
0x1100   :  { %v4047_v25 = vmul.f32 %v4037_v31, %v4037_v31  ;;  %v4048_v43 = vmul.f32 %v4040_v15, %v4040_v15 }
0x1101   :  { %v4050_v44 = vmul.f32 %v4043_v27, %v4043_v27  ;;  %v4051_v23 = vmul.f32 %v4046_v61, %v4046_v61 }
0x1102   :  { %v4049_v9 = vadd.f32 %v4048_v43, %v4047_v25 }
0x1103   :  { %v4052_v26 = vadd.f32 %v4051_v23, %v4050_v44 }
0x1105   :  { %v4053_v37 = vsub.f32 %v4049_v9, %v4052_v26 }
0x1107   :  { %v4054_v39 = vmul.f32 %v5769_v54, %v4053_v37  ;;  %v26_v54 = vld [vmem:[%s5924_s1 + $0x78] sm:$0xff] }
0x1108   :  { %v4148_v28 = vrot.slane %v26_v54, %v4751_v5 }
0x1109   :  { %4448 = vmatmul.mubr.msk.f32.vlgmr.msra.gmra.mxu1 %vm453_vm8, %v4054_v39  ;;  %vm4150_vm8 = vcmask 261126  }
0x11c9   :  { %v4124_v16 = vpop.f32.mrf.mxu1 }
0x11ca   :  { %v4125_v48 = vadd.f32 %v5793_v13, %v4124_v16 }
0x11cb   :  { %v4449_v46 = vpop.f32.mrf.mxu1 }
0x11cc   :  { %4582 = vtanh.f32 %v4125_v48 }
0x11d9   :  { %v4583_v60 = vpop.eup %4582 }
0x11da   :  { %v4129_v36 = vmul.f32 %v5799_v0, %v4583_v60 }
0x11dc   :  { %v4130_v42 = vadd.f32 %v5805_v12, %v4129_v36  ;;  %v4156_v12 = vsub.s32 1, %v4747_v55 }
0x11de   :  { %v4133_v49 = vrot.slane %v4130_v42, 2  ;;  %v4131_v34 = vmul.f32 %v4130_v42, %v5809_v14  ;;  %v4157_v52 = vrot.slane %v26_v54, %v4156_v12 }
0x11e0   :  { %v4135_v40 = vmul.f32 %v4133_v49, %v4130_v42 }
0x11e2   :  { %v4137_v59 = vrot.slane %v4135_v40, 2 }
0x11e4   :  { %v4139_v53 = vadd.f32 %v4137_v59, %v4131_v34 }
0x11e6   :  { %4584 = vtanh.f32 %v4139_v53 }
0x11f3   :  { %v4585_v50 = vpop.eup %4584 }
0x11f4   :  { %v4142_v13 = vrot.slane %v4585_v50, 2 }
0x11f6   :  { %v4144_v45 = vmul.f32 %v4142_v13, %v4130_v42 }
0x11f8   :  { %v4149_v0 = vmul.f32 %v4148_v28, %v4144_v45 }
0x11fa   :  { %v4151_v8 = vsel %vm4150_vm8, %v4149_v0, 0.0 }
0x11fb   :  { %4152 = vadd.xlane.f32.xlu0 %v4151_v8 }
0x1284   :  { %v4153_v14 = vpop.xlane.xlu0 %4152 }
0x1285   :  { %v4158_v7 = vadd.f32 %v4157_v52, %v4153_v14 }
0x1287   :  { %v4265_v57 = vmul.f32 -1.442695, %v4158_v7 }
0x1289   :  { %4586 = vpow2.f32 %v4265_v57 }
0x1296   :  { %v4587_v30 = vpop.eup %4586 }
0x1297   :  { %v4162_v22 = vadd.f32 1.0, %v4587_v30 }
0x1299   :  { %4588 = vrcp.f32 %v4162_v22 }
0x12a6   :  { %v4589_v58 = vpop.eup %4588 }
0x12a7   :  { %4166 = vst.msk [vmem:[%s5926_s2 - $0x6] sm:$0xc0] %vm4165_vm1, %v4589_v58 }

</bundles_post_ra>
